<compile_context>
chip_gen: v7x
topology: tpu7x:2x2x1
jax: 0.10.0
libtpu: 0.0.40
codegen_flags: <defaults>
</compile_context>

<pallas_src>
import jax
import jax.numpy as jnp
from jax import lax
from jax.experimental import pallas as pl
from jax.experimental.pallas import tpu as pltpu

BN_EPS = 1e-5
MM_DTYPE = jnp.bfloat16      # matmul operand / scratch / intermediate-store dtype
STORE_DTYPE = jnp.bfloat16   # dtype of conv outputs stored to HBM between kernels
LANE = 128                   # lane width: channel dims padded to multiples of this
VMEM_LIMIT = 32 * 1024 * 1024


def _round_up(x, m):
    return (x + m - 1) // m * m


# ----------------------------- Pallas kernels ------------------------------ #

def _conv1_shortcut_stats_kernel(x_ref, w1p_ref, ws_ref,
                                 y1_ref, m1_ref, q1_ref, ms_ref, qs_ref,
                                 xpad_ref):
    # x_ref:   (1, H, W, Cin)   bf16 (channel-padded)
    # w1p_ref: (3, 3*Cin, Cout) bf16 (kh-major packing of the 3x3 kernel)
    # ws_ref:  (Cin, Cout)      bf16
    # y1_ref:  (1, H, W, Cout)  bf16
    # m1/q1/ms/qs: (1, 1, Cout) f32 per-image mean / centered sum-of-squares
    # xpad_ref: (H+2, W+2, Cin) bf16 VMEM scratch (halo-padded copy of x)
    H, W, Cout = y1_ref.shape[1], y1_ref.shape[2], y1_ref.shape[3]
    Cin = x_ref.shape[3]
    inv_cnt = 1.0 / float(H * W)

    x = x_ref[0]                                           # (H, W, Cin) bf16

    # Halo padding: two zero border rows + aligned interior rows built as a
    # value-level concat (no full-buffer zeroing, no sublane-offset stores).
    zrow = jnp.zeros((1, W + 2, Cin), MM_DTYPE)
    zcol = jnp.zeros((H, 1, Cin), MM_DTYPE)
    xpad_ref[0:1, :, :] = zrow
    xpad_ref[H + 1:H + 2, :, :] = zrow
    xpad_ref[1:H + 1, :, :] = jnp.concatenate([zcol, x, zcol], axis=1)
    xp = xpad_ref[...]                                     # (H+2, W+2, Cin) bf16

    # conv1 as 3 accumulating im2col matmuls over kh (K = 3*Cin each, bf16
    # operands, f32 accumulation).  Only a 3x (not 9x) duplication of the
    # activation is materialized, in bf16.  Conv bias absorbed by bn1.
    y1 = jnp.zeros((H * W, Cout), jnp.float32)
    for kh in range(3):
        rows = jnp.concatenate(
            [xp[kh:kh + H, kw:kw + W, :] for kw in range(3)],
            axis=-1).reshape(H * W, 3 * Cin)
        y1 = y1 + jnp.dot(rows, w1p_ref[kh],
                          preferred_element_type=jnp.float32)

    y1_ref[0] = y1.reshape(H, W, Cout).astype(y1_ref.dtype)

    # Per-image BN1 partial stats (centered, from the f32 accumulator).
    mean1 = jnp.sum(y1, axis=0, keepdims=True) * inv_cnt
    m1_ref[0] = mean1
    q1_ref[0] = jnp.sum((y1 - mean1) ** 2, axis=0, keepdims=True)

    # Shortcut 1x1 conv: only its BN statistics are needed here; the values
    # are recomputed (cheap MXU work) in the epilogue kernel -> no HBM
    # round-trip of ys.
    ys = jnp.dot(x.reshape(H * W, Cin), ws_ref[...],
                 preferred_element_type=jnp.float32)
    means = jnp.sum(ys, axis=0, keepdims=True) * inv_cnt
    ms_ref[0] = means
    qs_ref[0] = jnp.sum((ys - means) ** 2, axis=0, keepdims=True)


def _bn1_relu_conv2_stats_kernel(y1_ref, sc1_ref, sh1_ref, w2p_ref,
                                 y2_ref, m2_ref, q2_ref, hpad_ref):
    # y1_ref: (1,H,W,C) bf16   sc1/sh1: (1,C) f32   w2p_ref: (3, 3*C, C) bf16
    # y2_ref: (1,H,W,C) bf16   m2/q2: (1,1,C) f32   hpad_ref: (H+2,W+2,C) bf16
    H, W, C = y2_ref.shape[1], y2_ref.shape[2], y2_ref.shape[3]
    inv_cnt = 1.0 / float(H * W)

    # Fused bn1-apply + relu; element-wise math in f32 (v5e has no bf16 VPU).
    # TODO(synk): on v6e/v7x this could run in bf16 to halve VPU/vreg traffic.
    h = jnp.maximum(
        y1_ref[0].astype(jnp.float32) * sc1_ref[...] + sh1_ref[...],
        0.0).astype(MM_DTYPE)                              # (H, W, C) bf16

    zrow = jnp.zeros((1, W + 2, C), MM_DTYPE)
    zcol = jnp.zeros((H, 1, C), MM_DTYPE)
    hpad_ref[0:1, :, :] = zrow
    hpad_ref[H + 1:H + 2, :, :] = zrow
    hpad_ref[1:H + 1, :, :] = jnp.concatenate([zcol, h, zcol], axis=1)
    hp = hpad_ref[...]

    y2 = jnp.zeros((H * W, C), jnp.float32)
    for kh in range(3):
        rows = jnp.concatenate(
            [hp[kh:kh + H, kw:kw + W, :] for kw in range(3)],
            axis=-1).reshape(H * W, 3 * C)
        y2 = y2 + jnp.dot(rows, w2p_ref[kh],
                          preferred_element_type=jnp.float32)

    y2_ref[0] = y2.reshape(H, W, C).astype(y2_ref.dtype)
    mean2 = jnp.sum(y2, axis=0, keepdims=True) * inv_cnt
    m2_ref[0] = mean2
    q2_ref[0] = jnp.sum((y2 - mean2) ** 2, axis=0, keepdims=True)


def _shortcut_bn_add_relu_kernel(x_ref, y2_ref, ws_ref,
                                 sc2_ref, sh2_ref, scs_ref, shs_ref, o_ref):
    # x_ref: (1,H,W,Cin) bf16   y2_ref: (1,H,W,C) bf16   ws_ref: (Cin,C) bf16
    # sc2/sh2/scs/shs: (1,C) f32   o_ref: (1,H,W,C) f32
    H, W, C = o_ref.shape[1], o_ref.shape[2], o_ref.shape[3]
    Cin = x_ref.shape[3]

    # Recompute the tiny 1x1 shortcut conv under the epilogue (hides in MXU slack).
    xs = x_ref[0].reshape(H * W, Cin)                      # bf16
    ys = jnp.dot(xs, ws_ref[...],
                 preferred_element_type=jnp.float32).reshape(H, W, C)

    out = (y2_ref[0].astype(jnp.float32) * sc2_ref[...] + sh2_ref[...]
           + ys * scs_ref[...] + shs_ref[...])
    o_ref[0] = jnp.maximum(out, 0.0)


# ------------------------------ Pallas wrappers ---------------------------- #

def conv1_and_shortcut_stats(x, w1p, ws):
    N, H, W, Cin = x.shape
    Cout = w1p.shape[-1]
    stat_shape = jax.ShapeDtypeStruct((N, 1, Cout), jnp.float32)
    stat_spec = pl.BlockSpec((1, 1, Cout), lambda n: (n, 0, 0))
    return pl.pallas_call(
        _conv1_shortcut_stats_kernel,
        out_shape=(jax.ShapeDtypeStruct((N, H, W, Cout), STORE_DTYPE),
                   stat_shape, stat_shape, stat_shape, stat_shape),
        grid=(N,),
        in_specs=[
            pl.BlockSpec((1, H, W, Cin), lambda n: (n, 0, 0, 0)),
            pl.BlockSpec((3, 3 * Cin, Cout), lambda n: (0, 0, 0)),
            pl.BlockSpec((Cin, Cout), lambda n: (0, 0)),
        ],
        out_specs=(pl.BlockSpec((1, H, W, Cout), lambda n: (n, 0, 0, 0)),
                   stat_spec, stat_spec, stat_spec, stat_spec),
        scratch_shapes=[pltpu.VMEM((H + 2, W + 2, Cin), MM_DTYPE)],
        compiler_params=pltpu.CompilerParams(
            dimension_semantics=("parallel",),
            vmem_limit_bytes=VMEM_LIMIT),
    )(x, w1p, ws)


def bn1_relu_conv2_stats(y1, sc1, sh1, w2p):
    N, H, W, C = y1.shape
    stat_shape = jax.ShapeDtypeStruct((N, 1, C), jnp.float32)
    stat_spec = pl.BlockSpec((1, 1, C), lambda n: (n, 0, 0))
    row_spec = pl.BlockSpec((1, C), lambda n: (0, 0))
    return pl.pallas_call(
        _bn1_relu_conv2_stats_kernel,
        out_shape=(jax.ShapeDtypeStruct((N, H, W, C), STORE_DTYPE),
                   stat_shape, stat_shape),
        grid=(N,),
        in_specs=[
            pl.BlockSpec((1, H, W, C), lambda n: (n, 0, 0, 0)),
            row_spec, row_spec,
            pl.BlockSpec((3, 3 * C, C), lambda n: (0, 0, 0)),
        ],
        out_specs=(pl.BlockSpec((1, H, W, C), lambda n: (n, 0, 0, 0)),
                   stat_spec, stat_spec),
        scratch_shapes=[pltpu.VMEM((H + 2, W + 2, C), MM_DTYPE)],
        compiler_params=pltpu.CompilerParams(
            dimension_semantics=("parallel",),
            vmem_limit_bytes=VMEM_LIMIT),
    )(y1, sc1, sh1, w2p)


def shortcut_bn_add_relu(x, y2, ws, sc2, sh2, scs, shs):
    N, H, W, Cin = x.shape
    C = y2.shape[3]
    row_spec = pl.BlockSpec((1, C), lambda n: (0, 0))
    return pl.pallas_call(
        _shortcut_bn_add_relu_kernel,
        out_shape=jax.ShapeDtypeStruct((N, H, W, C), jnp.float32),
        grid=(N,),
        in_specs=[
            pl.BlockSpec((1, H, W, Cin), lambda n: (n, 0, 0, 0)),
            pl.BlockSpec((1, H, W, C), lambda n: (n, 0, 0, 0)),
            pl.BlockSpec((Cin, C), lambda n: (0, 0)),
            row_spec, row_spec, row_spec, row_spec,
        ],
        out_specs=pl.BlockSpec((1, H, W, C), lambda n: (n, 0, 0, 0)),
        compiler_params=pltpu.CompilerParams(
            dimension_semantics=("parallel",),
            vmem_limit_bytes=VMEM_LIMIT),
    )(x, y2, ws, sc2, sh2, scs, shs)


# ------------------------------- BasicBlock -------------------------------- #

def _bn_scale_shift(mean_n, q_n, per_image_count, gamma, beta):
    # mean_n / q_n: (N, 1, C) per-image mean and centered sum of squares.
    # Welford-style combine across images (numerically safer than
    # E[x^2] - E[x]^2 over all N*H*W elements).
    n_img = mean_n.shape[0]
    total = per_image_count * n_img
    grand_mean = jnp.sum(mean_n, axis=0) / n_img                   # (1, C)
    within = jnp.sum(q_n, axis=0)                                  # (1, C)
    between = per_image_count * jnp.sum((mean_n - grand_mean) ** 2, axis=0)
    var = jnp.maximum((within + between) / total, 0.0)
    scale = gamma / jnp.sqrt(var + BN_EPS)
    shift = beta - grand_mean * scale
    return scale, shift


def basic_block_forward(x, p):
    N, H, W, Cin = x.shape
    Cout = p["w1"].shape[-1]
    per_image_count = float(H * W)

    # Lane-dense packing: pad channels to multiples of 128.
    Cinp = max(_round_up(Cin, LANE), LANE)
    Coutp = max(_round_up(Cout, LANE), LANE)

    xp = jnp.pad(x, ((0, 0), (0, 0), (0, 0), (0, Cinp - Cin))).astype(MM_DTYPE)

    w1p = jnp.pad(p["w1"], ((0, 0), (0, 0), (0, Cinp - Cin), (0, Coutp - Cout))
                  ).reshape(3, 3 * Cinp, Coutp).astype(MM_DTYPE)
    w2p = jnp.pad(p["w2"], ((0, 0), (0, 0), (0, Coutp - Cout), (0, Coutp - Cout))
                  ).reshape(3, 3 * Coutp, Coutp).astype(MM_DTYPE)
    wsp = jnp.pad(p["ws"], ((0, Cinp - Cin), (0, Coutp - Cout))).astype(MM_DTYPE)

    def pad_row(a):
        return jnp.pad(a, ((0, 0), (0, Coutp - Cout)))

    g1, be1 = pad_row(p["g1"]), pad_row(p["be1"])
    g2, be2 = pad_row(p["g2"]), pad_row(p["be2"])
    gs, bes = pad_row(p["gs"]), pad_row(p["bes"])
    # NOTE: conv biases b1/b2/bs are exactly absorbed by the batch-stat BNs
    # that follow (they only shift the batch mean), so they are not passed
    # to the kernels (checked in main).

    # K1: conv1 + bn1 stats + shortcut stats
    y1, m1, q1, ms, qs = conv1_and_shortcut_stats(xp, w1p, wsp)
    sc1, sh1 = _bn_scale_shift(m1, q1, per_image_count, g1, be1)
    scs, shs = _bn_scale_shift(ms, qs, per_image_count, gs, bes)

    # K2: bn1 + relu + conv2 + bn2 stats
    y2, m2, q2 = bn1_relu_conv2_stats(y1, sc1, sh1, w2p)
    sc2, sh2 = _bn_scale_shift(m2, q2, per_image_count, g2, be2)

    # K3: shortcut conv + bn2 + bn_s + add + relu; drop the channel padding.
    out_p = shortcut_bn_add_relu(xp, y2, wsp, sc2, sh2, scs, shs)
    return out_p[..., :Cout]


# ---------------------------- pure-JAX reference ---------------------------- #

def basic_block_ref(x, p, *, mm_dtype=jnp.float32, store_dtype=jnp.float32):
    """Reference. mm_dtype = conv operand dtype (always f32 accumulation);
    store_dtype = dtype conv1/conv2 outputs are rounded to before the BN apply
    (statistics always taken from the f32 accumulator), mirroring the kernels.
    Defaults reproduce the exact f32 PyTorch math."""
    def conv(inp, w, b, pad):
        y = lax.conv_general_dilated(
            inp.astype(mm_dtype), w.astype(mm_dtype), (1, 1), pad,
            dimension_numbers=("NHWC", "HWIO", "NHWC"),
            preferred_element_type=jnp.float32)
        return y + b.reshape(1, 1, 1, -1)

    def bn(y_stats, y_apply, gamma, beta):
        mean = jnp.mean(y_stats, axis=(0, 1, 2), keepdims=True)
        var = jnp.mean((y_stats - mean) ** 2, axis=(0, 1, 2), keepdims=True)
        return ((y_apply - mean) / jnp.sqrt(var + BN_EPS)
                * gamma.reshape(1, 1, 1, -1) + beta.reshape(1, 1, 1, -1))

    def rnd(y):
        return y.astype(store_dtype).astype(jnp.float32)

    y1 = conv(x, p["w1"], p["b1"], [(1, 1), (1, 1)])
    h = jax.nn.relu(bn(y1, rnd(y1), p["g1"], p["be1"]))
    y2 = conv(h, p["w2"], p["b2"], [(1, 1), (1, 1)])
    o2 = bn(y2, rnd(y2), p["g2"], p["be2"])
    ys = conv(x, p["ws"][None, None], p["bs"], [(0, 0), (0, 0)])
    os = bn(ys, ys, p["gs"], p["bes"])        # ys is never stored by the kernels
    return jax.nn.relu(o2 + os)


# ----------------------------------- main ----------------------------------- #

if __name__ == "__main__":
    N, H, W = 2, 16, 16
    in_planes, planes = 4, 8          # in_planes != planes => shortcut conv1x1 + BN

    key = jax.random.PRNGKey(0)
    ks = jax.random.split(key, 8)

    params = {
        "w1": 0.1 * jax.random.normal(ks[0], (3, 3, in_planes, planes), jnp.float32),
        "b1": 0.1 * jax.random.normal(ks[1], (1, planes), jnp.float32),
        "g1": jnp.ones((1, planes), jnp.float32),
        "be1": jnp.zeros((1, planes), jnp.float32),
        "w2": 0.1 * jax.random.normal(ks[2], (3, 3, planes, planes), jnp.float32),
        "b2": 0.1 * jax.random.normal(ks[3], (1, planes), jnp.float32),
        "g2": jnp.ones((1, planes), jnp.float32),
        "be2": jnp.zeros((1, planes), jnp.float32),
        "ws": 0.1 * jax.random.normal(ks[4], (in_planes, planes), jnp.float32),
        "bs": 0.1 * jax.random.normal(ks[5], (1, planes), jnp.float32),
        "gs": jnp.ones((1, planes), jnp.float32),
        "bes": jnp.zeros((1, planes), jnp.float32),
    }

    # NHWC input (PyTorch module is NCHW; equivalent to x_nchw.transpose(0, 2, 3, 1))
    x = jax.random.normal(ks[6], (N, H, W, in_planes), jnp.float32)

    out = jax.jit(basic_block_forward)(x, params)
    out = jax.block_until_ready(out)
    assert out.shape == (N, H, W, planes)

    # (a) conv bias followed by a batch-stat BN is bias-invariant (justifies
    #     dropping b1/b2/bs inside the kernels) -- checked in pure f32.
    params_nob = dict(params,
                      b1=jnp.zeros_like(params["b1"]),
                      b2=jnp.zeros_like(params["b2"]),
                      bs=jnp.zeros_like(params["bs"]))
    ref_spec = basic_block_ref(x, params)           # exact f32 PyTorch math
    ref_nob = basic_block_ref(x, params_nob)
    assert float(jnp.max(jnp.abs(ref_spec - ref_nob))) < 1e-5

    # (b) kernel vs matched-precision reference (bf16 matmul operands, bf16
    #     intermediate storage, f32 stats/epilogue -- the kernel's policy).
    ref_matched = basic_block_ref(x, params_nob,
                                  mm_dtype=MM_DTYPE, store_dtype=STORE_DTYPE)
    err_m = float(jnp.max(jnp.abs(out - ref_matched)))
    assert err_m < 5e-2, f"matched-precision mismatch: max abs err {err_m}"

    # (c) sanity envelope vs the exact f32 math (bf16-induced deviation only).
    err_f = float(jnp.max(jnp.abs(out - ref_spec)))
    assert err_f < 2e-1, f"f32-reference deviation too large: max abs err {err_f}"

    print("KERNEL_OK")
</pallas_src>

<mosaic_0001>
module attributes {stable_mosaic.version = 11 : i64} {
  func.func @_conv1_shortcut_stats_kernel(%arg0: i32, %arg1: memref<1x16x16x128xbf16, #tpu.memory_space<vmem>>, %arg2: memref<3x384x128xbf16, #tpu.memory_space<vmem>>, %arg3: memref<128x128xbf16, #tpu.memory_space<vmem>>, %arg4: memref<1x16x16x128xbf16, #tpu.memory_space<vmem>>, %arg5: memref<1x1x128xf32, #tpu.memory_space<vmem>>, %arg6: memref<1x1x128xf32, #tpu.memory_space<vmem>>, %arg7: memref<1x1x128xf32, #tpu.memory_space<vmem>>, %arg8: memref<1x1x128xf32, #tpu.memory_space<vmem>>, %arg9: memref<18x18x128xbf16, #tpu.memory_space<vmem>>) attributes {dimension_semantics = [#tpu.dimension_semantics<parallel>], iteration_bounds = array<i64: 2>, scalar_prefetch = 0 : i64, scratch_operands = 1 : i64, tpu.core_type = #tpu.core_type<tc>, window_params = [{transform_indices = @transform_0, window_bounds = array<i64: 1, 16, 16, 128>}, {pipeline_mode = #tpu.pipeline_mode<synchronous>, transform_indices = @transform_1, window_bounds = array<i64: 3, 384, 128>}, {pipeline_mode = #tpu.pipeline_mode<synchronous>, transform_indices = @transform_2, window_bounds = array<i64: 128, 128>}, {transform_indices = @transform_3, window_bounds = array<i64: 1, 16, 16, 128>}, {transform_indices = @transform_4, window_bounds = array<i64: 1, 1, 128>}, {transform_indices = @transform_5, window_bounds = array<i64: 1, 1, 128>}, {transform_indices = @transform_6, window_bounds = array<i64: 1, 1, 128>}, {transform_indices = @transform_7, window_bounds = array<i64: 1, 1, 128>}]} {
    %c0 = arith.constant 0 : index
    %c0_0 = arith.constant 0 : index
    %c0_1 = arith.constant 0 : index
    %c0_2 = arith.constant 0 : index
    %0 = vector.load %arg1[%c0, %c0_0, %c0_1, %c0_2] : memref<1x16x16x128xbf16, #tpu.memory_space<vmem>>, vector<1x16x16x128xbf16>
    %1 = vector.shape_cast %0 : vector<1x16x16x128xbf16> to vector<16x16x128xbf16>
    %cst = arith.constant 0.000000e+00 : bf16
    %2 = vector.broadcast %cst : bf16 to vector<1x18x128xbf16>
    %cst_3 = arith.constant 0.000000e+00 : bf16
    %3 = vector.broadcast %cst_3 : bf16 to vector<16x1x128xbf16>
    %c0_4 = arith.constant 0 : index
    %c0_5 = arith.constant 0 : index
    %c0_6 = arith.constant 0 : index
    %4 = vector.load %arg9[%c0_4, %c0_5, %c0_6] : memref<18x18x128xbf16, #tpu.memory_space<vmem>>, vector<1x18x128xbf16>
    tpu.vector_store %arg9[%c0_4, %c0_5, %c0_6], %2 {strides = array<i32>} : memref<18x18x128xbf16, #tpu.memory_space<vmem>>, vector<1x18x128xbf16>,
    %c17 = arith.constant 17 : index
    %c0_7 = arith.constant 0 : index
    %c0_8 = arith.constant 0 : index
    %5 = vector.load %arg9[%c17, %c0_7, %c0_8] : memref<18x18x128xbf16, #tpu.memory_space<vmem>>, vector<1x18x128xbf16>
    tpu.vector_store %arg9[%c17, %c0_7, %c0_8], %2 {strides = array<i32>} : memref<18x18x128xbf16, #tpu.memory_space<vmem>>, vector<1x18x128xbf16>,
    %6 = tpu.concatenate %3, %1, %3 in 1 : vector<16x1x128xbf16>, vector<16x16x128xbf16>, vector<16x1x128xbf16> -> vector<16x18x128xbf16>
    %c1 = arith.constant 1 : index
    %c0_9 = arith.constant 0 : index
    %c0_10 = arith.constant 0 : index
    %7 = vector.load %arg9[%c1, %c0_9, %c0_10] : memref<18x18x128xbf16, #tpu.memory_space<vmem>>, vector<16x18x128xbf16>
    tpu.vector_store %arg9[%c1, %c0_9, %c0_10], %6 {strides = array<i32>} : memref<18x18x128xbf16, #tpu.memory_space<vmem>>, vector<16x18x128xbf16>,
    %c0_11 = arith.constant 0 : index
    %c0_12 = arith.constant 0 : index
    %c0_13 = arith.constant 0 : index
    %8 = vector.load %arg9[%c0_11, %c0_12, %c0_13] : memref<18x18x128xbf16, #tpu.memory_space<vmem>>, vector<18x18x128xbf16>
    %cst_14 = arith.constant 0.000000e+00 : f32
    %9 = vector.broadcast %cst_14 : f32 to vector<256x128xf32>
    %10 = vector.extract_strided_slice %8 {offsets = [0, 0, 0], sizes = [16, 16, 128], strides = [1, 1, 1]} : vector<18x18x128xbf16> to vector<16x16x128xbf16>
    %11 = vector.extract_strided_slice %8 {offsets = [0, 1, 0], sizes = [16, 16, 128], strides = [1, 1, 1]} : vector<18x18x128xbf16> to vector<16x16x128xbf16>
    %12 = vector.extract_strided_slice %8 {offsets = [0, 2, 0], sizes = [16, 16, 128], strides = [1, 1, 1]} : vector<18x18x128xbf16> to vector<16x16x128xbf16>
    %13 = tpu.concatenate %10, %11, %12 in 2 : vector<16x16x128xbf16>, vector<16x16x128xbf16>, vector<16x16x128xbf16> -> vector<16x16x384xbf16>
    %14 = vector.shape_cast %13 : vector<16x16x384xbf16> to vector<256x384xbf16>
    %c0_15 = arith.constant 0 : index
    %c0_16 = arith.constant 0 : index
    %c0_17 = arith.constant 0 : index
    %15 = vector.load %arg2[%c0_15, %c0_16, %c0_17] : memref<3x384x128xbf16, #tpu.memory_space<vmem>>, vector<1x384x128xbf16>
    %16 = vector.shape_cast %15 : vector<1x384x128xbf16> to vector<384x128xbf16>
    %cst_18 = arith.constant dense<0.000000e+00> : vector<256x128xf32>
    %17 = tpu.matmul %14, %16, %cst_18 {dimension_numbers = #tpu.dot_dimension_numbers<[1], [0], [0], [1], [0, 0, 1, 1], [], []>} : vector<256x384xbf16>, vector<384x128xbf16>, vector<256x128xf32> -> vector<256x128xf32>
    %18 = arith.addf %9, %17 : vector<256x128xf32>
    %19 = vector.extract_strided_slice %8 {offsets = [1, 0, 0], sizes = [16, 16, 128], strides = [1, 1, 1]} : vector<18x18x128xbf16> to vector<16x16x128xbf16>
    %20 = vector.extract_strided_slice %8 {offsets = [1, 1, 0], sizes = [16, 16, 128], strides = [1, 1, 1]} : vector<18x18x128xbf16> to vector<16x16x128xbf16>
    %21 = vector.extract_strided_slice %8 {offsets = [1, 2, 0], sizes = [16, 16, 128], strides = [1, 1, 1]} : vector<18x18x128xbf16> to vector<16x16x128xbf16>
    %22 = tpu.concatenate %19, %20, %21 in 2 : vector<16x16x128xbf16>, vector<16x16x128xbf16>, vector<16x16x128xbf16> -> vector<16x16x384xbf16>
    %23 = vector.shape_cast %22 : vector<16x16x384xbf16> to vector<256x384xbf16>
    %c1_19 = arith.constant 1 : index
    %c0_20 = arith.constant 0 : index
    %c0_21 = arith.constant 0 : index
    %24 = vector.load %arg2[%c1_19, %c0_20, %c0_21] : memref<3x384x128xbf16, #tpu.memory_space<vmem>>, vector<1x384x128xbf16>
    %25 = vector.shape_cast %24 : vector<1x384x128xbf16> to vector<384x128xbf16>
    %cst_22 = arith.constant dense<0.000000e+00> : vector<256x128xf32>
    %26 = tpu.matmul %23, %25, %cst_22 {dimension_numbers = #tpu.dot_dimension_numbers<[1], [0], [0], [1], [0, 0, 1, 1], [], []>} : vector<256x384xbf16>, vector<384x128xbf16>, vector<256x128xf32> -> vector<256x128xf32>
    %27 = arith.addf %18, %26 : vector<256x128xf32>
    %28 = vector.extract_strided_slice %8 {offsets = [2, 0, 0], sizes = [16, 16, 128], strides = [1, 1, 1]} : vector<18x18x128xbf16> to vector<16x16x128xbf16>
    %29 = vector.extract_strided_slice %8 {offsets = [2, 1, 0], sizes = [16, 16, 128], strides = [1, 1, 1]} : vector<18x18x128xbf16> to vector<16x16x128xbf16>
    %30 = vector.extract_strided_slice %8 {offsets = [2, 2, 0], sizes = [16, 16, 128], strides = [1, 1, 1]} : vector<18x18x128xbf16> to vector<16x16x128xbf16>
    %31 = tpu.concatenate %28, %29, %30 in 2 : vector<16x16x128xbf16>, vector<16x16x128xbf16>, vector<16x16x128xbf16> -> vector<16x16x384xbf16>
    %32 = vector.shape_cast %31 : vector<16x16x384xbf16> to vector<256x384xbf16>
    %c2 = arith.constant 2 : index
    %c0_23 = arith.constant 0 : index
    %c0_24 = arith.constant 0 : index
    %33 = vector.load %arg2[%c2, %c0_23, %c0_24] : memref<3x384x128xbf16, #tpu.memory_space<vmem>>, vector<1x384x128xbf16>
    %34 = vector.shape_cast %33 : vector<1x384x128xbf16> to vector<384x128xbf16>
    %cst_25 = arith.constant dense<0.000000e+00> : vector<256x128xf32>
    %35 = tpu.matmul %32, %34, %cst_25 {dimension_numbers = #tpu.dot_dimension_numbers<[1], [0], [0], [1], [0, 0, 1, 1], [], []>} : vector<256x384xbf16>, vector<384x128xbf16>, vector<256x128xf32> -> vector<256x128xf32>
    %36 = arith.addf %27, %35 : vector<256x128xf32>
    %37 = vector.shape_cast %36 : vector<256x128xf32> to vector<16x16x128xf32>
    %38 = arith.truncf %37 : vector<16x16x128xf32> to vector<16x16x128xbf16>
    %c0_26 = arith.constant 0 : index
    %c0_27 = arith.constant 0 : index
    %c0_28 = arith.constant 0 : index
    %c0_29 = arith.constant 0 : index
    %39 = vector.load %arg4[%c0_26, %c0_27, %c0_28, %c0_29] : memref<1x16x16x128xbf16, #tpu.memory_space<vmem>>, vector<1x16x16x128xbf16>
    %40 = vector.shape_cast %39 : vector<1x16x16x128xbf16> to vector<16x16x128xbf16>
    %41 = vector.shape_cast %38 : vector<16x16x128xbf16> to vector<1x16x16x128xbf16>
    tpu.vector_store %arg4[%c0_26, %c0_27, %c0_28, %c0_29], %41 {strides = array<i32>} : memref<1x16x16x128xbf16, #tpu.memory_space<vmem>>, vector<1x16x16x128xbf16>,
    %cst_30 = arith.constant dense<0.000000e+00> : vector<128xf32>
    %42 = vector.multi_reduction <add>, %36, %cst_30 [0] : vector<256x128xf32> to vector<128xf32>
    %43 = vector.shape_cast %42 : vector<128xf32> to vector<1x128xf32>
    %cst_31 = arith.constant 3.906250e-03 : f32
    %44 = vector.broadcast %cst_31 : f32 to vector<1x128xf32>
    %45 = arith.mulf %43, %44 : vector<1x128xf32>
    %c0_32 = arith.constant 0 : index
    %c0_33 = arith.constant 0 : index
    %c0_34 = arith.constant 0 : index
    %46 = vector.load %arg5[%c0_32, %c0_33, %c0_34] : memref<1x1x128xf32, #tpu.memory_space<vmem>>, vector<1x1x128xf32>
    %47 = vector.shape_cast %46 : vector<1x1x128xf32> to vector<1x128xf32>
    %48 = vector.shape_cast %45 : vector<1x128xf32> to vector<1x1x128xf32>
    tpu.vector_store %arg5[%c0_32, %c0_33, %c0_34], %48 {strides = array<i32>} : memref<1x1x128xf32, #tpu.memory_space<vmem>>, vector<1x1x128xf32>,
    %49 = vector.broadcast %45 : vector<1x128xf32> to vector<256x128xf32>
    %50 = arith.subf %36, %49 : vector<256x128xf32>
    %51 = arith.mulf %50, %50 : vector<256x128xf32>
    %cst_35 = arith.constant dense<0.000000e+00> : vector<128xf32>
    %52 = vector.multi_reduction <add>, %51, %cst_35 [0] : vector<256x128xf32> to vector<128xf32>
    %53 = vector.shape_cast %52 : vector<128xf32> to vector<1x128xf32>
    %c0_36 = arith.constant 0 : index
    %c0_37 = arith.constant 0 : index
    %c0_38 = arith.constant 0 : index
    %54 = vector.load %arg6[%c0_36, %c0_37, %c0_38] : memref<1x1x128xf32, #tpu.memory_space<vmem>>, vector<1x1x128xf32>
    %55 = vector.shape_cast %54 : vector<1x1x128xf32> to vector<1x128xf32>
    %56 = vector.shape_cast %53 : vector<1x128xf32> to vector<1x1x128xf32>
    tpu.vector_store %arg6[%c0_36, %c0_37, %c0_38], %56 {strides = array<i32>} : memref<1x1x128xf32, #tpu.memory_space<vmem>>, vector<1x1x128xf32>,
    %57 = vector.shape_cast %1 : vector<16x16x128xbf16> to vector<256x128xbf16>
    %c0_39 = arith.constant 0 : index
    %c0_40 = arith.constant 0 : index
    %58 = vector.load %arg3[%c0_39, %c0_40] : memref<128x128xbf16, #tpu.memory_space<vmem>>, vector<128x128xbf16>
    %cst_41 = arith.constant dense<0.000000e+00> : vector<256x128xf32>
    %59 = tpu.matmul %57, %58, %cst_41 {dimension_numbers = #tpu.dot_dimension_numbers<[1], [0], [0], [1], [0, 0, 1, 1], [], []>} : vector<256x128xbf16>, vector<128x128xbf16>, vector<256x128xf32> -> vector<256x128xf32>
    %cst_42 = arith.constant dense<0.000000e+00> : vector<128xf32>
    %60 = vector.multi_reduction <add>, %59, %cst_42 [0] : vector<256x128xf32> to vector<128xf32>
    %61 = vector.shape_cast %60 : vector<128xf32> to vector<1x128xf32>
    %cst_43 = arith.constant 3.906250e-03 : f32
    %62 = vector.broadcast %cst_43 : f32 to vector<1x128xf32>
    %63 = arith.mulf %61, %62 : vector<1x128xf32>
    %c0_44 = arith.constant 0 : index
    %c0_45 = arith.constant 0 : index
    %c0_46 = arith.constant 0 : index
    %64 = vector.load %arg7[%c0_44, %c0_45, %c0_46] : memref<1x1x128xf32, #tpu.memory_space<vmem>>, vector<1x1x128xf32>
    %65 = vector.shape_cast %64 : vector<1x1x128xf32> to vector<1x128xf32>
    %66 = vector.shape_cast %63 : vector<1x128xf32> to vector<1x1x128xf32>
    tpu.vector_store %arg7[%c0_44, %c0_45, %c0_46], %66 {strides = array<i32>} : memref<1x1x128xf32, #tpu.memory_space<vmem>>, vector<1x1x128xf32>,
    %67 = vector.broadcast %63 : vector<1x128xf32> to vector<256x128xf32>
    %68 = arith.subf %59, %67 : vector<256x128xf32>
    %69 = arith.mulf %68, %68 : vector<256x128xf32>
    %cst_47 = arith.constant dense<0.000000e+00> : vector<128xf32>
    %70 = vector.multi_reduction <add>, %69, %cst_47 [0] : vector<256x128xf32> to vector<128xf32>
    %71 = vector.shape_cast %70 : vector<128xf32> to vector<1x128xf32>
    %c0_48 = arith.constant 0 : index
    %c0_49 = arith.constant 0 : index
    %c0_50 = arith.constant 0 : index
    %72 = vector.load %arg8[%c0_48, %c0_49, %c0_50] : memref<1x1x128xf32, #tpu.memory_space<vmem>>, vector<1x1x128xf32>
    %73 = vector.shape_cast %72 : vector<1x1x128xf32> to vector<1x128xf32>
    %74 = vector.shape_cast %71 : vector<1x128xf32> to vector<1x1x128xf32>
    tpu.vector_store %arg8[%c0_48, %c0_49, %c0_50], %74 {strides = array<i32>} : memref<1x1x128xf32, #tpu.memory_space<vmem>>, vector<1x1x128xf32>,
    return
  }
  func.func @transform_0(%arg0: i32) -> (i32, i32, i32, i32) {
    %c0_i32 = arith.constant 0 : i32
    %c0_i32_0 = arith.constant 0 : i32
    %c0_i32_1 = arith.constant 0 : i32
    %c0_i32_2 = arith.constant 0 : i32
    return %arg0, %c0_i32, %c0_i32_0, %c0_i32_1 : i32, i32, i32, i32
  }
  func.func @transform_1(%arg0: i32) -> (i32, i32, i32) {
    %c0_i32 = arith.constant 0 : i32
    %c0_i32_0 = arith.constant 0 : i32
    %c0_i32_1 = arith.constant 0 : i32
    %c0_i32_2 = arith.constant 0 : i32
    return %c0_i32, %c0_i32_0, %c0_i32_1 : i32, i32, i32
  }
  func.func @transform_2(%arg0: i32) -> (i32, i32) {
    %c0_i32 = arith.constant 0 : i32
    %c0_i32_0 = arith.constant 0 : i32
    %c0_i32_1 = arith.constant 0 : i32
    return %c0_i32, %c0_i32_0 : i32, i32
  }
  func.func @transform_3(%arg0: i32) -> (i32, i32, i32, i32) {
    %c0_i32 = arith.constant 0 : i32
    %c0_i32_0 = arith.constant 0 : i32
    %c0_i32_1 = arith.constant 0 : i32
    %c0_i32_2 = arith.constant 0 : i32
    return %arg0, %c0_i32, %c0_i32_0, %c0_i32_1 : i32, i32, i32, i32
  }
  func.func @transform_4(%arg0: i32) -> (i32, i32, i32) {
    %c0_i32 = arith.constant 0 : i32
    %c0_i32_0 = arith.constant 0 : i32
    %c0_i32_1 = arith.constant 0 : i32
    return %arg0, %c0_i32, %c0_i32_0 : i32, i32, i32
  }
  func.func @transform_5(%arg0: i32) -> (i32, i32, i32) {
    %c0_i32 = arith.constant 0 : i32
    %c0_i32_0 = arith.constant 0 : i32
    %c0_i32_1 = arith.constant 0 : i32
    return %arg0, %c0_i32, %c0_i32_0 : i32, i32, i32
  }
  func.func @transform_6(%arg0: i32) -> (i32, i32, i32) {
    %c0_i32 = arith.constant 0 : i32
    %c0_i32_0 = arith.constant 0 : i32
    %c0_i32_1 = arith.constant 0 : i32
    return %arg0, %c0_i32, %c0_i32_0 : i32, i32, i32
  }
  func.func @transform_7(%arg0: i32) -> (i32, i32, i32) {
    %c0_i32 = arith.constant 0 : i32
    %c0_i32_0 = arith.constant 0 : i32
    %c0_i32_1 = arith.constant 0 : i32
    return %arg0, %c0_i32, %c0_i32_0 : i32, i32, i32
  }
}

module attributes {stable_mosaic.version = 11 : i64} {
  func.func @_shortcut_bn_add_relu_kernel(%arg0: i32, %arg1: memref<1x16x16x128xbf16, #tpu.memory_space<vmem>>, %arg2: memref<1x16x16x128xbf16, #tpu.memory_space<vmem>>, %arg3: memref<128x128xbf16, #tpu.memory_space<vmem>>, %arg4: memref<1x128xf32, #tpu.memory_space<vmem>>, %arg5: memref<1x128xf32, #tpu.memory_space<vmem>>, %arg6: memref<1x128xf32, #tpu.memory_space<vmem>>, %arg7: memref<1x128xf32, #tpu.memory_space<vmem>>, %arg8: memref<1x16x16x128xf32, #tpu.memory_space<vmem>>) attributes {dimension_semantics = [#tpu.dimension_semantics<parallel>], iteration_bounds = array<i64: 2>, scalar_prefetch = 0 : i64, scratch_operands = 0 : i64, tpu.core_type = #tpu.core_type<tc>, window_params = [{transform_indices = @transform_0, window_bounds = array<i64: 1, 16, 16, 128>}, {transform_indices = @transform_1, window_bounds = array<i64: 1, 16, 16, 128>}, {pipeline_mode = #tpu.pipeline_mode<synchronous>, transform_indices = @transform_2, window_bounds = array<i64: 128, 128>}, {pipeline_mode = #tpu.pipeline_mode<synchronous>, transform_indices = @transform_3, window_bounds = array<i64: 1, 128>}, {pipeline_mode = #tpu.pipeline_mode<synchronous>, transform_indices = @transform_4, window_bounds = array<i64: 1, 128>}, {pipeline_mode = #tpu.pipeline_mode<synchronous>, transform_indices = @transform_5, window_bounds = array<i64: 1, 128>}, {pipeline_mode = #tpu.pipeline_mode<synchronous>, transform_indices = @transform_6, window_bounds = array<i64: 1, 128>}, {transform_indices = @transform_7, window_bounds = array<i64: 1, 16, 16, 128>}]} {
    %c0 = arith.constant 0 : index
    %c0_0 = arith.constant 0 : index
    %c0_1 = arith.constant 0 : index
    %c0_2 = arith.constant 0 : index
    %0 = vector.load %arg1[%c0, %c0_0, %c0_1, %c0_2] : memref<1x16x16x128xbf16, #tpu.memory_space<vmem>>, vector<1x16x16x128xbf16>
    %1 = vector.shape_cast %0 : vector<1x16x16x128xbf16> to vector<16x16x128xbf16>
    %2 = vector.shape_cast %1 : vector<16x16x128xbf16> to vector<256x128xbf16>
    %c0_3 = arith.constant 0 : index
    %c0_4 = arith.constant 0 : index
    %3 = vector.load %arg3[%c0_3, %c0_4] : memref<128x128xbf16, #tpu.memory_space<vmem>>, vector<128x128xbf16>
    %cst = arith.constant dense<0.000000e+00> : vector<256x128xf32>
    %4 = tpu.matmul %2, %3, %cst {dimension_numbers = #tpu.dot_dimension_numbers<[1], [0], [0], [1], [0, 0, 1, 1], [], []>} : vector<256x128xbf16>, vector<128x128xbf16>, vector<256x128xf32> -> vector<256x128xf32>
    %5 = vector.shape_cast %4 : vector<256x128xf32> to vector<16x16x128xf32>
    %c0_5 = arith.constant 0 : index
    %c0_6 = arith.constant 0 : index
    %c0_7 = arith.constant 0 : index
    %c0_8 = arith.constant 0 : index
    %6 = vector.load %arg2[%c0_5, %c0_6, %c0_7, %c0_8] : memref<1x16x16x128xbf16, #tpu.memory_space<vmem>>, vector<1x16x16x128xbf16>
    %7 = vector.shape_cast %6 : vector<1x16x16x128xbf16> to vector<16x16x128xbf16>
    %8 = arith.extf %7 : vector<16x16x128xbf16> to vector<16x16x128xf32>
    %c0_9 = arith.constant 0 : index
    %c0_10 = arith.constant 0 : index
    %9 = vector.load %arg4[%c0_9, %c0_10] : memref<1x128xf32, #tpu.memory_space<vmem>>, vector<1x128xf32>
    %10 = vector.shape_cast %9 : vector<1x128xf32> to vector<1x1x128xf32>
    %11 = vector.broadcast %10 : vector<1x1x128xf32> to vector<16x16x128xf32>
    %12 = arith.mulf %8, %11 : vector<16x16x128xf32>
    %c0_11 = arith.constant 0 : index
    %c0_12 = arith.constant 0 : index
    %13 = vector.load %arg5[%c0_11, %c0_12] : memref<1x128xf32, #tpu.memory_space<vmem>>, vector<1x128xf32>
    %14 = vector.shape_cast %13 : vector<1x128xf32> to vector<1x1x128xf32>
    %15 = vector.broadcast %14 : vector<1x1x128xf32> to vector<16x16x128xf32>
    %16 = arith.addf %12, %15 : vector<16x16x128xf32>
    %c0_13 = arith.constant 0 : index
    %c0_14 = arith.constant 0 : index
    %17 = vector.load %arg6[%c0_13, %c0_14] : memref<1x128xf32, #tpu.memory_space<vmem>>, vector<1x128xf32>
    %18 = vector.shape_cast %17 : vector<1x128xf32> to vector<1x1x128xf32>
    %19 = vector.broadcast %18 : vector<1x1x128xf32> to vector<16x16x128xf32>
    %20 = arith.mulf %5, %19 : vector<16x16x128xf32>
    %21 = arith.addf %16, %20 : vector<16x16x128xf32>
    %c0_15 = arith.constant 0 : index
    %c0_16 = arith.constant 0 : index
    %22 = vector.load %arg7[%c0_15, %c0_16] : memref<1x128xf32, #tpu.memory_space<vmem>>, vector<1x128xf32>
    %23 = vector.shape_cast %22 : vector<1x128xf32> to vector<1x1x128xf32>
    %24 = vector.broadcast %23 : vector<1x1x128xf32> to vector<16x16x128xf32>
    %25 = arith.addf %21, %24 : vector<16x16x128xf32>
    %cst_17 = arith.constant 0.000000e+00 : f32
    %26 = vector.broadcast %cst_17 : f32 to vector<16x16x128xf32>
    %27 = arith.maximumf %25, %26 : vector<16x16x128xf32>
    %c0_18 = arith.constant 0 : index
    %c0_19 = arith.constant 0 : index
    %c0_20 = arith.constant 0 : index
    %c0_21 = arith.constant 0 : index
    %28 = vector.load %arg8[%c0_18, %c0_19, %c0_20, %c0_21] : memref<1x16x16x128xf32, #tpu.memory_space<vmem>>, vector<1x16x16x128xf32>
    %29 = vector.shape_cast %28 : vector<1x16x16x128xf32> to vector<16x16x128xf32>
    %30 = vector.shape_cast %27 : vector<16x16x128xf32> to vector<1x16x16x128xf32>
    tpu.vector_store %arg8[%c0_18, %c0_19, %c0_20, %c0_21], %30 {strides = array<i32>} : memref<1x16x16x128xf32, #tpu.memory_space<vmem>>, vector<1x16x16x128xf32>,
    return
  }
  func.func @transform_0(%arg0: i32) -> (i32, i32, i32, i32) {
    %c0_i32 = arith.constant 0 : i32
    %c0_i32_0 = arith.constant 0 : i32
    %c0_i32_1 = arith.constant 0 : i32
    %c0_i32_2 = arith.constant 0 : i32
    return %arg0, %c0_i32, %c0_i32_0, %c0_i32_1 : i32, i32, i32, i32
  }
  func.func @transform_1(%arg0: i32) -> (i32, i32, i32, i32) {
    %c0_i32 = arith.constant 0 : i32
    %c0_i32_0 = arith.constant 0 : i32
    %c0_i32_1 = arith.constant 0 : i32
    %c0_i32_2 = arith.constant 0 : i32
    return %arg0, %c0_i32, %c0_i32_0, %c0_i32_1 : i32, i32, i32, i32
  }
  func.func @transform_2(%arg0: i32) -> (i32, i32) {
    %c0_i32 = arith.constant 0 : i32
    %c0_i32_0 = arith.constant 0 : i32
    %c0_i32_1 = arith.constant 0 : i32
    return %c0_i32, %c0_i32_0 : i32, i32
  }
  func.func @transform_3(%arg0: i32) -> (i32, i32) {
    %c0_i32 = arith.constant 0 : i32
    %c0_i32_0 = arith.constant 0 : i32
    %c0_i32_1 = arith.constant 0 : i32
    return %c0_i32, %c0_i32_0 : i32, i32
  }
  func.func @transform_4(%arg0: i32) -> (i32, i32) {
    %c0_i32 = arith.constant 0 : i32
    %c0_i32_0 = arith.constant 0 : i32
    %c0_i32_1 = arith.constant 0 : i32
    return %c0_i32, %c0_i32_0 : i32, i32
  }
  func.func @transform_5(%arg0: i32) -> (i32, i32) {
    %c0_i32 = arith.constant 0 : i32
    %c0_i32_0 = arith.constant 0 : i32
    %c0_i32_1 = arith.constant 0 : i32
    return %c0_i32, %c0_i32_0 : i32, i32
  }
  func.func @transform_6(%arg0: i32) -> (i32, i32) {
    %c0_i32 = arith.constant 0 : i32
    %c0_i32_0 = arith.constant 0 : i32
    %c0_i32_1 = arith.constant 0 : i32
    return %c0_i32, %c0_i32_0 : i32, i32
  }
  func.func @transform_7(%arg0: i32) -> (i32, i32, i32, i32) {
    %c0_i32 = arith.constant 0 : i32
    %c0_i32_0 = arith.constant 0 : i32
    %c0_i32_1 = arith.constant 0 : i32
    %c0_i32_2 = arith.constant 0 : i32
    return %arg0, %c0_i32, %c0_i32_0, %c0_i32_1 : i32, i32, i32, i32
  }
}

module attributes {stable_mosaic.version = 11 : i64} {
  func.func @_bn1_relu_conv2_stats_kernel(%arg0: i32, %arg1: memref<1x16x16x128xbf16, #tpu.memory_space<vmem>>, %arg2: memref<1x128xf32, #tpu.memory_space<vmem>>, %arg3: memref<1x128xf32, #tpu.memory_space<vmem>>, %arg4: memref<3x384x128xbf16, #tpu.memory_space<vmem>>, %arg5: memref<1x16x16x128xbf16, #tpu.memory_space<vmem>>, %arg6: memref<1x1x128xf32, #tpu.memory_space<vmem>>, %arg7: memref<1x1x128xf32, #tpu.memory_space<vmem>>, %arg8: memref<18x18x128xbf16, #tpu.memory_space<vmem>>) attributes {dimension_semantics = [#tpu.dimension_semantics<parallel>], iteration_bounds = array<i64: 2>, scalar_prefetch = 0 : i64, scratch_operands = 1 : i64, tpu.core_type = #tpu.core_type<tc>, window_params = [{transform_indices = @transform_0, window_bounds = array<i64: 1, 16, 16, 128>}, {pipeline_mode = #tpu.pipeline_mode<synchronous>, transform_indices = @transform_1, window_bounds = array<i64: 1, 128>}, {pipeline_mode = #tpu.pipeline_mode<synchronous>, transform_indices = @transform_2, window_bounds = array<i64: 1, 128>}, {pipeline_mode = #tpu.pipeline_mode<synchronous>, transform_indices = @transform_3, window_bounds = array<i64: 3, 384, 128>}, {transform_indices = @transform_4, window_bounds = array<i64: 1, 16, 16, 128>}, {transform_indices = @transform_5, window_bounds = array<i64: 1, 1, 128>}, {transform_indices = @transform_6, window_bounds = array<i64: 1, 1, 128>}]} {
    %c0 = arith.constant 0 : index
    %c0_0 = arith.constant 0 : index
    %c0_1 = arith.constant 0 : index
    %c0_2 = arith.constant 0 : index
    %0 = vector.load %arg1[%c0, %c0_0, %c0_1, %c0_2] : memref<1x16x16x128xbf16, #tpu.memory_space<vmem>>, vector<1x16x16x128xbf16>
    %1 = vector.shape_cast %0 : vector<1x16x16x128xbf16> to vector<16x16x128xbf16>
    %2 = arith.extf %1 : vector<16x16x128xbf16> to vector<16x16x128xf32>
    %c0_3 = arith.constant 0 : index
    %c0_4 = arith.constant 0 : index
    %3 = vector.load %arg2[%c0_3, %c0_4] : memref<1x128xf32, #tpu.memory_space<vmem>>, vector<1x128xf32>
    %4 = vector.shape_cast %3 : vector<1x128xf32> to vector<1x1x128xf32>
    %5 = vector.broadcast %4 : vector<1x1x128xf32> to vector<16x16x128xf32>
    %6 = arith.mulf %2, %5 : vector<16x16x128xf32>
    %c0_5 = arith.constant 0 : index
    %c0_6 = arith.constant 0 : index
    %7 = vector.load %arg3[%c0_5, %c0_6] : memref<1x128xf32, #tpu.memory_space<vmem>>, vector<1x128xf32>
    %8 = vector.shape_cast %7 : vector<1x128xf32> to vector<1x1x128xf32>
    %9 = vector.broadcast %8 : vector<1x1x128xf32> to vector<16x16x128xf32>
    %10 = arith.addf %6, %9 : vector<16x16x128xf32>
    %cst = arith.constant 0.000000e+00 : f32
    %11 = vector.broadcast %cst : f32 to vector<16x16x128xf32>
    %12 = arith.maximumf %10, %11 : vector<16x16x128xf32>
    %13 = arith.truncf %12 : vector<16x16x128xf32> to vector<16x16x128xbf16>
    %cst_7 = arith.constant 0.000000e+00 : bf16
    %14 = vector.broadcast %cst_7 : bf16 to vector<1x18x128xbf16>
    %cst_8 = arith.constant 0.000000e+00 : bf16
    %15 = vector.broadcast %cst_8 : bf16 to vector<16x1x128xbf16>
    %c0_9 = arith.constant 0 : index
    %c0_10 = arith.constant 0 : index
    %c0_11 = arith.constant 0 : index
    %16 = vector.load %arg8[%c0_9, %c0_10, %c0_11] : memref<18x18x128xbf16, #tpu.memory_space<vmem>>, vector<1x18x128xbf16>
    tpu.vector_store %arg8[%c0_9, %c0_10, %c0_11], %14 {strides = array<i32>} : memref<18x18x128xbf16, #tpu.memory_space<vmem>>, vector<1x18x128xbf16>,
    %c17 = arith.constant 17 : index
    %c0_12 = arith.constant 0 : index
    %c0_13 = arith.constant 0 : index
    %17 = vector.load %arg8[%c17, %c0_12, %c0_13] : memref<18x18x128xbf16, #tpu.memory_space<vmem>>, vector<1x18x128xbf16>
    tpu.vector_store %arg8[%c17, %c0_12, %c0_13], %14 {strides = array<i32>} : memref<18x18x128xbf16, #tpu.memory_space<vmem>>, vector<1x18x128xbf16>,
    %18 = tpu.concatenate %15, %13, %15 in 1 : vector<16x1x128xbf16>, vector<16x16x128xbf16>, vector<16x1x128xbf16> -> vector<16x18x128xbf16>
    %c1 = arith.constant 1 : index
    %c0_14 = arith.constant 0 : index
    %c0_15 = arith.constant 0 : index
    %19 = vector.load %arg8[%c1, %c0_14, %c0_15] : memref<18x18x128xbf16, #tpu.memory_space<vmem>>, vector<16x18x128xbf16>
    tpu.vector_store %arg8[%c1, %c0_14, %c0_15], %18 {strides = array<i32>} : memref<18x18x128xbf16, #tpu.memory_space<vmem>>, vector<16x18x128xbf16>,
    %c0_16 = arith.constant 0 : index
    %c0_17 = arith.constant 0 : index
    %c0_18 = arith.constant 0 : index
    %20 = vector.load %arg8[%c0_16, %c0_17, %c0_18] : memref<18x18x128xbf16, #tpu.memory_space<vmem>>, vector<18x18x128xbf16>
    %cst_19 = arith.constant 0.000000e+00 : f32
    %21 = vector.broadcast %cst_19 : f32 to vector<256x128xf32>
    %22 = vector.extract_strided_slice %20 {offsets = [0, 0, 0], sizes = [16, 16, 128], strides = [1, 1, 1]} : vector<18x18x128xbf16> to vector<16x16x128xbf16>
    %23 = vector.extract_strided_slice %20 {offsets = [0, 1, 0], sizes = [16, 16, 128], strides = [1, 1, 1]} : vector<18x18x128xbf16> to vector<16x16x128xbf16>
    %24 = vector.extract_strided_slice %20 {offsets = [0, 2, 0], sizes = [16, 16, 128], strides = [1, 1, 1]} : vector<18x18x128xbf16> to vector<16x16x128xbf16>
    %25 = tpu.concatenate %22, %23, %24 in 2 : vector<16x16x128xbf16>, vector<16x16x128xbf16>, vector<16x16x128xbf16> -> vector<16x16x384xbf16>
    %26 = vector.shape_cast %25 : vector<16x16x384xbf16> to vector<256x384xbf16>
    %c0_20 = arith.constant 0 : index
    %c0_21 = arith.constant 0 : index
    %c0_22 = arith.constant 0 : index
    %27 = vector.load %arg4[%c0_20, %c0_21, %c0_22] : memref<3x384x128xbf16, #tpu.memory_space<vmem>>, vector<1x384x128xbf16>
    %28 = vector.shape_cast %27 : vector<1x384x128xbf16> to vector<384x128xbf16>
    %cst_23 = arith.constant dense<0.000000e+00> : vector<256x128xf32>
    %29 = tpu.matmul %26, %28, %cst_23 {dimension_numbers = #tpu.dot_dimension_numbers<[1], [0], [0], [1], [0, 0, 1, 1], [], []>} : vector<256x384xbf16>, vector<384x128xbf16>, vector<256x128xf32> -> vector<256x128xf32>
    %30 = arith.addf %21, %29 : vector<256x128xf32>
    %31 = vector.extract_strided_slice %20 {offsets = [1, 0, 0], sizes = [16, 16, 128], strides = [1, 1, 1]} : vector<18x18x128xbf16> to vector<16x16x128xbf16>
    %32 = vector.extract_strided_slice %20 {offsets = [1, 1, 0], sizes = [16, 16, 128], strides = [1, 1, 1]} : vector<18x18x128xbf16> to vector<16x16x128xbf16>
    %33 = vector.extract_strided_slice %20 {offsets = [1, 2, 0], sizes = [16, 16, 128], strides = [1, 1, 1]} : vector<18x18x128xbf16> to vector<16x16x128xbf16>
    %34 = tpu.concatenate %31, %32, %33 in 2 : vector<16x16x128xbf16>, vector<16x16x128xbf16>, vector<16x16x128xbf16> -> vector<16x16x384xbf16>
    %35 = vector.shape_cast %34 : vector<16x16x384xbf16> to vector<256x384xbf16>
    %c1_24 = arith.constant 1 : index
    %c0_25 = arith.constant 0 : index
    %c0_26 = arith.constant 0 : index
    %36 = vector.load %arg4[%c1_24, %c0_25, %c0_26] : memref<3x384x128xbf16, #tpu.memory_space<vmem>>, vector<1x384x128xbf16>
    %37 = vector.shape_cast %36 : vector<1x384x128xbf16> to vector<384x128xbf16>
    %cst_27 = arith.constant dense<0.000000e+00> : vector<256x128xf32>
    %38 = tpu.matmul %35, %37, %cst_27 {dimension_numbers = #tpu.dot_dimension_numbers<[1], [0], [0], [1], [0, 0, 1, 1], [], []>} : vector<256x384xbf16>, vector<384x128xbf16>, vector<256x128xf32> -> vector<256x128xf32>
    %39 = arith.addf %30, %38 : vector<256x128xf32>
    %40 = vector.extract_strided_slice %20 {offsets = [2, 0, 0], sizes = [16, 16, 128], strides = [1, 1, 1]} : vector<18x18x128xbf16> to vector<16x16x128xbf16>
    %41 = vector.extract_strided_slice %20 {offsets = [2, 1, 0], sizes = [16, 16, 128], strides = [1, 1, 1]} : vector<18x18x128xbf16> to vector<16x16x128xbf16>
    %42 = vector.extract_strided_slice %20 {offsets = [2, 2, 0], sizes = [16, 16, 128], strides = [1, 1, 1]} : vector<18x18x128xbf16> to vector<16x16x128xbf16>
    %43 = tpu.concatenate %40, %41, %42 in 2 : vector<16x16x128xbf16>, vector<16x16x128xbf16>, vector<16x16x128xbf16> -> vector<16x16x384xbf16>
    %44 = vector.shape_cast %43 : vector<16x16x384xbf16> to vector<256x384xbf16>
    %c2 = arith.constant 2 : index
    %c0_28 = arith.constant 0 : index
    %c0_29 = arith.constant 0 : index
    %45 = vector.load %arg4[%c2, %c0_28, %c0_29] : memref<3x384x128xbf16, #tpu.memory_space<vmem>>, vector<1x384x128xbf16>
    %46 = vector.shape_cast %45 : vector<1x384x128xbf16> to vector<384x128xbf16>
    %cst_30 = arith.constant dense<0.000000e+00> : vector<256x128xf32>
    %47 = tpu.matmul %44, %46, %cst_30 {dimension_numbers = #tpu.dot_dimension_numbers<[1], [0], [0], [1], [0, 0, 1, 1], [], []>} : vector<256x384xbf16>, vector<384x128xbf16>, vector<256x128xf32> -> vector<256x128xf32>
    %48 = arith.addf %39, %47 : vector<256x128xf32>
    %49 = vector.shape_cast %48 : vector<256x128xf32> to vector<16x16x128xf32>
    %50 = arith.truncf %49 : vector<16x16x128xf32> to vector<16x16x128xbf16>
    %c0_31 = arith.constant 0 : index
    %c0_32 = arith.constant 0 : index
    %c0_33 = arith.constant 0 : index
    %c0_34 = arith.constant 0 : index
    %51 = vector.load %arg5[%c0_31, %c0_32, %c0_33, %c0_34] : memref<1x16x16x128xbf16, #tpu.memory_space<vmem>>, vector<1x16x16x128xbf16>
    %52 = vector.shape_cast %51 : vector<1x16x16x128xbf16> to vector<16x16x128xbf16>
    %53 = vector.shape_cast %50 : vector<16x16x128xbf16> to vector<1x16x16x128xbf16>
    tpu.vector_store %arg5[%c0_31, %c0_32, %c0_33, %c0_34], %53 {strides = array<i32>} : memref<1x16x16x128xbf16, #tpu.memory_space<vmem>>, vector<1x16x16x128xbf16>,
    %cst_35 = arith.constant dense<0.000000e+00> : vector<128xf32>
    %54 = vector.multi_reduction <add>, %48, %cst_35 [0] : vector<256x128xf32> to vector<128xf32>
    %55 = vector.shape_cast %54 : vector<128xf32> to vector<1x128xf32>
    %cst_36 = arith.constant 3.906250e-03 : f32
    %56 = vector.broadcast %cst_36 : f32 to vector<1x128xf32>
    %57 = arith.mulf %55, %56 : vector<1x128xf32>
    %c0_37 = arith.constant 0 : index
    %c0_38 = arith.constant 0 : index
    %c0_39 = arith.constant 0 : index
    %58 = vector.load %arg6[%c0_37, %c0_38, %c0_39] : memref<1x1x128xf32, #tpu.memory_space<vmem>>, vector<1x1x128xf32>
    %59 = vector.shape_cast %58 : vector<1x1x128xf32> to vector<1x128xf32>
    %60 = vector.shape_cast %57 : vector<1x128xf32> to vector<1x1x128xf32>
    tpu.vector_store %arg6[%c0_37, %c0_38, %c0_39], %60 {strides = array<i32>} : memref<1x1x128xf32, #tpu.memory_space<vmem>>, vector<1x1x128xf32>,
    %61 = vector.broadcast %57 : vector<1x128xf32> to vector<256x128xf32>
    %62 = arith.subf %48, %61 : vector<256x128xf32>
    %63 = arith.mulf %62, %62 : vector<256x128xf32>
    %cst_40 = arith.constant dense<0.000000e+00> : vector<128xf32>
    %64 = vector.multi_reduction <add>, %63, %cst_40 [0] : vector<256x128xf32> to vector<128xf32>
    %65 = vector.shape_cast %64 : vector<128xf32> to vector<1x128xf32>
    %c0_41 = arith.constant 0 : index
    %c0_42 = arith.constant 0 : index
    %c0_43 = arith.constant 0 : index
    %66 = vector.load %arg7[%c0_41, %c0_42, %c0_43] : memref<1x1x128xf32, #tpu.memory_space<vmem>>, vector<1x1x128xf32>
    %67 = vector.shape_cast %66 : vector<1x1x128xf32> to vector<1x128xf32>
    %68 = vector.shape_cast %65 : vector<1x128xf32> to vector<1x1x128xf32>
    tpu.vector_store %arg7[%c0_41, %c0_42, %c0_43], %68 {strides = array<i32>} : memref<1x1x128xf32, #tpu.memory_space<vmem>>, vector<1x1x128xf32>,
    return
  }
  func.func @transform_0(%arg0: i32) -> (i32, i32, i32, i32) {
    %c0_i32 = arith.constant 0 : i32
    %c0_i32_0 = arith.constant 0 : i32
    %c0_i32_1 = arith.constant 0 : i32
    %c0_i32_2 = arith.constant 0 : i32
    return %arg0, %c0_i32, %c0_i32_0, %c0_i32_1 : i32, i32, i32, i32
  }
  func.func @transform_1(%arg0: i32) -> (i32, i32) {
    %c0_i32 = arith.constant 0 : i32
    %c0_i32_0 = arith.constant 0 : i32
    %c0_i32_1 = arith.constant 0 : i32
    return %c0_i32, %c0_i32_0 : i32, i32
  }
  func.func @transform_2(%arg0: i32) -> (i32, i32) {
    %c0_i32 = arith.constant 0 : i32
    %c0_i32_0 = arith.constant 0 : i32
    %c0_i32_1 = arith.constant 0 : i32
    return %c0_i32, %c0_i32_0 : i32, i32
  }
  func.func @transform_3(%arg0: i32) -> (i32, i32, i32) {
    %c0_i32 = arith.constant 0 : i32
    %c0_i32_0 = arith.constant 0 : i32
    %c0_i32_1 = arith.constant 0 : i32
    %c0_i32_2 = arith.constant 0 : i32
    return %c0_i32, %c0_i32_0, %c0_i32_1 : i32, i32, i32
  }
  func.func @transform_4(%arg0: i32) -> (i32, i32, i32, i32) {
    %c0_i32 = arith.constant 0 : i32
    %c0_i32_0 = arith.constant 0 : i32
    %c0_i32_1 = arith.constant 0 : i32
    %c0_i32_2 = arith.constant 0 : i32
    return %arg0, %c0_i32, %c0_i32_0, %c0_i32_1 : i32, i32, i32, i32
  }
  func.func @transform_5(%arg0: i32) -> (i32, i32, i32) {
    %c0_i32 = arith.constant 0 : i32
    %c0_i32_0 = arith.constant 0 : i32
    %c0_i32_1 = arith.constant 0 : i32
    return %arg0, %c0_i32, %c0_i32_0 : i32, i32, i32
  }
  func.func @transform_6(%arg0: i32) -> (i32, i32, i32) {
    %c0_i32 = arith.constant 0 : i32
    %c0_i32_0 = arith.constant 0 : i32
    %c0_i32_1 = arith.constant 0 : i32
    return %arg0, %c0_i32, %c0_i32_0 : i32, i32, i32
  }
}

</mosaic_0001>

<bundles_post_ra>
// kernel: basic_block_forward.5
= control target key start
LH: loop header
LB: loop body
LE: loop exit
PB: predicated region body
PF: predicated region fallthrough
CT: control target
= control target key end

     0   :  { %s1327_s24 = smov 0   ;;  %s1693_s0 = inlined_call_operand.vmem [shape: bf16[2,16,16,128], index: 0, kind: input, shape index: {}]   ;;  %s1694_s1 = inlined_call_operand.vmem [shape: bf16[2,16,16,128], index: 1, kind: input, shape index: {}]   ;;  %s1695_s2 = inlined_call_operand.vmem [shape: bf16[128,128], index: 2, kind: input, shape index: {}]   ;;  %s1696_s3 = inlined_call_operand.vmem [shape: f32[1,128], index: 3, kind: input, shape index: {}]   ;;  %s1697_s4 = inlined_call_operand.vmem [shape: f32[1,128], index: 4, kind: input, shape index: {}]   ;;  %s1698_s5 = inlined_call_operand.vmem [shape: f32[1,128], index: 5, kind: input, shape index: {}]   ;;  %s1699_s6 = inlined_call_operand.vmem [shape: f32[1,128], index: 6, kind: input, shape index: {}]   ;;  %s1700_s7 = inlined_call_operand.vmem [shape: f32[2,16,16,128], index: 7, kind: output, shape index: {}]  }
   0x1 LB: > { %s1036_s25 = sadd.s32 4294967295, %s1285_s24   ;;  %p1040_p0 = scmp.ge.s32.totalorder %s1285_s24, 1  ;;  %s1285_s24 = sphi %s1327_s24, %s17_s24  }
   0x2   : > { %p247_p1 = scmp.lt.s32.totalorder %s1285_s24, 3 }
   0x4   : > { %p248_p2 = pnand %p1040_p0, %p247_p1 }
   0x5   : > { %v1255_v0 = vld [vmem:[%s1695_s2] sm:$0xff] (!%p248_p2)   ;;  %p284_p3 = scmp.lt.s32.totalorder (!%p248_p2), %s1036_s25, 1  ;;  %v1256_v1 = vld [vmem:[%s1695_s2 + $0x8] sm:$0xff] (!%p248_p2)   ;;  %v1257_v2 = vld [vmem:[%s1695_s2 + $0x10] sm:$0xff] (!%p248_p2)  }
   0x6   : > { %251 = sbr.rel (%p248_p2) target bundleno = 288 (0x120), region = 48  ;;  %1183 = vmatprep.subr.bf16.mxu0 (!%p248_p2), %v1255_v0  ;;  %1231 = vmatprep.subr.bf16.mxu1 (!%p248_p2), %v1255_v0  ;;  %v1258_v3 = vld [vmem:[%s1695_s2 + $0x18] sm:$0xff] (!%p248_p2)   ;;  %v1259_v6 = vld [vmem:[%s1695_s2 + $0x20] sm:$0xff] (!%p248_p2)   ;;  %v1260_v7 = vld [vmem:[%s1695_s2 + $0x28] sm:$0xff] (!%p248_p2)  }
   0x7   : > { %1184 = vmatpush3.bf16.msra.mxu0 (!%p248_p2), %v1255_v0  ;;  %1239 = vmatpush3.bf16.msra.mxu1 (!%p248_p2), %v1255_v0  ;;  %v1261_v8 = vld [vmem:[%s1695_s2 + $0x30] sm:$0xff] (!%p248_p2)   ;;  %v1262_v9 = vld [vmem:[%s1695_s2 + $0x38] sm:$0xff] (!%p248_p2)   ;;  %v1403_v34 = vld [vmem:[%s1696_s3] ss:$0 sm:$0xff] (!%p248_p2) }
   0x8   : > { %1185 = vmatprep.subr.bf16.mxu0 (!%p248_p2), %v1256_v1  ;;  %1232 = vmatprep.subr.bf16.mxu1 (!%p248_p2), %v1256_v1  ;;  %v1410_v49 = vld [vmem:[%s1697_s4] ss:$0 sm:$0xff] (!%p248_p2) }
   0xb   : > { %1186 = vmatpush3.bf16.msra.mxu0 (!%p248_p2), %v1256_v1  ;;  %1240 = vmatpush3.bf16.msra.mxu1 (!%p248_p2), %v1256_v1 }
   0xc   : > { %1187 = vmatprep.subr.bf16.mxu0 (!%p248_p2), %v1257_v2  ;;  %1233 = vmatprep.subr.bf16.mxu1 (!%p248_p2), %v1257_v2 }
   0xd   : > { %s1702_s25 = smov (!%p284_p3, %s1036_s25), 1 }
   0xe   : > { %s1077_s9 = sshll.u32 %s1702_s25, 7  ;;  %s1079_s13 = sshll.u32 %s1702_s25, 8 }
   0xf   : > { %s1352_s12 = scalar_lea.vmem %s1693_s0, %s1077_s9  ;;  %1188 = vmatpush3.bf16.msra.mxu0 %v1257_v2  ;;  %1241 = vmatpush3.bf16.msra.mxu1 %v1257_v2  ;;  %s1390_s27 = scalar_lea.vmem %s1694_s1, %s1077_s9 }
  0x10   : > { %v1263_v4 = vld [vmem:[%s1352_s12] sm:$0xff]   ;;  %1189 = vmatprep.subr.bf16.mxu0 %v1258_v3  ;;  %1234 = vmatprep.subr.bf16.mxu1 %v1258_v3  ;;  %v1265_v10 = vld [vmem:[%s1352_s12 + $0x8] sm:$0xff]   ;;  %v1267_v12 = vld [vmem:[%s1352_s12 + $0x10] sm:$0xff]   ;;  %s1576_s15 = scalar_lea.vmem %s1700_s7, %s1079_s13 }
  0x11   : > { %v1264_v5 = vld [vmem:[%s1352_s12 + $0x40] sm:$0xff]   ;;  %1199 = vmatprep.mubr.bf16.mxu0 %v1263_v4  ;;  %v1266_v11 = vld [vmem:[%s1352_s12 + $0x48] sm:$0xff]   ;;  %v1268_v13 = vld [vmem:[%s1352_s12 + $0x50] sm:$0xff]  }
  0x12   : > { %1215 = vmatprep.mubr.bf16.mxu1 %v1264_v5  ;;  %v1269_v14 = vld [vmem:[%s1352_s12 + $0x18] sm:$0xff]   ;;  %v1271_v16 = vld [vmem:[%s1352_s12 + $0x20] sm:$0xff]   ;;  %v1273_v18 = vld [vmem:[%s1352_s12 + $0x28] sm:$0xff]  }
  0x13   : > { %1190 = vmatpush3.bf16.msra.mxu0 %v1258_v3  ;;  %1242 = vmatpush3.bf16.msra.mxu1 %v1258_v3  ;;  %v1270_v15 = vld [vmem:[%s1352_s12 + $0x58] sm:$0xff]   ;;  %v1272_v17 = vld [vmem:[%s1352_s12 + $0x60] sm:$0xff]   ;;  %v1274_v19 = vld [vmem:[%s1352_s12 + $0x68] sm:$0xff]  }
  0x14   : > { %1191 = vmatprep.subr.bf16.mxu0 %v1259_v6  ;;  %1235 = vmatprep.subr.bf16.mxu1 %v1259_v6  ;;  %v1275_v20 = vld [vmem:[%s1352_s12 + $0x30] sm:$0xff]   ;;  %v1277_v22 = vld [vmem:[%s1352_s12 + $0x38] sm:$0xff]   ;;  %v1144_v24 = vld [vmem:[%s1390_s27 + $0x8] sm:$0xff]  }
  0x15   : > { %v1276_v21 = vld [vmem:[%s1352_s12 + $0x70] sm:$0xff]   ;;  %v1278_v23 = vld [vmem:[%s1352_s12 + $0x78] sm:$0xff]   ;;  %v1152_v25 = vld [vmem:[%s1390_s27 + $0x48] sm:$0xff]   ;;  %v1086_v29 = vunpack.c.l.bf16 %v1144_v24  ;;  %v1087_v37 = vunpack.c.h.bf16 %v1144_v24 }
  0x16   : > { %v1081_v26 = vld [vmem:[%s1390_s27] sm:$0xff]   ;;  %v1146_v28 = vld [vmem:[%s1390_s27 + $0x18] sm:$0xff]   ;;  %v1118_v30 = vunpack.c.l.bf16 %v1152_v25  ;;  %v1145_v32 = vld [vmem:[%s1390_s27 + $0x10] sm:$0xff]   ;;  %v1119_v38 = vunpack.c.h.bf16 %v1152_v25 }
  0x17   : > { %1192 = vmatpush3.bf16.msra.mxu0 %v1259_v6  ;;  %1243 = vmatpush3.bf16.msra.mxu1 %v1259_v6  ;;  %v1151_v27 = vld [vmem:[%s1390_s27 + $0x40] sm:$0xff]   ;;  %v1154_v31 = vld [vmem:[%s1390_s27 + $0x58] sm:$0xff]   ;;  %v1153_v33 = vld [vmem:[%s1390_s27 + $0x50] sm:$0xff]   ;;  %v1082_v35 = vunpack.c.l.bf16 %v1081_v26  ;;  %v1083_v39 = vunpack.c.h.bf16 %v1081_v26  ;;  %v1094_v41 = vunpack.c.l.bf16 %v1146_v28  ;;  %v1090_v43 = vunpack.c.l.bf16 %v1145_v32 }
  0x18   : > { %1193 = vmatprep.subr.bf16.mxu0 %v1260_v7  ;;  %1236 = vmatprep.subr.bf16.mxu1 %v1260_v7  ;;  %v1114_v36 = vunpack.c.l.bf16 %v1151_v27  ;;  %v1115_v40 = vunpack.c.h.bf16 %v1151_v27  ;;  %v1126_v42 = vunpack.c.l.bf16 %v1154_v31  ;;  %v1122_v44 = vunpack.c.l.bf16 %v1153_v33  ;;  %v1148_v6 = vld [vmem:[%s1390_s27 + $0x28] sm:$0xff]   ;;  %v1149_v24 = vld [vmem:[%s1390_s27 + $0x30] sm:$0xff]  }
  0x19   : > { %v726_v45 = vmul.f32 %v1086_v29, %v1403_v34  ;;  %v742_v46 = vmul.f32 %v1118_v30, %v1403_v34  ;;  %v1095_v47 = vunpack.c.h.bf16 %v1146_v28  ;;  %v1127_v48 = vunpack.c.h.bf16 %v1154_v31  ;;  %v1157_v25 = vld [vmem:[%s1390_s27 + $0x70] sm:$0xff]  }
  0x1a   : > { %v724_v50 = vmul.f32 %v1082_v35, %v1403_v34  ;;  %v740_v51 = vmul.f32 %v1114_v36, %v1403_v34  ;;  %v1091_v52 = vunpack.c.h.bf16 %v1145_v32  ;;  %v1123_v53 = vunpack.c.h.bf16 %v1153_v33 }
  0x1b   : > { %1194 = vmatpush3.bf16.msra.mxu0 %v1260_v7  ;;  %1244 = vmatpush3.bf16.msra.mxu1 %v1260_v7  ;;  %v727_v54 = vmul.f32 %v1087_v37, %v1403_v34  ;;  %v743_v55 = vmul.f32 %v1119_v38, %v1403_v34  ;;  %v725_v56 = vmul.f32 %v1083_v39, %v1403_v34  ;;  %v1156_v7 = vld [vmem:[%s1390_s27 + $0x68] sm:$0xff]   ;;  %v1103_v30 = vunpack.c.h.bf16 %v1148_v6 }
  0x1c   : > { %1195 = vmatprep.subr.bf16.mxu0 %v1261_v8  ;;  %1237 = vmatprep.subr.bf16.mxu1 %v1261_v8  ;;  %v741_v57 = vmul.f32 %v1115_v40, %v1403_v34  ;;  %v730_v58 = vmul.f32 %v1094_v41, %v1403_v34  ;;  %v746_v59 = vmul.f32 %v1126_v42, %v1403_v34  ;;  %v1135_v31 = vunpack.c.h.bf16 %v1156_v7 }
  0x1d   : > { %v728_v60 = vmul.f32 %v1090_v43, %v1403_v34  ;;  %v744_v61 = vmul.f32 %v1122_v44, %v1403_v34  ;;  %v1423_v62 = vadd.f32 %v1410_v49, %v726_v45  ;;  %v1426_v63 = vadd.f32 %v1410_v49, %v742_v46 }
  0x1e   : > { %v731_v0 = vmul.f32 %v1095_v47, %v1403_v34  ;;  %v747_v1 = vmul.f32 %v1127_v48, %v1403_v34  ;;  %v1431_v2 = vadd.f32 %v1410_v49, %v724_v50  ;;  %v1434_v3 = vadd.f32 %v1410_v49, %v740_v51 }
  0x1f   : > { %1196 = vmatpush3.bf16.msra.mxu0 %v1261_v8  ;;  %1245 = vmatpush3.bf16.msra.mxu1 %v1261_v8  ;;  %v729_v4 = vmul.f32 %v1091_v52, %v1403_v34  ;;  %v745_v5 = vmul.f32 %v1123_v53, %v1403_v34  ;;  %v1441_v8 = vadd.f32 %v1410_v49, %v727_v54  ;;  %v1106_v37 = vunpack.c.l.bf16 %v1149_v24 }
  0x20   : > { %1197 = vmatprep.subr.bf16.mxu0 %v1262_v9  ;;  %1238 = vmatprep.subr.bf16.mxu1 %v1262_v9  ;;  %v1138_v38 = vunpack.c.l.bf16 %v1157_v25  ;;  %v1107_v45 = vunpack.c.h.bf16 %v1149_v24  ;;  %v1139_v46 = vunpack.c.h.bf16 %v1157_v25  ;;  %v735_v47 = vmul.f32 %v1103_v30, %v1403_v34 }
  0x21   : > { %v1477_v26 = vadd.f32 %v1410_v49, %v729_v4  ;;  %v1480_v27 = vadd.f32 %v1410_v49, %v745_v5  ;;  %v751_v48 = vmul.f32 %v1135_v31, %v1403_v34  ;;  %v736_v54 = vmul.f32 %v1106_v37, %v1403_v34 }
  0x22   : > { %v753_v4 = vmul.f32 %v1139_v46, %v1403_v34  ;;  %v1516_v5 = vadd.f32 %v1410_v49, %v735_v47 }
  0x23   : > { %1198 = vmatpush3.bf16.msra.mxu0 %v1262_v9  ;;  %1246 = vmatpush3.bf16.msra.mxu1 %v1262_v9  ;;  %v1444_v9 = vadd.f32 %v1410_v49, %v743_v55  ;;  %v752_v55 = vmul.f32 %v1138_v38, %v1403_v34 }
  0x26   : > { %1200 = vmatmul.mubr.bf16.vlgmr.msra.gmra.mrb[0].mxu0 %v1265_v10  ;;  %1216 = vmatmul.mubr.bf16.vlgmr.msra.gmra.mrb[0].mxu1 %v1266_v11  ;;  %v1447_v10 = vadd.f32 %v1410_v49, %v725_v56  ;;  %v1450_v11 = vadd.f32 %v1410_v49, %v741_v57 }
  0x27   : > { %1203 = vmatprep.mubr.bf16.mxu0 %v1267_v12  ;;  %1219 = vmatprep.mubr.bf16.mxu1 %v1268_v13  ;;  %v1147_v12 = vld [vmem:[%s1390_s27 + $0x20] sm:$0xff]  }
  0x28   : > { %v1155_v13 = vld [vmem:[%s1390_s27 + $0x60] sm:$0xff]   ;;  %v1098_v28 = vunpack.c.l.bf16 %v1147_v12  ;;  %v1099_v32 = vunpack.c.h.bf16 %v1147_v12 }
  0x29   : > { %v1130_v29 = vunpack.c.l.bf16 %v1155_v13  ;;  %v1131_v33 = vunpack.c.h.bf16 %v1155_v13 }
  0x2a   : > { %v732_v43 = vmul.f32 %v1098_v28, %v1403_v34  ;;  %v733_v50 = vmul.f32 %v1099_v32, %v1403_v34  ;;  %v1550_v32 = vld [vmem:[%s1699_s6] ss:$0 sm:$0xff] }
  0x2b   : > { %v748_v44 = vmul.f32 %v1130_v29, %v1403_v34  ;;  %v749_v51 = vmul.f32 %v1131_v33, %v1403_v34 }
  0x2d   : > { %v1525_v12 = vadd.f32 %v1410_v49, %v749_v51 }
  0x2e   : > { %1204 = vmatmul.mubr.bf16.gmra.mrb[4].mxu0 %v1269_v14  ;;  %1220 = vmatmul.mubr.bf16.gmra.mrb[4].mxu1 %v1270_v15  ;;  %v1455_v14 = vadd.f32 %v1410_v49, %v730_v58  ;;  %v1458_v15 = vadd.f32 %v1410_v49, %v746_v59 }
  0x2f   : > { %1207 = vmatprep.mubr.bf16.mxu0 %v1271_v16  ;;  %1223 = vmatprep.mubr.bf16.mxu1 %v1272_v17  ;;  %v1461_v16 = vadd.f32 %v1410_v49, %v728_v60  ;;  %v1464_v17 = vadd.f32 %v1410_v49, %v744_v61  ;;  %v1505_v60 = vld [vmem:[%s1698_s5] ss:$0 sm:$0xff]  ;;  %v1508_v61 = vadd.f32 %v1410_v49, %v732_v43 }
  0x36   : > { %1208 = vmatmul.mubr.bf16.gmra.mrb[8].mxu0 %v1273_v18  ;;  %1224 = vmatmul.mubr.bf16.gmra.mrb[8].mxu1 %v1274_v19  ;;  %v1150_v18 = vld [vmem:[%s1390_s27 + $0x38] sm:$0xff]   ;;  %v1468_v19 = vadd.f32 %v1410_v49, %v731_v0  ;;  %v1511_v0 = vadd.f32 %v1410_v49, %v748_v44 }
  0x37   : > { %1211 = vmatprep.mubr.bf16.mxu0 %v1275_v20  ;;  %1227 = vmatprep.mubr.bf16.mxu1 %v1276_v21  ;;  %v1471_v20 = vadd.f32 %v1410_v49, %v747_v1  ;;  %v1102_v21 = vunpack.c.l.bf16 %v1148_v6  ;;  %v1110_v35 = vunpack.c.l.bf16 %v1150_v18  ;;  %v1111_v41 = vunpack.c.h.bf16 %v1150_v18 }
  0x38   : > { %v737_v1 = vmul.f32 %v1107_v45, %v1403_v34  ;;  %v1519_v6 = vadd.f32 %v1410_v49, %v751_v48 }
  0x39   : > { %v734_v39 = vmul.f32 %v1102_v21, %v1403_v34  ;;  %v738_v52 = vmul.f32 %v1110_v35, %v1403_v34  ;;  %v739_v58 = vmul.f32 %v1111_v41, %v1403_v34 }
  0x3a   : > { %v1555_v38 = vadd.f32 %v1410_v49, %v737_v1 }
  0x3b   : > { %v1495_v56 = vadd.f32 %v1410_v49, %v734_v39  ;;  %v1528_v21 = vadd.f32 %v1410_v49, %v738_v52  ;;  %v1542_v30 = vadd.f32 %v1410_v49, %v739_v58  ;;  %v1558_v39 = vadd.f32 %v1410_v49, %v753_v4 }
  0x3e   : > { %1212 = vmatmul.mubr.bf16.gmra.mrb[12].mxu0 %v1277_v22  ;;  %1228 = vmatmul.mubr.bf16.gmra.mrb[12].mxu1 %v1278_v23  ;;  %v1134_v22 = vunpack.c.l.bf16 %v1156_v7  ;;  %v1158_v23 = vld [vmem:[%s1390_s27 + $0x78] sm:$0xff]   ;;  %v1522_v7 = vadd.f32 %v1410_v49, %v733_v50 }
  0x3f   : > { %v1142_v36 = vunpack.c.l.bf16 %v1158_v23  ;;  %v1143_v42 = vunpack.c.h.bf16 %v1158_v23  ;;  %v1537_v23 = vadd.f32 %v1410_v49, %v752_v55 }
  0x40   : > { %v750_v40 = vmul.f32 %v1134_v22, %v1403_v34 }
  0x41   : > { %v754_v53 = vmul.f32 %v1142_v36, %v1403_v34  ;;  %v755_v59 = vmul.f32 %v1143_v42, %v1403_v34  ;;  %v1534_v34 = vadd.f32 %v1410_v49, %v736_v54 }
  0x42   : > { %v1498_v57 = vadd.f32 %v1410_v49, %v750_v40 }
  0x43   : > { %v1531_v22 = vadd.f32 %v1410_v49, %v754_v53  ;;  %v1545_v31 = vadd.f32 %v1410_v49, %v755_v59 }
  0xf9   : > { %v1201_v13 = vpop.f32.mrb[0].mxu0  ;;  %v1217_v18 = vpop.f32.mrb[0].mxu1 }
  0xfa   : > { %v804_v24 = vmul.f32 %v1201_v13, %v1505_v60  ;;  %v820_v25 = vmul.f32 %v1217_v18, %v1505_v60  ;;  %v526_v28 = vpop.f32.mrb[1].mxu0  ;;  %v590_v29 = vpop.f32.mrb[1].mxu1 }
  0xfb   : > { %v802_v33 = vmul.f32 %v1505_v60, %v526_v28  ;;  %v818_v35 = vmul.f32 %v1505_v60, %v590_v29  ;;  %v1202_v36 = vpop.f32.mrb[2].mxu0  ;;  %v1218_v37 = vpop.f32.mrb[2].mxu1 }
  0xfc   : > { %v836_v40 = vadd.f32 %v804_v24, %v1423_v62  ;;  %v852_v41 = vadd.f32 %v820_v25, %v1426_v63  ;;  %v805_v42 = vmul.f32 %v1202_v36, %v1505_v60  ;;  %v821_v43 = vmul.f32 %v1218_v37, %v1505_v60  ;;  %v529_v44 = vpop.f32.mrb[3].mxu0  ;;  %v593_v45 = vpop.f32.mrb[3].mxu1 }
  0xfd   : > { %v834_v46 = vadd.f32 %v802_v33, %v1431_v2  ;;  %v850_v47 = vadd.f32 %v818_v35, %v1434_v3  ;;  %v803_v48 = vmul.f32 %v1505_v60, %v529_v44  ;;  %v819_v49 = vmul.f32 %v1505_v60, %v593_v45 }
  0xfe   : > { %v875_v50 = vadd.f32 %v1550_v32, %v836_v40  ;;  %v891_v62 = vadd.f32 %v1550_v32, %v852_v41  ;;  %v837_v63 = vadd.f32 %v805_v42, %v1441_v8  ;;  %v853_v51 = vadd.f32 %v821_v43, %v1444_v9 }
  0xff   : > { %v873_v2 = vadd.f32 %v1550_v32, %v834_v46  ;;  %v889_v3 = vadd.f32 %v1550_v32, %v850_v47  ;;  %v835_v52 = vadd.f32 %v803_v48, %v1447_v10  ;;  %v851_v53 = vadd.f32 %v819_v49, %v1450_v11 }
 0x100   : > { %v907_v54 = vmax.f32 %v875_v50, 0.0  ;;  %v923_v55 = vmax.f32 %v891_v62, 0.0  ;;  %v876_v8 = vadd.f32 %v1550_v32, %v837_v63  ;;  %v892_v9 = vadd.f32 %v1550_v32, %v853_v51 }
 0x101   : > { %v905_v58 = vmax.f32 %v873_v2, 0.0  ;;  %v921_v59 = vmax.f32 %v889_v3, 0.0  ;;  %v874_v1 = vadd.f32 %v1550_v32, %v835_v52  ;;  %v890_v4 = vadd.f32 %v1550_v32, %v851_v53  ;;  %v1205_v13 = vpop.f32.mrb[4].mxu0  ;;  %v1221_v18 = vpop.f32.mrb[4].mxu1 }
 0x102   : > { %939 = vst [vmem:[%s1576_s15 + $0x10] sm:$0xff] %v907_v54  ;;  %955 = vst [vmem:[%s1576_s15 + $0x90] sm:$0xff] %v923_v55  ;;  %v908_v10 = vmax.f32 %v876_v8, 0.0  ;;  %v924_v11 = vmax.f32 %v892_v9, 0.0  ;;  %v808_v24 = vmul.f32 %v1205_v13, %v1505_v60  ;;  %v824_v25 = vmul.f32 %v1221_v18, %v1505_v60  ;;  %v542_v28 = vpop.f32.mrb[5].mxu0  ;;  %v606_v29 = vpop.f32.mrb[5].mxu1 }
 0x103   : > { %937 = vst [vmem:[%s1576_s15] sm:$0xff] %v905_v58  ;;  %953 = vst [vmem:[%s1576_s15 + $0x80] sm:$0xff] %v921_v59  ;;  %v906_v33 = vmax.f32 %v874_v1, 0.0  ;;  %v922_v35 = vmax.f32 %v890_v4, 0.0  ;;  %v806_v36 = vmul.f32 %v1505_v60, %v542_v28  ;;  %v822_v37 = vmul.f32 %v1505_v60, %v606_v29  ;;  %v1206_v40 = vpop.f32.mrb[6].mxu0  ;;  %v1222_v41 = vpop.f32.mrb[6].mxu1 }
 0x104   : > { %940 = vst [vmem:[%s1576_s15 + $0x18] sm:$0xff] %v908_v10  ;;  %956 = vst [vmem:[%s1576_s15 + $0x98] sm:$0xff] %v924_v11  ;;  %v840_v42 = vadd.f32 %v808_v24, %v1455_v14  ;;  %v856_v43 = vadd.f32 %v824_v25, %v1458_v15  ;;  %v809_v44 = vmul.f32 %v1206_v40, %v1505_v60  ;;  %v545_v46 = vpop.f32.mrb[7].mxu0  ;;  %v609_v47 = vpop.f32.mrb[7].mxu1 }
 0x105   : > { %v825_v45 = vmul.f32 %v1222_v41, %v1505_v60  ;;  %938 = vst [vmem:[%s1576_s15 + $0x8] sm:$0xff] %v906_v33  ;;  %954 = vst [vmem:[%s1576_s15 + $0x88] sm:$0xff] %v922_v35  ;;  %v838_v48 = vadd.f32 %v806_v36, %v1461_v16  ;;  %v854_v49 = vadd.f32 %v822_v37, %v1464_v17 }
 0x106   : > { %v807_v50 = vmul.f32 %v1505_v60, %v545_v46  ;;  %v823_v62 = vmul.f32 %v1505_v60, %v609_v47  ;;  %v879_v14 = vadd.f32 %v1550_v32, %v840_v42  ;;  %v895_v15 = vadd.f32 %v1550_v32, %v856_v43 }
 0x107   : > { %v841_v63 = vadd.f32 %v809_v44, %v1468_v19  ;;  %v857_v51 = vadd.f32 %v825_v45, %v1471_v20  ;;  %v877_v2 = vadd.f32 %v1550_v32, %v838_v48  ;;  %v893_v16 = vadd.f32 %v1550_v32, %v854_v49 }
 0x108   : > { %v839_v17 = vadd.f32 %v807_v50, %v1477_v26  ;;  %v855_v3 = vadd.f32 %v823_v62, %v1480_v27  ;;  %v911_v52 = vmax.f32 %v879_v14, 0.0  ;;  %v927_v53 = vmax.f32 %v895_v15, 0.0 }
 0x109   : > { %v880_v54 = vadd.f32 %v1550_v32, %v841_v63  ;;  %v896_v55 = vadd.f32 %v1550_v32, %v857_v51  ;;  %v909_v19 = vmax.f32 %v877_v2, 0.0  ;;  %v925_v8 = vmax.f32 %v893_v16, 0.0  ;;  %v1209_v58 = vpop.f32.mrb[8].mxu0  ;;  %v1225_v59 = vpop.f32.mrb[8].mxu1 }
 0x10a   : > { %v878_v20 = vadd.f32 %v1550_v32, %v839_v17  ;;  %v894_v9 = vadd.f32 %v1550_v32, %v855_v3  ;;  %943 = vst [vmem:[%s1576_s15 + $0x30] sm:$0xff] %v911_v52  ;;  %959 = vst [vmem:[%s1576_s15 + $0xb0] sm:$0xff] %v927_v53  ;;  %v812_v1 = vmul.f32 %v1209_v58, %v1505_v60  ;;  %v558_v13 = vpop.f32.mrb[9].mxu0  ;;  %v622_v18 = vpop.f32.mrb[9].mxu1 }
 0x10b   : > { %v912_v26 = vmax.f32 %v880_v54, 0.0  ;;  %v928_v27 = vmax.f32 %v896_v55, 0.0  ;;  %v828_v4 = vmul.f32 %v1225_v59, %v1505_v60  ;;  %941 = vst [vmem:[%s1576_s15 + $0x20] sm:$0xff] %v909_v19  ;;  %957 = vst [vmem:[%s1576_s15 + $0xa0] sm:$0xff] %v925_v8  ;;  %v810_v24 = vmul.f32 %v1505_v60, %v558_v13  ;;  %v1210_v28 = vpop.f32.mrb[10].mxu0  ;;  %v1226_v29 = vpop.f32.mrb[10].mxu1 }
 0x10c   : > { %v910_v10 = vmax.f32 %v878_v20, 0.0  ;;  %v926_v11 = vmax.f32 %v894_v9, 0.0  ;;  %v826_v25 = vmul.f32 %v1505_v60, %v622_v18  ;;  %v844_v33 = vadd.f32 %v812_v1, %v1495_v56  ;;  %v561_v40 = vpop.f32.mrb[11].mxu0  ;;  %v625_v41 = vpop.f32.mrb[11].mxu1 }
 0x10d   : > { %944 = vst [vmem:[%s1576_s15 + $0x38] sm:$0xff] %v912_v26  ;;  %960 = vst [vmem:[%s1576_s15 + $0xb8] sm:$0xff] %v928_v27  ;;  %v860_v35 = vadd.f32 %v828_v4, %v1498_v57  ;;  %v813_v36 = vmul.f32 %v1210_v28, %v1505_v60  ;;  %v829_v37 = vmul.f32 %v1226_v29, %v1505_v60 }
 0x10e   : > { %942 = vst [vmem:[%s1576_s15 + $0x28] sm:$0xff] %v910_v10  ;;  %958 = vst [vmem:[%s1576_s15 + $0xa8] sm:$0xff] %v926_v11  ;;  %v842_v42 = vadd.f32 %v810_v24, %v1508_v61  ;;  %v858_v43 = vadd.f32 %v826_v25, %v1511_v0  ;;  %v811_v44 = vmul.f32 %v1505_v60, %v561_v40 }
 0x10f   : > { %v827_v45 = vmul.f32 %v1505_v60, %v625_v41  ;;  %v883_v56 = vadd.f32 %v1550_v32, %v844_v33  ;;  %v899_v57 = vadd.f32 %v1550_v32, %v860_v35  ;;  %v845_v46 = vadd.f32 %v813_v36, %v1516_v5 }
 0x110   : > { %v861_v47 = vadd.f32 %v829_v37, %v1519_v6  ;;  %v881_v48 = vadd.f32 %v1550_v32, %v842_v42  ;;  %v897_v61 = vadd.f32 %v1550_v32, %v858_v43  ;;  %v843_v0 = vadd.f32 %v811_v44, %v1522_v7 }
 0x111   : > { %v859_v49 = vadd.f32 %v827_v45, %v1525_v12  ;;  %v915_v50 = vmax.f32 %v883_v56, 0.0  ;;  %v931_v62 = vmax.f32 %v899_v57, 0.0  ;;  %v884_v14 = vadd.f32 %v1550_v32, %v845_v46  ;;  %v1213_v2 = vpop.f32.mrb[12].mxu0  ;;  %v1229_v16 = vpop.f32.mrb[12].mxu1 }
 0x112   : > { %v900_v15 = vadd.f32 %v1550_v32, %v861_v47  ;;  %v913_v5 = vmax.f32 %v881_v48, 0.0  ;;  %v929_v63 = vmax.f32 %v897_v61, 0.0  ;;  %v882_v6 = vadd.f32 %v1550_v32, %v843_v0  ;;  %v574_v52 = vpop.f32.mrb[13].mxu0  ;;  %v638_v53 = vpop.f32.mrb[13].mxu1 }
 0x113   : > { %v898_v51 = vadd.f32 %v1550_v32, %v859_v49  ;;  %947 = vst [vmem:[%s1576_s15 + $0x50] sm:$0xff] %v915_v50  ;;  %963 = vst [vmem:[%s1576_s15 + $0xd0] sm:$0xff] %v931_v62  ;;  %v916_v7 = vmax.f32 %v884_v14, 0.0  ;;  %v816_v17 = vmul.f32 %v1213_v2, %v1505_v60  ;;  %v832_v3 = vmul.f32 %v1229_v16, %v1505_v60  ;;  %v1214_v20 = vpop.f32.mrb[14].mxu0  ;;  %v1230_v9 = vpop.f32.mrb[14].mxu1 }
 0x114   : > { %v932_v12 = vmax.f32 %v900_v15, 0.0  ;;  %945 = vst [vmem:[%s1576_s15 + $0x40] sm:$0xff] %v913_v5  ;;  %961 = vst [vmem:[%s1576_s15 + $0xc0] sm:$0xff] %v929_v63  ;;  %v914_v54 = vmax.f32 %v882_v6, 0.0  ;;  %v814_v19 = vmul.f32 %v1505_v60, %v574_v52  ;;  %v830_v8 = vmul.f32 %v1505_v60, %v638_v53  ;;  %v577_v1 = vpop.f32.mrb[15].mxu0  ;;  %v641_v4 = vpop.f32.mrb[15].mxu1 }
 0x115   : > { %v930_v55 = vmax.f32 %v898_v51, 0.0  ;;  %948 = vst [vmem:[%s1576_s15 + $0x58] sm:$0xff] %v916_v7  ;;  %v848_v58 = vadd.f32 %v816_v17, %v1528_v21  ;;  %v864_v59 = vadd.f32 %v832_v3, %v1531_v22  ;;  %v817_v26 = vmul.f32 %v1214_v20, %v1505_v60 }
 0x116   : > { %964 = vst [vmem:[%s1576_s15 + $0xd8] sm:$0xff] %v932_v12  ;;  %v833_v27 = vmul.f32 %v1230_v9, %v1505_v60  ;;  %946 = vst [vmem:[%s1576_s15 + $0x48] sm:$0xff] %v914_v54  ;;  %v846_v13 = vadd.f32 %v814_v19, %v1534_v34  ;;  %v862_v18 = vadd.f32 %v830_v8, %v1537_v23 }
 0x117   : > { %962 = vst [vmem:[%s1576_s15 + $0xc8] sm:$0xff] %v930_v55  ;;  %v815_v10 = vmul.f32 %v1505_v60, %v577_v1  ;;  %v831_v11 = vmul.f32 %v1505_v60, %v641_v4  ;;  %v887_v21 = vadd.f32 %v1550_v32, %v848_v58  ;;  %v903_v22 = vadd.f32 %v1550_v32, %v864_v59 }
 0x118   : > { %v849_v24 = vadd.f32 %v817_v26, %v1542_v30  ;;  %v865_v25 = vadd.f32 %v833_v27, %v1545_v31  ;;  %v885_v28 = vadd.f32 %v1550_v32, %v846_v13  ;;  %v901_v34 = vadd.f32 %v1550_v32, %v862_v18 }
 0x119   : > { %v847_v23 = vadd.f32 %v815_v10, %v1555_v38  ;;  %v863_v60 = vadd.f32 %v831_v11, %v1558_v39  ;;  %v919_v29 = vmax.f32 %v887_v21, 0.0  ;;  %v935_v33 = vmax.f32 %v903_v22, 0.0 }
 0x11a   : > { %v888_v35 = vadd.f32 %v1550_v32, %v849_v24  ;;  %v904_v30 = vadd.f32 %v1550_v32, %v865_v25  ;;  %v917_v31 = vmax.f32 %v885_v28, 0.0  ;;  %v933_v36 = vmax.f32 %v901_v34, 0.0 }
 0x11b   : > { %v886_v37 = vadd.f32 %v1550_v32, %v847_v23  ;;  %v902_v40 = vadd.f32 %v1550_v32, %v863_v60  ;;  %951 = vst [vmem:[%s1576_s15 + $0x70] sm:$0xff] %v919_v29  ;;  %967 = vst [vmem:[%s1576_s15 + $0xf0] sm:$0xff] %v935_v33 }
 0x11c   : > { %v920_v38 = vmax.f32 %v888_v35, 0.0  ;;  %v936_v39 = vmax.f32 %v904_v30, 0.0  ;;  %949 = vst [vmem:[%s1576_s15 + $0x60] sm:$0xff] %v917_v31  ;;  %965 = vst [vmem:[%s1576_s15 + $0xe0] sm:$0xff] %v933_v36 }
 0x11d   : > { %v918_v41 = vmax.f32 %v886_v37, 0.0  ;;  %v934_v42 = vmax.f32 %v902_v40, 0.0 }
 0x11e   : > { %952 = vst [vmem:[%s1576_s15 + $0x78] sm:$0xff] %v920_v38  ;;  %968 = vst [vmem:[%s1576_s15 + $0xf8] sm:$0xff] %v936_v39 }
 0x11f   : > { %950 = vst [vmem:[%s1576_s15 + $0x68] sm:$0xff] %v918_v41  ;;  %966 = vst [vmem:[%s1576_s15 + $0xe8] sm:$0xff] %v934_v42 }
 0x120 PF: > { %s17_s24 = sadd.s32 1, %s1285_s24  }
 0x121   : > { %p14_p4 = scmp.ge.s32.totalorder %s17_s24, 4  }
 0x123   :  { %16 = sbr.rel (!%p14_p4) target bundleno = 1 (0x1), region = 81 }

// kernel: basic_block_forward.4
= control target key start
LH: loop header
LB: loop body
LE: loop exit
PB: predicated region body
PF: predicated region fallthrough
CT: control target
= control target key end

     0   :  { %s4789_s21 = smov 0   ;;  %s6054_s0 = inlined_call_operand.vmem [shape: bf16[2,16,16,128], index: 0, kind: input, shape index: {}]   ;;  %s6055_s1 = inlined_call_operand.vmem [shape: f32[1,128], index: 1, kind: input, shape index: {}]   ;;  %s6056_s2 = inlined_call_operand.vmem [shape: f32[1,128], index: 2, kind: input, shape index: {}]   ;;  %s6057_s3 = inlined_call_operand.vmem [shape: bf16[3,384,128], index: 3, kind: input, shape index: {}]   ;;  %s6058_s4 = inlined_call_operand.vmem [shape: bf16[2,16,16,128], index: 4, kind: output, shape index: {0}]   ;;  %s6059_s5 = inlined_call_operand.vmem [shape: f32[2,1,128], index: 5, kind: output, shape index: {1}]   ;;  %s6060_s6 = inlined_call_operand.vmem [shape: f32[2,1,128], index: 6, kind: output, shape index: {2}]  }
   0x1 LB: > { %s3377_s22 = sadd.s32 4294967295, %s4751_s21   ;;  %p3381_p0 = scmp.ge.s32.totalorder %s4751_s21, 1  ;;  %s4751_s21 = sphi %s4789_s21, %s17_s21  }
   0x2   : > { %p217_p1 = scmp.lt.s32.totalorder %s4751_s21, 3 }
   0x4   : > { %p218_p2 = pnand %p3381_p0, %p217_p1 }
   0x6   : > { %221 = sbr.rel (%p218_p2) target bundleno = 693 (0x2b5), region = 36 }
   0xd   : > { %v4800_v0 = vld [vmem:[%s6057_s3 + $0x140] sm:$0xff]   ;;  %v4813_v3 = vld [vmem:[%s6057_s3 + $0x148] sm:$0xff]   ;;  %v4825_v6 = vld [vmem:[%s6057_s3 + $0x150] sm:$0xff]   ;;  %v4753_v7 = vmov 0   ;;  %p253_p3 = scmp.lt.s32.totalorder %s3377_s22, 1  ;;  %vm611_vm0 = vcmask 1040384  }
   0xe   : > { %v4620_v1 = vld [vmem:[%s6057_s3 + $0x100] sm:$0xff]   ;;  %4434 = vmatprep.subr.bf16.mxu1 %v4800_v0  ;;  %v4623_v4 = vld [vmem:[%s6057_s3 + $0x108] sm:$0xff]   ;;  %460 = vst [vmem:[#allocation2] sm:$0xf] %v4753_v7  ;;  %461 = vst [vmem:[#allocation2 + $0x4] sm:$0xf] %v4753_v7 }
   0xf   : > { %v4621_v2 = vld [vmem:[%s6057_s3 + $0xc0] sm:$0xff]   ;;  %4442 = vmatpush3.bf16.msra.mxu1 %v4800_v0  ;;  %3882 = vmatprep.subr.bf16.mxu0 %v4620_v1  ;;  %v4624_v5 = vld [vmem:[%s6057_s3 + $0xc8] sm:$0xff]   ;;  %462 = vst [vmem:[#allocation2 + $0x8] sm:$0x1] %v4753_v7  ;;  %464 = vst [vmem:[#allocation2 + $0xcc] sm:$0xf] %v4753_v7 }
  0x10   : > { %3883 = vmatpush3.bf16.msra.mxu0 %v4621_v2  ;;  %4435 = vmatprep.subr.bf16.mxu1 %v4813_v3  ;;  %465 = vst [vmem:[#allocation2 + $0xd0] sm:$0xf] %v4753_v7  ;;  %466 = vst [vmem:[#allocation2 + $0xd4] sm:$0x1] %v4753_v7  ;;  %v4626_v8 = vld [vmem:[%s6057_s3 + $0x110] sm:$0xff]   ;;  %v4838_v10 = vld [vmem:[%s6057_s3 + $0x158] sm:$0xff]  }
  0x11   : > { %3884 = vmatprep.subr.bf16.mxu0 %v4623_v4  ;;  %v4627_v9 = vld [vmem:[%s6057_s3 + $0xd0] sm:$0xff]   ;;  %v4629_v11 = vld [vmem:[%s6057_s3 + $0x118] sm:$0xff]   ;;  %v4853_v13 = vld [vmem:[%s6057_s3 + $0x160] sm:$0xff]   ;;  %s6070_s22 = smov (!%p253_p3, %s3377_s22), 1  ;;  %vm612_vm1 = vsmask.f32 256 }
  0x12   : > { %v4630_v12 = vld [vmem:[%s6057_s3 + $0xd8] sm:$0xff]   ;;  %v4632_v14 = vld [vmem:[%s6057_s3 + $0x120] sm:$0xff]   ;;  %v4870_v16 = vld [vmem:[%s6057_s3 + $0x168] sm:$0xff]   ;;  %s3674_s11 = sshll.u32 %s6070_s22, 7  ;;  %vm1278_vm3 = vcmask 1046528   ;;  %s265_s16 = scalar_lea.vmem %s6059_s5, %s6070_s22 }
  0x13   : > { %4443 = vmatpush3.bf16.msra.mxu1 %v4813_v3  ;;  %v4633_v15 = vld [vmem:[%s6057_s3 + $0xe0] sm:$0xff]   ;;  %v4635_v17 = vld [vmem:[%s6057_s3 + $0x128] sm:$0xff]   ;;  %v4884_v19 = vld [vmem:[%s6057_s3 + $0x170] sm:$0xff]   ;;  %s4891_s18 = scalar_lea.vmem %s6054_s0, %s3674_s11  ;;  %vm1069_vm4 = vsmask.f32 7424  ;;  %s5818_s14 = scalar_lea.vmem %s6058_s4, %s3674_s11 }
  0x14   : > { %3885 = vmatpush3.bf16.msra.mxu0 %v4624_v5  ;;  %4436 = vmatprep.subr.bf16.mxu1 %v4825_v6  ;;  %v4636_v18 = vld [vmem:[%s6057_s3 + $0xe8] sm:$0xff]   ;;  %v4638_v20 = vld [vmem:[%s6057_s3 + $0x130] sm:$0xff]   ;;  %v3859_v22 = vld [vmem:[%s4891_s18 + $0x40] sm:$0xff]   ;;  %s268_s20 = scalar_lea.vmem %s6060_s6, %s6070_s22 }
  0x15   : > { %3886 = vmatprep.subr.bf16.mxu0 %v4626_v8  ;;  %v4639_v21 = vld [vmem:[%s6057_s3 + $0xf0] sm:$0xff]   ;;  %v4904_v23 = vld [vmem:[%s6055_s1] ss:$0 sm:$0xff]  ;;  %v4640_v24 = vld [vmem:[%s6057_s3 + $0x178] sm:$0xff]   ;;  %v3742_v25 = vunpack.c.l.bf16 %v3859_v22  ;;  %v3743_v26 = vunpack.c.h.bf16 %v3859_v22 }
  0x16   : > { %v4641_v27 = vld [vmem:[%s6057_s3 + $0x138] sm:$0xff]   ;;  %v4916_v28 = vld [vmem:[%s6056_s2] ss:$0 sm:$0xff]  ;;  %v3860_v29 = vld [vmem:[%s4891_s18 + $0x48] sm:$0xff]  }
  0x17   : > { %4444 = vmatpush3.bf16.msra.mxu1 %v4825_v6  ;;  %v357_v30 = vmul.f32 %v3742_v25, %v4904_v23  ;;  %v358_v31 = vmul.f32 %v3743_v26, %v4904_v23  ;;  %v4644_v32 = vld [vmem:[%s6057_s3 + $0xf8] sm:$0xff]   ;;  %v3746_v33 = vunpack.c.l.bf16 %v3860_v29  ;;  %v3747_v34 = vunpack.c.h.bf16 %v3860_v29  ;;  %v4647_v35 = vld [vmem:[%s6057_s3 + $0x40] sm:$0xff]   ;;  %v3861_v46 = vld [vmem:[%s4891_s18 + $0x50] sm:$0xff]  }
  0x18   : > { %3887 = vmatpush3.bf16.msra.mxu0 %v4627_v9  ;;  %4437 = vmatprep.subr.bf16.mxu1 %v4838_v10  ;;  %v3709_v39 = vld [vmem:[%s4891_s18] sm:$0xff]   ;;  %v3862_v47 = vld [vmem:[%s4891_s18 + $0x58] sm:$0xff]   ;;  %v3750_v51 = vunpack.c.l.bf16 %v3861_v46  ;;  %v3751_v54 = vunpack.c.h.bf16 %v3861_v46  ;;  %vm4946_vm2 = vmand %vm611_vm0, %vm612_vm1 }
  0x19   : > { %3888 = vmatprep.subr.bf16.mxu0 %v4629_v11  ;;  %v396_v36 = vadd.f32 %v4916_v28, %v357_v30  ;;  %v397_v37 = vadd.f32 %v4916_v28, %v358_v31  ;;  %v359_v38 = vmul.f32 %v3746_v33, %v4904_v23  ;;  %v360_v40 = vmul.f32 %v3747_v34, %v4904_v23  ;;  %v3852_v30 = vld [vmem:[%s4891_s18 + $0x8] sm:$0xff]  }
  0x1a   : > { %v3710_v41 = vunpack.c.l.bf16 %v3709_v39  ;;  %v3711_v42 = vunpack.c.h.bf16 %v3709_v39  ;;  %v3754_v55 = vunpack.c.l.bf16 %v3862_v47  ;;  %v361_v59 = vmul.f32 %v3750_v51, %v4904_v23 }
  0x1b   : > { %4445 = vmatpush3.bf16.msra.mxu1 %v4838_v10  ;;  %v428_v43 = vmax.f32 %v396_v36, 0.0  ;;  %v429_v44 = vmax.f32 %v397_v37, 0.0  ;;  %v398_v45 = vadd.f32 %v4916_v28, %v359_v38  ;;  %v399_v48 = vadd.f32 %v4916_v28, %v360_v40 }
  0x1c   : > { %3889 = vmatpush3.bf16.msra.mxu0 %v4630_v12  ;;  %4438 = vmatprep.subr.bf16.mxu1 %v4853_v13  ;;  %v341_v49 = vmul.f32 %v3710_v41, %v4904_v23  ;;  %v342_v50 = vmul.f32 %v3711_v42, %v4904_v23  ;;  %v362_v62 = vmul.f32 %v3751_v54, %v4904_v23  ;;  %v3755_v63 = vunpack.c.h.bf16 %v3862_v47 }
  0x1d   : > { %3890 = vmatprep.subr.bf16.mxu0 %v4632_v14  ;;  %v452_v52 = vpack.c.bf16 %v429_v44, %v428_v43  ;;  %v430_v53 = vmax.f32 %v398_v45, 0.0  ;;  %v431_v56 = vmax.f32 %v399_v48, 0.0  ;;  %v400_v7 = vadd.f32 %v4916_v28, %v361_v59  ;;  %v3863_v43 = vld [vmem:[%s4891_s18 + $0x60] sm:$0xff]  }
  0x1e   : > { %v380_v57 = vadd.f32 %v4916_v28, %v341_v49  ;;  %v381_v58 = vadd.f32 %v4916_v28, %v342_v50  ;;  %v401_v9 = vadd.f32 %v4916_v28, %v362_v62  ;;  %v363_v11 = vmul.f32 %v3754_v55, %v4904_v23 }
  0x1f   : > { %4446 = vmatpush3.bf16.msra.mxu1 %v4853_v13  ;;  %v524_v60 = vshrl.u32 %v452_v52, 16  ;;  %v527_v61 = vshll.u32 %v452_v52, 16  ;;  %v453_v2 = vpack.c.bf16 %v431_v56, %v430_v53  ;;  %v364_v12 = vmul.f32 %v3755_v63, %v4904_v23 }
  0x20   : > { %3891 = vmatpush3.bf16.msra.mxu0 %v4633_v15  ;;  %4439 = vmatprep.subr.bf16.mxu1 %v4870_v16  ;;  %v412_v4 = vmax.f32 %v380_v57, 0.0  ;;  %v413_v5 = vmax.f32 %v381_v58, 0.0  ;;  %v433_v22 = vmax.f32 %v401_v9, 0.0  ;;  %v3714_v46 = vunpack.c.l.bf16 %v3852_v30 }
  0x21   : > { %3892 = vmatprep.subr.bf16.mxu0 %v4635_v17  ;;  %v526_v8 = vrot.slane %v524_v60, 7  ;;  %v531_v14 = vshrl.u32 %v453_v2, 16  ;;  %v534_v15 = vshll.u32 %v453_v2, 16  ;;  %v403_v33 = vadd.f32 %v4916_v28, %v364_v12  ;;  %v3864_v2 = vld [vmem:[%s4891_s18 + $0x68] sm:$0xff]  }
  0x22   : > { %v444_v17 = vpack.c.bf16 %v413_v5, %v412_v4  ;;  %v3715_v47 = vunpack.c.h.bf16 %v3852_v30  ;;  %v343_v55 = vmul.f32 %v3714_v46, %v4904_v23  ;;  %v3758_v58 = vunpack.c.l.bf16 %v3863_v43 }
  0x23   : > { %4447 = vmatpush3.bf16.msra.mxu1 %v4870_v16  ;;  %v533_v26 = vrot.slane %v531_v14, 7  ;;  %v435_v45 = vmax.f32 %v403_v33, 0.0  ;;  %v3759_v59 = vunpack.c.h.bf16 %v3863_v43  ;;  %v3763_v30 = vunpack.c.h.bf16 %v3864_v2  ;;  %v4651_v43 = vld [vmem:[%s6057_s3 + $0x48] sm:$0xff]  }
  0x24   : > { %3893 = vmatpush3.bf16.msra.mxu0 %v4636_v18  ;;  %4440 = vmatprep.subr.bf16.mxu1 %v4884_v19  ;;  %v432_v18 = vmax.f32 %v400_v7, 0.0  ;;  %v471_v29 = vshll.u32 %v444_v17, 16  ;;  %v344_v57 = vmul.f32 %v3715_v47, %v4904_v23  ;;  %v365_v14 = vmul.f32 %v3758_v58, %v4904_v23  ;;  %v4652_v58 = vld [vmem:[%s6057_s3 + $0x8] sm:$0xff]  }
  0x25   : > { %3894 = vmatprep.subr.bf16.mxu0 %v4638_v20  ;;  %v529_v20 = vor.u32 %v527_v61, %v526_v8  ;;  %v536_v37 = vor.u32 %v534_v15, %v533_v26  ;;  %v639_v38 = vsel %vm4946_vm2, %v533_v26, 0  ;;  %v366_v15 = vmul.f32 %v3759_v59, %v4904_v23 }
  0x26   : > { %v3417_v39 = vcombine.low %v639_v38, %v639_v38  ;;  %v383_v9 = vadd.f32 %v4916_v28, %v344_v57 }
  0x27   : > { %4448 = vmatpush3.bf16.msra.mxu1 %v4884_v19  ;;  %v622_v31 = vsel %vm4946_vm2, 0, %v529_v20  ;;  %v623_v44 = vsel %vm4946_vm2, 0, %v536_v37  ;;  %v4648_v37 = vld [vmem:[%s6057_s3] sm:$0xff]  }
  0x28   : > { %3895 = vmatpush3.bf16.msra.mxu0 %v4639_v21  ;;  %4441 = vmatprep.subr.bf16.mxu1 %v4640_v24  ;;  %v638_v21 = vsel %vm4946_vm2, %v526_v8, 0  ;;  %v3413_v36 = vcombine.high %v622_v31, %v622_v31  ;;  %v3415_v48 = vcombine.low %v623_v44, %v623_v44  ;;  %v3416_v49 = vcombine.high %v623_v44, %v623_v44 }
  0x29   : > { %3896 = vmatprep.subr.bf16.mxu0 %v4641_v27  ;;  %v3414_v25 = vcombine.low %v638_v21, %v638_v21  ;;  %v468_v27 = vshrl.u32 %v444_v17, 16  ;;  %852 = vst [vmem:[#allocation2 + $0x80] sm:$0x1] %v3417_v39  ;;  %v382_v8 = vadd.f32 %v4916_v28, %v343_v55  ;;  %v3853_v17 = vld [vmem:[%s4891_s18 + $0x10] sm:$0xff]   ;;  %v415_v33 = vmax.f32 %v383_v9, 0.0 }
  0x2a   : > { %848 = vst [vmem:[#allocation2 + $0x70] sm:$0xf] %v3413_v36  ;;  %850 = vst [vmem:[#allocation2 + $0x78] sm:$0xf] %v3415_v48  ;;  %v368_v39 = vmul.f32 %v3763_v30, %v4904_v23 }
  0x2b   : > { %4449 = vmatpush3.bf16.msra.mxu1 %v4640_v24  ;;  %v402_v24 = vadd.f32 %v4916_v28, %v363_v11  ;;  %849 = vst [vmem:[#allocation2 + $0x74] sm:$0x1] %v3414_v25  ;;  %v470_v40 = vrot.slane %v468_v27, 7  ;;  %851 = vst [vmem:[#allocation2 + $0x7c] sm:$0xf] %v3416_v49  ;;  %v4983_v27 = vadd.f32 %v4916_v28, %v365_v14 }
  0x2c   : > { %3897 = vmatpush3.bf16.msra.mxu0 %v4644_v32  ;;  %4018 = vmatprep.subr.bf16.mxu1 %v4647_v35  ;;  %v454_v32 = vpack.c.bf16 %v433_v22, %v432_v18  ;;  %v3412_v35 = vcombine.low %v622_v31, %v622_v31 }
  0x2d   : > { %4290 = vmatprep.subr.bf16.mxu0 %v4800_v0  ;;  %v434_v34 = vmax.f32 %v402_v24, 0.0  ;;  %v473_v50 = vor.u32 %v471_v29, %v470_v40  ;;  %v630_v51 = vsel %vm4946_vm2, %v470_v40, 0  ;;  %v3762_v24 = vunpack.c.l.bf16 %v3864_v2 }
  0x2e   : > { %v538_v41 = vshrl.u32 %v454_v32, 16  ;;  %v541_v42 = vshll.u32 %v454_v32, 16  ;;  %847 = vst [vmem:[#allocation2 + $0x6c] sm:$0xf] %v3412_v35  ;;  %v3390_v52 = vcombine.low %v630_v51, %v630_v51  ;;  %v4986_v29 = vadd.f32 %v4916_v28, %v366_v15  ;;  %v5007_v51 = vld [vmem:[%s4891_s18 + $0x70] sm:$0xff]  }
  0x2f   : > { %v455_v54 = vpack.c.bf16 %v435_v45, %v434_v34  ;;  %v614_v56 = vsel %vm4946_vm2, 0, %v473_v50  ;;  %v414_v32 = vmax.f32 %v382_v8, 0.0  ;;  %v367_v34 = vmul.f32 %v3762_v24, %v4904_v23  ;;  %v4657_v15 = vld [vmem:[%s6057_s3 + $0x50] sm:$0xff]  }
  0x30   : > { %v540_v53 = vrot.slane %v538_v41, 7  ;;  %v3388_v60 = vcombine.low %v614_v56, %v614_v56  ;;  %v3389_v61 = vcombine.high %v614_v56, %v614_v56  ;;  %825 = vst [vmem:[#allocation2 + $0x14] sm:$0x1] %v3390_v52  ;;  %v4646_v25 = vld [vmem:[#allocation2 + $0x80] ss:$0 sps:$4 sm:$0x11]   ;;  %v3718_v40 = vunpack.c.l.bf16 %v3853_v17 }
  0x31   : > { %v545_v7 = vshrl.u32 %v455_v54, 16  ;;  %v548_v12 = vshll.u32 %v455_v54, 16  ;;  %v1310_v36 = vrot.slane %v4646_v25, 1  ;;  %v445_v45 = vpack.c.bf16 %v415_v33, %v414_v32 }
  0x32   : > { %v543_v62 = vor.u32 %v541_v42, %v540_v53  ;;  %v640_v63 = vsel %vm4946_vm2, %v540_v53, 0  ;;  %v4643_v4 = vld [vmem:[#allocation2 + $0x74] ss:$0 sps:$4 sm:$0x11]   ;;  %823 = vst [vmem:[#allocation2 + $0xc] sm:$0xf] %v3388_v60  ;;  %v406_v46 = vadd.f32 %v4916_v28, %v367_v34  ;;  %v407_v56 = vadd.f32 %v4916_v28, %v368_v39 }
  0x33   : > { %v3420_v5 = vcombine.low %v640_v63, %v640_v63  ;;  %824 = vst [vmem:[#allocation2 + $0x10] sm:$0xf] %v3389_v61  ;;  %v1307_v20 = vrot.slane %v4643_v4, 1  ;;  %v547_v26 = vrot.slane %v545_v7, 7  ;;  %v4645_v35 = vld [vmem:[#allocation2 + $0x78] sm:$0xff]   ;;  %v436_v50 = vmax.f32 %v4983_v27, 0.0 }
  0x34   : > { %v624_v11 = vsel %vm4946_vm2, 0, %v543_v62  ;;  %v1309_v47 = vrot.slane %v4645_v35, 1  ;;  %v475_v60 = vshrl.u32 %v445_v45, 16  ;;  %v3719_v61 = vunpack.c.h.bf16 %v3853_v17 }
  0x35   : > { %v4642_v18 = vld [vmem:[#allocation2 + $0x6c] sm:$0xff]   ;;  %v3418_v21 = vcombine.low %v624_v11, %v624_v11  ;;  %v3419_v22 = vcombine.high %v624_v11, %v624_v11  ;;  %855 = vst [vmem:[#allocation2 + $0x8c] sm:$0x1] %v3420_v5  ;;  %v550_v38 = vor.u32 %v548_v12, %v547_v26  ;;  %v641_v44 = vsel %vm4946_vm2, %v547_v26, 0 }
  0x36   : > { %v1306_v31 = vrot.slane %v4642_v18, 1  ;;  %v3423_v49 = vcombine.low %v641_v44, %v641_v44  ;;  %v5013_v57 = vsel %vm1278_vm3, %v1309_v47, %v1310_v36  ;;  %v345_v62 = vmul.f32 %v3718_v40, %v4904_v23  ;;  %v4662_v47 = vld [vmem:[%s6057_s3 + $0x18] sm:$0xff]  }
  0x37   : > { %853 = vst [vmem:[#allocation2 + $0x84] sm:$0xf] %v3418_v21  ;;  %854 = vst [vmem:[#allocation2 + $0x88] sm:$0xf] %v3419_v22  ;;  %v625_v48 = vsel %vm4946_vm2, 0, %v550_v38  ;;  %v478_v5 = vshll.u32 %v445_v45, 16  ;;  %v346_v9 = vmul.f32 %v3719_v61, %v4904_v23  ;;  %v3766_v12 = vunpack.c.l.bf16 %v5007_v51 }
  0x38   : > { %v4994_v41 = vsel %vm1278_vm3, %v1306_v31, %v1307_v20  ;;  %v4650_v42 = vld [vmem:[#allocation2 + $0x14] ss:$0 sps:$4 sm:$0x11]   ;;  %v3421_v54 = vcombine.low %v625_v48, %v625_v48  ;;  %v3422_v55 = vcombine.high %v625_v48, %v625_v48  ;;  %858 = vst [vmem:[#allocation2 + $0x98] sm:$0x1] %v3423_v49  ;;  %v384_v11 = vadd.f32 %v4916_v28, %v345_v62  ;;  %v4667_v61 = vld [vmem:[%s6057_s3 + $0x60] sm:$0xff]  }
  0x39   : > { %4322 = vmatprep.mubr.bf16.mxu1 %v4994_v41  ;;  %v1090_v53 = vshll.u32 %v4650_v42, 16  ;;  %v477_v17 = vrot.slane %v475_v60, 7  ;;  %v437_v18 = vmax.f32 %v4986_v29, 0.0  ;;  %v438_v20 = vmax.f32 %v406_v46, 0.0  ;;  %v4658_v22 = vld [vmem:[%s6057_s3 + $0x10] sm:$0xff]   ;;  %v4661_v29 = vld [vmem:[%s6057_s3 + $0x58] sm:$0xff]  }
  0x3a   : > { %v5009_v52 = vld [vmem:[#allocation2 + $0xc] sm:$0xff]   ;;  %4323 = vmatmul.mubr.bf16.vlgmr.msra.gmra.mrb[0].mxu1 %v5013_v57  ;;  %856 = vst [vmem:[#allocation2 + $0x90] sm:$0xf] %v3421_v54  ;;  %857 = vst [vmem:[#allocation2 + $0x94] sm:$0xf] %v3422_v55  ;;  %v439_v24 = vmax.f32 %v407_v56, 0.0  ;;  %v385_v25 = vadd.f32 %v4916_v28, %v346_v9  ;;  %v3767_v42 = vunpack.c.h.bf16 %v5007_v51 }
  0x3b   : > { %v1083_v63 = vshrl.u32 %v5009_v52, 16  ;;  %v1085_v2 = vshll.u32 %v5009_v52, 16  ;;  %v1092_v4 = vrot.slane %v1090_v53, 1  ;;  %4019 = vmatpush3.bf16.msra.mxu1 %v4648_v37  ;;  %v416_v26 = vmax.f32 %v384_v11, 0.0  ;;  %v5042_v37 = vld [vmem:[%s4891_s18 + $0x78] sm:$0xff]  }
  0x3c   : > { %v4654_v59 = vld [vmem:[#allocation2 + $0x8c] ss:$0 sps:$4 sm:$0x11]   ;;  %4020 = vmatprep.subr.bf16.mxu1 %v4651_v43  ;;  %v480_v30 = vor.u32 %v478_v5, %v477_v17  ;;  %v631_v31 = vsel %vm4946_vm2, %v477_v17, 0  ;;  %v456_v32 = vpack.c.bf16 %v437_v18, %v436_v50  ;;  %v457_v35 = vpack.c.bf16 %v439_v24, %v438_v20  ;;  %v3854_v17 = vld [vmem:[%s4891_s18 + $0x18] sm:$0xff]  }
  0x3d   : > { %v1313_v8 = vrot.slane %v4654_v59, 1  ;;  %v1087_v14 = vrot.slane %v1085_v2, 1  ;;  %v3393_v34 = vcombine.low %v631_v31, %v631_v31  ;;  %v417_v36 = vmax.f32 %v385_v25, 0.0 }
  0x3e   : > { %v4653_v7 = vld [vmem:[#allocation2 + $0x84] sm:$0xff]   ;;  %v615_v40 = vsel %vm4946_vm2, 0, %v480_v30  ;;  %v369_v43 = vmul.f32 %v3766_v12, %v4904_v23  ;;  %v552_v48 = vshrl.u32 %v456_v32, 16  ;;  %v555_v51 = vshll.u32 %v456_v32, 16 }
  0x3f   : > { %v1312_v21 = vrot.slane %v4653_v7, 1  ;;  %v1088_v27 = vor.u32 %v1087_v14, %v1083_v63  ;;  %4021 = vmatpush3.bf16.msra.mxu1 %v4652_v58  ;;  %v5048_v39 = vld [vmem:[#allocation2 + $0x98] ss:$0 sps:$4 sm:$0x11]   ;;  %v3391_v45 = vcombine.low %v615_v40, %v615_v40  ;;  %v3392_v46 = vcombine.high %v615_v40, %v615_v40  ;;  %828 = vst [vmem:[#allocation2 + $0x20] sm:$0x1] %v3393_v34 }
  0x40   : > { %4022 = vmatprep.subr.bf16.mxu1 %v4657_v15  ;;  %v446_v49 = vpack.c.bf16 %v417_v36, %v416_v26  ;;  %v1316_v50 = vrot.slane %v5048_v39, 1  ;;  %v559_v53 = vshrl.u32 %v457_v35, 16  ;;  %v562_v54 = vshll.u32 %v457_v35, 16  ;;  %v4668_v7 = vld [vmem:[%s6057_s3 + $0x20] sm:$0xff]   ;;  %v4671_v14 = vld [vmem:[%s6057_s3 + $0x68] sm:$0xff]  }
  0x41   : > { %v5039_v33 = vsel %vm1278_vm3, %v1312_v21, %v1313_v8  ;;  %v5045_v38 = vsel %vm1069_vm4, %v1088_v27, %v1092_v4  ;;  %v5055_v44 = vld [vmem:[#allocation2 + $0x90] sm:$0xff]   ;;  %826 = vst [vmem:[#allocation2 + $0x18] sm:$0xf] %v3391_v45  ;;  %827 = vst [vmem:[#allocation2 + $0x1c] sm:$0xf] %v3392_v46  ;;  %v554_v56 = vrot.slane %v552_v48, 7  ;;  %v370_v62 = vmul.f32 %v3767_v42, %v4904_v23 }
  0x42   : > { %4326 = vmatprep.mubr.bf16.mxu1 %v5039_v33  ;;  %1642 = vmatprep.mubr.bf16.mxu0 %v5045_v38  ;;  %v1315_v55 = vrot.slane %v5055_v44, 1  ;;  %v482_v58 = vshrl.u32 %v446_v49, 16  ;;  %v485_v59 = vshll.u32 %v446_v49, 16  ;;  %v561_v60 = vrot.slane %v559_v53, 7  ;;  %v5102_v35 = vld [vmem:[#allocation2] sm:$0xff]   ;;  %v4677_v46 = vld [vmem:[%s6057_s3 + $0x70] sm:$0xff]  }
  0x43   : > { %1643 = vmatmul.mubr.bf16.vlgmr.msra.gmra.mrb[0].mxu0 %v5009_v52  ;;  %4023 = vmatpush3.bf16.msra.mxu1 %v4658_v22  ;;  %v3770_v63 = vunpack.c.l.bf16 %v5042_v37  ;;  %v557_v4 = vor.u32 %v555_v51, %v554_v56  ;;  %v642_v5 = vsel %vm4946_vm2, %v554_v56, 0  ;;  %v409_v15 = vadd.f32 %v4916_v28, %v370_v62  ;;  %v3855_v51 = vld [vmem:[%s4891_s18 + $0x20] sm:$0xff]  }
  0x44   : > { %4291 = vmatpush3.bf16.msra.mxu0 %v4800_v0  ;;  %4024 = vmatprep.subr.bf16.mxu1 %v4661_v29  ;;  %v408_v0 = vadd.f32 %v4916_v28, %v369_v43  ;;  %v5072_v2 = vsel %vm1278_vm3, %v1315_v55, %v1316_v50  ;;  %v484_v8 = vrot.slane %v482_v58, 7  ;;  %v3426_v9 = vcombine.low %v642_v5, %v642_v5  ;;  %v3856_v55 = vld [vmem:[%s4891_s18 + $0x28] sm:$0xff]  }
  0x45   : > { %4292 = vmatprep.subr.bf16.mxu0 %v4813_v3  ;;  %4327 = vmatmul.mubr.bf16.gmra.mrb[4].mxu1 %v5072_v2  ;;  %v564_v11 = vor.u32 %v562_v54, %v561_v60  ;;  %v643_v12 = vsel %vm4946_vm2, %v561_v60, 0  ;;  %v626_v18 = vsel %vm4946_vm2, 0, %v557_v4  ;;  %v3771_v45 = vunpack.c.h.bf16 %v5042_v37 }
  0x46   : > { %v3429_v20 = vcombine.low %v643_v12, %v643_v12  ;;  %v487_v21 = vor.u32 %v485_v59, %v484_v8  ;;  %v632_v22 = vsel %vm4946_vm2, %v484_v8, 0  ;;  %v5092_v24 = vld [vmem:[#allocation2 + $0x20] ss:$0 sps:$4 sm:$0x11]   ;;  %v3424_v25 = vcombine.low %v626_v18, %v626_v18  ;;  %861 = vst [vmem:[#allocation2 + $0xa4] sm:$0x1] %v3426_v9 }
  0x47   : > { %4025 = vmatpush3.bf16.msra.mxu1 %v4662_v47  ;;  %v3425_v26 = vcombine.high %v626_v18, %v626_v18  ;;  %v627_v27 = vsel %vm4946_vm2, 0, %v564_v11  ;;  %v3396_v30 = vcombine.low %v632_v22, %v632_v22  ;;  %v440_v34 = vmax.f32 %v408_v0, 0.0 }
  0x48   : > { %4293 = vmatpush3.bf16.msra.mxu0 %v4813_v3  ;;  %4026 = vmatprep.subr.bf16.mxu1 %v4667_v61  ;;  %v3427_v31 = vcombine.low %v627_v27, %v627_v27  ;;  %v3428_v29 = vcombine.high %v627_v27, %v627_v27  ;;  %864 = vst [vmem:[#allocation2 + $0xb0] sm:$0x1] %v3429_v20  ;;  %v616_v32 = vsel %vm4946_vm2, 0, %v487_v21  ;;  %v4672_v3 = vld [vmem:[%s6057_s3 + $0x28] sm:$0xff]   ;;  %v5104_v36 = vld [vmem:[#allocation2 + $0x18] sm:$0xff]   ;;  %v1102_v40 = vshll.u32 %v5092_v24, 16 }
  0x49   : > { %4294 = vmatprep.subr.bf16.mxu0 %v4825_v6  ;;  %859 = vst [vmem:[#allocation2 + $0x9c] sm:$0xf] %v3424_v25  ;;  %860 = vst [vmem:[#allocation2 + $0xa0] sm:$0xf] %v3425_v26  ;;  %v3394_v42 = vcombine.low %v616_v32, %v616_v32  ;;  %v3395_v43 = vcombine.high %v616_v32, %v616_v32  ;;  %v441_v47 = vmax.f32 %v409_v15, 0.0  ;;  %v3722_v49 = vunpack.c.l.bf16 %v3854_v17  ;;  %v4681_v61 = vld [vmem:[%s6057_s3 + $0x78] sm:$0xff]  }
  0x4a   : > { %831 = vst [vmem:[#allocation2 + $0x2c] sm:$0x1] %v3396_v30  ;;  %862 = vst [vmem:[#allocation2 + $0xa8] sm:$0xf] %v3427_v31  ;;  %v371_v48 = vmul.f32 %v3770_v63, %v4904_v23  ;;  %v3723_v50 = vunpack.c.h.bf16 %v3854_v17  ;;  %v1095_v53 = vshrl.u32 %v5104_v36, 16  ;;  %v1097_v37 = vshll.u32 %v5104_v36, 16 }
  0x4b   : > { %863 = vst [vmem:[#allocation2 + $0xac] sm:$0xf] %v3428_v29  ;;  %4027 = vmatpush3.bf16.msra.mxu1 %v4668_v7  ;;  %v1104_v54 = vrot.slane %v1102_v40, 1  ;;  %829 = vst [vmem:[#allocation2 + $0x24] sm:$0xf] %v3394_v42  ;;  %v5118_v56 = vpack.c.bf16 %v441_v47, %v440_v34  ;;  %v372_v58 = vmul.f32 %v3771_v45, %v4904_v23  ;;  %v1071_v62 = vshrl.u32 %v5102_v35, 16 }
  0x4c   : > { %4295 = vmatpush3.bf16.msra.mxu0 %v4825_v6  ;;  %830 = vst [vmem:[#allocation2 + $0x28] sm:$0xf] %v3395_v43  ;;  %4028 = vmatprep.subr.bf16.mxu1 %v4671_v14  ;;  %v4678_v6 = vld [vmem:[%s6057_s3 + $0x30] sm:$0xff]   ;;  %v1099_v59 = vrot.slane %v1097_v37, 1  ;;  %v347_v60 = vmul.f32 %v3722_v49, %v4904_v23  ;;  %v1073_v0 = vshll.u32 %v5102_v35, 16  ;;  %v410_v7 = vadd.f32 %v4916_v28, %v371_v48  ;;  %v4682_v31 = vld [vmem:[%s6057_s3 + $0x38] sm:$0xff]  }
  0x4d   : > { %4296 = vmatprep.subr.bf16.mxu0 %v4838_v10  ;;  %v5131_v63 = vld [vmem:[%s4891_s18 + $0x30] sm:$0xff]   ;;  %v5133_v4 = vld [vmem:[#allocation2 + $0xa4] ss:$0 sps:$4 sm:$0x11]   ;;  %v566_v5 = vshrl.u32 %v5118_v56, 16  ;;  %v348_v8 = vmul.f32 %v3723_v50, %v4904_v23  ;;  %v3726_v9 = vunpack.c.l.bf16 %v3855_v51  ;;  %v569_v14 = vshll.u32 %v5118_v56, 16 }
  0x4e   : > { %v1100_v11 = vor.u32 %v1099_v59, %v1095_v53  ;;  %v3727_v15 = vunpack.c.h.bf16 %v3855_v51  ;;  %v3730_v17 = vunpack.c.l.bf16 %v3856_v55  ;;  %v1319_v20 = vrot.slane %v5133_v4, 1  ;;  %v5181_v37 = vld [vmem:[%s6057_s3 + $0x80] sm:$0xff]  }
  0x4f   : > { %4029 = vmatpush3.bf16.msra.mxu1 %v4672_v3  ;;  %v5139_v12 = vld [vmem:[#allocation2 + $0xb0] ss:$0 sps:$4 sm:$0x11]   ;;  %v411_v21 = vadd.f32 %v4916_v28, %v372_v58  ;;  %v349_v22 = vmul.f32 %v3726_v9, %v4904_v23  ;;  %v3731_v25 = vunpack.c.h.bf16 %v3856_v55  ;;  %v386_v30 = vadd.f32 %v4916_v28, %v347_v60 }
  0x50   : > { %4297 = vmatpush3.bf16.msra.mxu0 %v4838_v10  ;;  %4030 = vmatprep.subr.bf16.mxu1 %v4677_v46  ;;  %v5143_v18 = vld [vmem:[#allocation2 + $0x9c] sm:$0xff]   ;;  %v5149_v10 = vsel %vm1069_vm4, %v1100_v11, %v1104_v54  ;;  %v1322_v27 = vrot.slane %v5139_v12, 1  ;;  %v350_v29 = vmul.f32 %v3727_v15, %v4904_v23  ;;  %v387_v34 = vadd.f32 %v4916_v28, %v348_v8  ;;  %v5195_v15 = vld [vmem:[#allocation2 + $0x8] ss:$0 sps:$4 sm:$0x11]  }
  0x51   : > { %4298 = vmatprep.subr.bf16.mxu0 %v4853_v13  ;;  %1650 = vmatprep.mubr.bf16.mxu0 %v5149_v10  ;;  %v1318_v32 = vrot.slane %v5143_v18, 1  ;;  %v351_v40 = vmul.f32 %v3730_v17, %v4904_v23  ;;  %v3734_v42 = vunpack.c.l.bf16 %v5131_v63  ;;  %v5168_v45 = vld [vmem:[#allocation2 + $0x2c] ss:$0 sps:$4 sm:$0x11]   ;;  %v388_v46 = vadd.f32 %v4916_v28, %v349_v22 }
  0x52   : > { %v5151_v26 = vld [vmem:[#allocation2 + $0xa8] sm:$0xff]   ;;  %1651 = vmatmul.mubr.bf16.gmra.mrb[4].mxu0 %v5104_v36  ;;  %v389_v47 = vadd.f32 %v4916_v28, %v350_v29  ;;  %v352_v48 = vmul.f32 %v3731_v25, %v4904_v23  ;;  %v568_v53 = vrot.slane %v566_v5, 7  ;;  %v1114_v55 = vshll.u32 %v5168_v45, 16 }
  0x53   : > { %v5161_v3 = vld [vmem:[#allocation2 + $0x24] sm:$0xff]   ;;  %4031 = vmatpush3.bf16.msra.mxu1 %v4678_v6  ;;  %v1321_v43 = vrot.slane %v5151_v26, 1  ;;  %v5174_v49 = vsel %vm1278_vm3, %v1318_v32, %v1319_v20  ;;  %v442_v56 = vmax.f32 %v410_v7, 0.0  ;;  %v443_v58 = vmax.f32 %v411_v21, 0.0 }
  0x54   : > { %4032 = vmatprep.subr.bf16.mxu1 %v4681_v61  ;;  %v1107_v50 = vshrl.u32 %v5161_v3, 16  ;;  %v1109_v51 = vshll.u32 %v5161_v3, 16  ;;  %4299 = vmatpush3.bf16.msra.mxu0 %v4853_v13  ;;  %v571_v59 = vor.u32 %v569_v14, %v568_v53  ;;  %v644_v60 = vsel %vm4946_vm2, %v568_v53, 0  ;;  %v4728_v53 = vld [vmem:[%s6055_s1] ss:$0 sm:$0xff] }
  0x55   : > { %4330 = vmatprep.mubr.bf16.mxu1 %v5174_v49  ;;  %v5186_v54 = vsel %vm1278_vm3, %v1321_v43, %v1322_v27  ;;  %4300 = vmatprep.subr.bf16.mxu0 %v4870_v16  ;;  %v418_v61 = vmax.f32 %v386_v30, 0.0  ;;  %v1116_v13 = vrot.slane %v1114_v55, 1  ;;  %v3432_v5 = vcombine.low %v644_v60, %v644_v60 }
  0x56   : > { %4331 = vmatmul.mubr.bf16.gmra.mrb[8].mxu1 %v5186_v54  ;;  %v1111_v6 = vrot.slane %v1109_v51, 1  ;;  %v459_v8 = vpack.c.bf16 %v443_v58, %v442_v56  ;;  %v419_v9 = vmax.f32 %v387_v34, 0.0  ;;  %v628_v7 = vsel %vm4946_vm2, 0, %v571_v59  ;;  %v4729_v58 = vld [vmem:[%s6057_s3 + $0x178] sm:$0xff]  }
  0x57   : > { %4033 = vmatpush3.bf16.msra.mxu1 %v4682_v31  ;;  %v390_v17 = vadd.f32 %v4916_v28, %v351_v40  ;;  %v3735_v14 = vunpack.c.h.bf16 %v5131_v63  ;;  %v3430_v20 = vcombine.low %v628_v7, %v628_v7  ;;  %v3431_v21 = vcombine.high %v628_v7, %v628_v7  ;;  %867 = vst [vmem:[#allocation2 + $0xbc] sm:$0x1] %v3432_v5  ;;  %v3858_v5 = vld [vmem:[%s4891_s18 + $0x38] sm:$0xff]  }
  0x58   : > { %v1112_v11 = vor.u32 %v1111_v6, %v1107_v50  ;;  %4338 = vmatprep.subr.bf16.mxu1 %v5181_v37  ;;  %4301 = vmatpush3.bf16.msra.mxu0 %v4870_v16  ;;  %v573_v22 = vshrl.u32 %v459_v8, 16  ;;  %v576_v25 = vshll.u32 %v459_v8, 16  ;;  %v447_v30 = vpack.c.bf16 %v419_v9, %v418_v61  ;;  %v4700_v6 = vld [vmem:[%s6057_s3 + $0x1c0] sm:$0xff]  }
  0x59   : > { %4302 = vmatprep.subr.bf16.mxu0 %v4884_v19  ;;  %v5207_v31 = vrot.slane %v1073_v0, 1  ;;  %v353_v29 = vmul.f32 %v3734_v42, %v4904_v23  ;;  %865 = vst [vmem:[#allocation2 + $0xb4] sm:$0xf] %v3430_v20  ;;  %866 = vst [vmem:[#allocation2 + $0xb8] sm:$0xf] %v3431_v21  ;;  %v420_v63 = vmax.f32 %v388_v46, 0.0  ;;  %v391_v34 = vadd.f32 %v4916_v28, %v352_v48 }
  0x5a   : > { %v5203_v27 = vsel %vm1069_vm4, %v1112_v11, %v1116_v13  ;;  %v575_v16 = vrot.slane %v573_v22, 7  ;;  %v421_v32 = vmax.f32 %v389_v47, 0.0  ;;  %v489_v19 = vshrl.u32 %v447_v30, 16  ;;  %v4727_v46 = vld [vmem:[%s6057_s3 + $0x170] sm:$0xff]  }
  0x5b   : > { %1658 = vmatprep.mubr.bf16.mxu0 %v5203_v27  ;;  %v492_v40 = vshll.u32 %v447_v30, 16  ;;  %v1078_v43 = vshll.u32 %v5195_v15, 16  ;;  %v422_v50 = vmax.f32 %v390_v17, 0.0  ;;  %v423_v51 = vmax.f32 %v391_v34, 0.0  ;;  %v4730_v30 = vld [vmem:[%s6056_s2] ss:$0 sm:$0xff] }
  0x5c   : > { %1659 = vmatmul.mubr.bf16.gmra.mrb[8].mxu0 %v5161_v3  ;;  %v578_v0 = vor.u32 %v576_v25, %v575_v16  ;;  %v645_v23 = vsel %vm4946_vm2, %v575_v16, 0  ;;  %v448_v42 = vpack.c.bf16 %v421_v32, %v420_v63  ;;  %v491_v48 = vrot.slane %v489_v19, 7 }
  0x5d   : > { %4303 = vmatpush3.bf16.msra.mxu0 %v4727_v46  ;;  %v3435_v47 = vcombine.low %v645_v23, %v645_v23  ;;  %v354_v55 = vmul.f32 %v4728_v53, %v3735_v14  ;;  %v5223_v56 = vadd.f32 %v4916_v28, %v353_v29  ;;  %v449_v13 = vpack.c.bf16 %v423_v51, %v422_v50 }
  0x5e   : > { %4304 = vmatprep.subr.bf16.mxu0 %v4729_v58  ;;  %v629_v59 = vsel %vm4946_vm2, 0, %v578_v0  ;;  %v496_v60 = vshrl.u32 %v448_v42, 16  ;;  %v499_v61 = vshll.u32 %v448_v42, 16  ;;  %v5234_v8 = vld [vmem:[#allocation2 + $0xbc] ss:$0 sps:$4 sm:$0x11]   ;;  %v494_v11 = vor.u32 %v492_v40, %v491_v48 }
  0x5f   : > { %v3433_v28 = vcombine.low %v629_v59, %v629_v59  ;;  %v3434_v9 = vcombine.high %v629_v59, %v629_v59  ;;  %870 = vst [vmem:[#allocation2 + $0xc8] sm:$0x1] %v3435_v47  ;;  %v633_v7 = vsel %vm4946_vm2, %v491_v48, 0  ;;  %v503_v20 = vshrl.u32 %v449_v13, 16 }
  0x60   : > { %v3399_v17 = vcombine.low %v633_v7, %v633_v7  ;;  %v498_v14 = vrot.slane %v496_v60, 7  ;;  %v506_v21 = vshll.u32 %v449_v13, 16  ;;  %v5238_v22 = vld [vmem:[#allocation2 + $0xb4] sm:$0xff]   ;;  %v1325_v25 = vrot.slane %v5234_v8, 1 }
  0x61   : > { %4305 = vmatpush3.bf16.msra.mxu0 %v4729_v58  ;;  %868 = vst [vmem:[#allocation2 + $0xc0] sm:$0xf] %v3433_v28  ;;  %869 = vst [vmem:[#allocation2 + $0xc4] sm:$0xf] %v3434_v9  ;;  %v393_v29 = vadd.f32 %v4730_v30, %v354_v55  ;;  %v3738_v16 = vunpack.c.l.bf16 %v3858_v5  ;;  %v3739_v63 = vunpack.c.h.bf16 %v3858_v5  ;;  %v617_v32 = vsel %vm4946_vm2, 0, %v494_v11 }
  0x62   : > { %4154 = vmatprep.subr.bf16.mxu0 %v4700_v6  ;;  %834 = vst [vmem:[#allocation2 + $0x38] sm:$0x1] %v3399_v17  ;;  %v501_v34 = vor.u32 %v499_v61, %v498_v14  ;;  %v634_v19 = vsel %vm4946_vm2, %v498_v14, 0  ;;  %v505_v40 = vrot.slane %v503_v20, 7  ;;  %v1324_v50 = vrot.slane %v5238_v22, 1 }
  0x63   : > { %v3397_v0 = vcombine.low %v617_v32, %v617_v32  ;;  %v3398_v23 = vcombine.high %v617_v32, %v617_v32  ;;  %v3402_v42 = vcombine.low %v634_v19, %v634_v19  ;;  %v424_v48 = vmax.f32 %v5223_v56, 0.0 }
  0x64   : > { %v618_v51 = vsel %vm4946_vm2, 0, %v501_v34  ;;  %v508_v46 = vor.u32 %v506_v21, %v505_v40  ;;  %v635_v47 = vsel %vm4946_vm2, %v505_v40, 0  ;;  %v5255_v55 = vsel %vm1278_vm3, %v1324_v50, %v1325_v25 }
  0x65   : > { %832 = vst [vmem:[#allocation2 + $0x30] sm:$0xf] %v3397_v0  ;;  %833 = vst [vmem:[#allocation2 + $0x34] sm:$0xf] %v3398_v23  ;;  %v3400_v58 = vcombine.low %v618_v51, %v618_v51  ;;  %v3401_v6 = vcombine.high %v618_v51, %v618_v51  ;;  %v3405_v59 = vcombine.low %v635_v47, %v635_v47  ;;  %4334 = vmatprep.mubr.bf16.mxu1 %v5255_v55 }
  0x66   : > { %837 = vst [vmem:[#allocation2 + $0x44] sm:$0x1] %v3402_v42  ;;  %v5258_v60 = vld [vmem:[#allocation2 + $0xc8] ss:$0 sps:$4 sm:$0x11]   ;;  %v1076_v61 = vor.u32 %v5207_v31, %v1071_v62  ;;  %v619_v56 = vsel %vm4946_vm2, 0, %v508_v46  ;;  %v355_v13 = vmul.f32 %v4728_v53, %v3738_v16  ;;  %v356_v5 = vmul.f32 %v4728_v53, %v3739_v63 }
  0x67   : > { %v1080_v28 = vrot.slane %v1078_v43, 1  ;;  %835 = vst [vmem:[#allocation2 + $0x3c] sm:$0xf] %v3400_v58  ;;  %836 = vst [vmem:[#allocation2 + $0x40] sm:$0xf] %v3401_v6  ;;  %v3403_v9 = vcombine.low %v619_v56, %v619_v56  ;;  %v3404_v11 = vcombine.high %v619_v56, %v619_v56  ;;  %v425_v7 = vmax.f32 %v393_v29, 0.0 }
  0x68   : > { %840 = vst [vmem:[#allocation2 + $0x50] sm:$0x1] %v3405_v59  ;;  %v5267_v17 = vld [vmem:[#allocation2 + $0xc0] sm:$0xff]   ;;  %v1414_v14 = vrot.slane %v5258_v60, 1  ;;  %v394_v20 = vadd.f32 %v4730_v30, %v355_v13  ;;  %v395_v62 = vadd.f32 %v4730_v30, %v356_v5 }
  0x69   : > { %v5270_v31 = vld [vmem:[#allocation2 + $0x38] ss:$0 sps:$4 sm:$0x11]   ;;  %838 = vst [vmem:[#allocation2 + $0x48] sm:$0xf] %v3403_v9  ;;  %v450_v53 = vpack.c.bf16 %v425_v7, %v424_v48  ;;  %v1413_v21 = vrot.slane %v5267_v17, 1  ;;  %v1081_v63 = vsel %vm1069_vm4, %v1076_v61, %v1080_v28 }
  0x6a   : > { %839 = vst [vmem:[#allocation2 + $0x4c] sm:$0xf] %v3404_v11  ;;  %v426_v43 = vmax.f32 %v394_v20, 0.0  ;;  %v427_v25 = vmax.f32 %v395_v62, 0.0  ;;  %v1126_v16 = vshll.u32 %v5270_v31, 16 }
  0x6b   : > { %v510_v29 = vshrl.u32 %v450_v53, 16  ;;  %v5276_v32 = vsel %vm1278_vm3, %v1413_v21, %v1414_v14  ;;  %v513_v30 = vshll.u32 %v450_v53, 16  ;;  %v4692_v53 = vld [vmem:[%s6057_s3 + $0x88] sm:$0xff]  }
  0x6c   : > { %v5278_v34 = vld [vmem:[#allocation2 + $0x30] sm:$0xff]   ;;  %v451_v19 = vpack.c.bf16 %v427_v25, %v426_v43  ;;  %4335 = vmatmul.mubr.bf16.gmra.mrb[12].mxu1 %v5276_v32  ;;  %v1128_v40 = vrot.slane %v1126_v16, 1 }
  0x6d   : > { %v5281_v50 = vld [vmem:[#allocation2 + $0x44] ss:$0 sps:$4 sm:$0x11]   ;;  %v1119_v0 = vshrl.u32 %v5278_v34, 16  ;;  %v1121_v23 = vshll.u32 %v5278_v34, 16  ;;  %2108 = vmatprep.mubr.bf16.mxu1 %v1081_v63  ;;  %v512_v46 = vrot.slane %v510_v29, 7 }
  0x6e   : > { %v5285_v42 = vld [vmem:[#allocation2 + $0x3c] sm:$0xff]   ;;  %v1138_v51 = vshll.u32 %v5281_v50, 16  ;;  %v517_v47 = vshrl.u32 %v451_v19, 16 }
  0x6f   : > { %v1123_v48 = vrot.slane %v1121_v23, 1  ;;  %v1131_v6 = vshrl.u32 %v5285_v42, 16  ;;  %v1133_v59 = vshll.u32 %v5285_v42, 16  ;;  %v5292_v56 = vld [vmem:[#allocation2 + $0x50] ss:$0 sps:$4 sm:$0x11]   ;;  %v515_v13 = vor.u32 %v513_v30, %v512_v46 }
  0x70   : > { %v1140_v61 = vrot.slane %v1138_v51, 1  ;;  %v636_v11 = vsel %vm4946_vm2, %v512_v46, 0  ;;  %v1150_v14 = vshll.u32 %v5292_v56, 16  ;;  %v519_v29 = vrot.slane %v517_v47, 7 }
  0x71   : > { %v5288_v58 = vld [vmem:[#allocation2 + $0x48] sm:$0xff]   ;;  %v1124_v5 = vor.u32 %v1123_v48, %v1119_v0  ;;  %v1135_v7 = vrot.slane %v1133_v59, 1  ;;  %v620_v20 = vsel %vm4946_vm2, 0, %v515_v13  ;;  %v3408_v62 = vcombine.low %v636_v11, %v636_v11  ;;  %v4696_v59 = vld [vmem:[%s6057_s3 + $0x98] sm:$0xff]  }
  0x72   : > { %v1143_v28 = vshrl.u32 %v5288_v58, 16  ;;  %v1145_v9 = vshll.u32 %v5288_v58, 16  ;;  %v3406_v25 = vcombine.low %v620_v20, %v620_v20  ;;  %v3407_v16 = vcombine.high %v620_v20, %v620_v20 }
  0x73   : > { %v5305_v21 = vsel %vm1069_vm4, %v1124_v5, %v1128_v40  ;;  %v1136_v63 = vor.u32 %v1135_v7, %v1131_v6  ;;  %843 = vst [vmem:[#allocation2 + $0x5c] sm:$0x1] %v3408_v62  ;;  %v520_v30 = vshll.u32 %v451_v19, 16  ;;  %v4695_v19 = vld [vmem:[%s6057_s3 + $0x90] sm:$0xff]   ;;  %v4698_v62 = vld [vmem:[%s6057_s3 + $0xa8] sm:$0xff]  }
  0x74   : > { %v1147_v43 = vrot.slane %v1145_v9, 1  ;;  %1666 = vmatprep.mubr.bf16.mxu0 %v5305_v21  ;;  %2109 = vmatmul.mubr.bf16.vlgmr.msra.gmra.mrb[16].mxu1 %v5102_v35  ;;  %841 = vst [vmem:[#allocation2 + $0x54] sm:$0xf] %v3406_v25  ;;  %842 = vst [vmem:[#allocation2 + $0x58] sm:$0xf] %v3407_v16  ;;  %v637_v35 = vsel %vm4946_vm2, %v519_v29, 0 }
  0x75   : > { %1667 = vmatmul.mubr.bf16.gmra.mrb[12].mxu0 %v5278_v34  ;;  %4339 = vmatpush3.bf16.msra.mxu1 %v5181_v37  ;;  %v5312_v40 = vsel %vm1069_vm4, %v1136_v63, %v1140_v61  ;;  %v522_v0 = vor.u32 %v520_v30, %v519_v29  ;;  %v1152_v37 = vrot.slane %v1150_v14, 1  ;;  %v3411_v51 = vcombine.low %v637_v35, %v637_v35  ;;  %v4699_v63 = vld [vmem:[%s6057_s3 + $0xb0] sm:$0xff]  }
  0x76   : > { %2116 = vmatprep.mubr.bf16.mxu1 %v5045_v38  ;;  %4340 = vmatprep.subr.bf16.mxu1 %v4692_v53  ;;  %v1148_v23 = vor.u32 %v1147_v43, %v1143_v28  ;;  %v5363_v30 = vld [vmem:[#allocation2 + $0x6c] sm:$0xff]  }
  0x77   : > { %1674 = vmatprep.mubr.bf16.mxu0 %v5312_v40  ;;  %v621_v46 = vsel %vm4946_vm2, 0, %v522_v0  ;;  %846 = vst [vmem:[#allocation2 + $0x68] sm:$0x1] %v3411_v51  ;;  %v1181_v0 = vshll.u32 %v5363_v30, 16 }
  0x78   : > { %v3409_v47 = vcombine.low %v621_v46, %v621_v46  ;;  %v3410_v38 = vcombine.high %v621_v46, %v621_v46  ;;  %v5324_v48 = vsel %vm1069_vm4, %v1148_v23, %v1152_v37  ;;  %v1179_v23 = vshrl.u32 %v5363_v30, 16  ;;  %v4732_v51 = vld [vmem:[#allocation2 + $0x74] ss:$0 sps:$4 sm:$0x11]  }
  0x79   : > { %4341 = vmatpush3.bf16.msra.mxu1 %v4692_v53  ;;  %v1183_v37 = vrot.slane %v1181_v0, 1  ;;  %v1186_v46 = vshll.u32 %v4732_v51, 16 }
  0x7a   : > { %4342 = vmatprep.subr.bf16.mxu1 %v4695_v19  ;;  %v5326_v6 = vld [vmem:[#allocation2 + $0x5c] ss:$0 sps:$4 sm:$0x11]   ;;  %844 = vst [vmem:[#allocation2 + $0x60] sm:$0xf] %v3409_v47 }
  0x7b   : > { %845 = vst [vmem:[#allocation2 + $0x64] sm:$0xf] %v3410_v38  ;;  %v5332_v1 = vld [vmem:[#allocation2 + $0x54] sm:$0xff]   ;;  %v1162_v61 = vshll.u32 %v5326_v6, 16  ;;  %v1184_v38 = vor.u32 %v1183_v37, %v1179_v23 }
  0x7c   : > { %2117 = vmatmul.mubr.bf16.gmra.mrb[20].mxu1 %v5009_v52  ;;  %v1155_v13 = vshrl.u32 %v5332_v1, 16  ;;  %v1157_v5 = vshll.u32 %v5332_v1, 16  ;;  %v4697_v52 = vld [vmem:[%s6057_s3 + $0xa0] sm:$0xff]   ;;  %v4708_v47 = vld [vmem:[%s6057_s3 + $0xb8] sm:$0xff]  }
  0x7d   : > { %1675 = vmatmul.mubr.bf16.gmra.mrb[16].mxu0 %v5285_v42  ;;  %2124 = vmatprep.mubr.bf16.mxu1 %v5149_v10  ;;  %v1164_v28 = vrot.slane %v1162_v61, 1  ;;  %v5377_v61 = vld [vmem:[#allocation2 + $0x78] sm:$0xff]  }
  0x7e   : > { %1682 = vmatprep.mubr.bf16.mxu0 %v5324_v48  ;;  %4343 = vmatpush3.bf16.msra.mxu1 %v4695_v19  ;;  %v1159_v9 = vrot.slane %v1157_v5, 1  ;;  %v5343_v11 = vld [vmem:[#allocation2 + $0x68] ss:$0 sps:$4 sm:$0x11]   ;;  %v5383_v5 = vld [vmem:[%s6057_s3 + $0x200] sm:$0xff]  }
  0x7f   : > { %4344 = vmatprep.subr.bf16.mxu1 %v4696_v59  ;;  %v1174_v20 = vshll.u32 %v5343_v11, 16 }
  0x80   : > { %v1160_v7 = vor.u32 %v1159_v9, %v1155_v13  ;;  %v1193_v13 = vshll.u32 %v5377_v61, 16 }
  0x81   : > { %v1176_v29 = vrot.slane %v1174_v20, 1 }
  0x82   : > { %v5345_v14 = vld [vmem:[#allocation2 + $0x60] sm:$0xff]   ;;  %4345 = vmatpush3.bf16.msra.mxu1 %v4696_v59  ;;  %v5353_v53 = vsel %vm1069_vm4, %v1160_v7, %v1164_v28  ;;  %v1188_v59 = vrot.slane %v1186_v46, 1  ;;  %v1195_v9 = vrot.slane %v1193_v13, 1  ;;  %v1217_v46 = vshll.u32 %v5055_v44, 16 }
  0x83   : > { %4346 = vmatprep.subr.bf16.mxu1 %v4697_v52  ;;  %v1167_v43 = vshrl.u32 %v5345_v14, 16  ;;  %v1169_v25 = vshll.u32 %v5345_v14, 16  ;;  %v4734_v7 = vld [vmem:[#allocation2 + $0x80] ss:$0 sps:$4 sm:$0x11]   ;;  %v1222_v13 = vshll.u32 %v5048_v39, 16 }
  0x84   : > { %2125 = vmatmul.mubr.bf16.gmra.mrb[24].mxu1 %v5104_v36  ;;  %v5386_v28 = vsel %vm1069_vm4, %v1184_v38, %v1188_v59  ;;  %v1198_v20 = vshll.u32 %v4734_v7, 16  ;;  %v1215_v38 = vshrl.u32 %v5055_v44, 16  ;;  %v1219_v59 = vrot.slane %v1217_v46, 1 }
  0x85   : > { %1683 = vmatmul.mubr.bf16.gmra.mrb[20].mxu0 %v5288_v58  ;;  %2132 = vmatprep.mubr.bf16.mxu1 %v5203_v27  ;;  %v1171_v16 = vrot.slane %v1169_v25, 1  ;;  %v5394_v25 = vld [vmem:[#allocation2 + $0x84] sm:$0xff]   ;;  %v1229_v7 = vshll.u32 %v5143_v18, 16  ;;  %v1227_v44 = vshrl.u32 %v5143_v18, 16  ;;  %v1234_v39 = vshll.u32 %v5133_v4, 16 }
  0x86   : > { %1690 = vmatprep.mubr.bf16.mxu0 %v5353_v53  ;;  %4347 = vmatpush3.bf16.msra.mxu1 %v4697_v52  ;;  %v1191_v52 = vshrl.u32 %v5377_v61, 16  ;;  %v1246_v4 = vshll.u32 %v5139_v12, 16 }
  0x87   : > { %4348 = vmatprep.subr.bf16.mxu1 %v4698_v62  ;;  %v1172_v35 = vor.u32 %v1171_v16, %v1167_v43  ;;  %v1200_v43 = vrot.slane %v1198_v20, 1  ;;  %v1205_v16 = vshll.u32 %v5394_v25, 16 }
  0x88   : > { %v1248_v46 = vrot.slane %v1246_v4, 1  ;;  %v4739_v4 = vld [vmem:[#allocation2 + $0x14] ss:$0 sps:$4 sm:$0x11]  }
  0x89   : > { %v5367_v19 = vsel %vm1069_vm4, %v1172_v35, %v1176_v29  ;;  %v1203_v29 = vshrl.u32 %v5394_v25, 16  ;;  %v1207_v0 = vrot.slane %v1205_v16, 1  ;;  %v4736_v35 = vld [vmem:[#allocation2 + $0x8c] ss:$0 sps:$4 sm:$0x11]   ;;  %v1236_v16 = vrot.slane %v1234_v39, 1 }
  0x8a   : > { %4349 = vmatpush3.bf16.msra.mxu1 %v4698_v62  ;;  %v1196_v62 = vor.u32 %v1195_v9, %v1191_v52  ;;  %v1210_v23 = vshll.u32 %v4736_v35, 16  ;;  %v1220_v52 = vor.u32 %v1219_v59, %v1215_v38  ;;  %v1224_v9 = vrot.slane %v1222_v13, 1 }
  0x8b   : > { %4350 = vmatprep.subr.bf16.mxu1 %v4699_v63  ;;  %v1208_v37 = vor.u32 %v1207_v0, %v1203_v29  ;;  %v1241_v29 = vshll.u32 %v5151_v26, 16  ;;  %v1239_v35 = vshrl.u32 %v5151_v26, 16  ;;  %v1253_v38 = vshll.u32 %v5238_v22, 16 }
  0x8c   : > { %2133 = vmatmul.mubr.bf16.gmra.mrb[28].mxu1 %v5161_v3  ;;  %v1212_v51 = vrot.slane %v1210_v23, 1  ;;  %v5417_v20 = vsel %vm1069_vm4, %v1220_v52, %v1224_v9  ;;  %v1251_v13 = vshrl.u32 %v5238_v22, 16  ;;  %v1258_v52 = vshll.u32 %v5234_v8, 16 }
  0x8d   : > { %1691 = vmatmul.mubr.bf16.gmra.mrb[24].mxu0 %v5332_v1  ;;  %2140 = vmatprep.mubr.bf16.mxu1 %v5305_v21  ;;  %v1243_v23 = vrot.slane %v1241_v29, 1  ;;  %v1255_v12 = vrot.slane %v1253_v38, 1  ;;  %v1401_v39 = vshrl.u32 %v5267_v17, 16  ;;  %v1408_v8 = vshll.u32 %v5258_v60, 16  ;;  %v4738_v60 = vld [vmem:[#allocation2 + $0xc] sm:$0xff]  }
  0x8e   : > { %1698 = vmatprep.mubr.bf16.mxu0 %v5367_v19  ;;  %4351 = vmatpush3.bf16.msra.mxu1 %v4699_v63  ;;  %v5398_v63 = vsel %vm1069_vm4, %v1196_v62, %v1200_v43  ;;  %v1231_v62 = vrot.slane %v1229_v7, 1  ;;  %v1260_v7 = vrot.slane %v1258_v52, 1  ;;  %v1285_v38 = vrot.slane %v5104_v36, 1 }
  0x8f   : > { %4352 = vmatprep.subr.bf16.mxu1 %v4708_v47  ;;  %v1256_v9 = vor.u32 %v1255_v12, %v1251_v13  ;;  %v1410_v29 = vrot.slane %v1408_v8, 1  ;;  %v1286_v13 = vrot.slane %v5092_v24, 1  ;;  %v1288_v12 = vrot.slane %v5161_v3, 1  ;;  %v4703_v24 = vld [vmem:[%s6057_s3 + $0x188] sm:$0xff]  }
  0x90   : > { %v1232_v43 = vor.u32 %v1231_v62, %v1227_v44  ;;  %v1403_v44 = vshll.u32 %v5267_v17, 16  ;;  %v1289_v52 = vrot.slane %v5168_v45, 1  ;;  %v1291_v36 = vrot.slane %v5278_v34, 1 }
  0x91   : > { %v5449_v62 = vsel %vm1069_vm4, %v1256_v9, %v1260_v7  ;;  %v5476_v9 = vsel %vm1278_vm3, %v1285_v38, %v1286_v13  ;;  %v4701_v7 = vld [vmem:[%s6057_s3 + $0x180] sm:$0xff]   ;;  %v1292_v45 = vrot.slane %v5270_v31, 1  ;;  %v1295_v8 = vrot.slane %v5281_v50, 1  ;;  %v4706_v31 = vld [vmem:[%s6057_s3 + $0x1d8] sm:$0xff]  }
  0x92   : > { %4353 = vmatpush3.bf16.msra.mxu1 %v4708_v47  ;;  %v5407_v47 = vsel %vm1069_vm4, %v1208_v37, %v1212_v51  ;;  %v5427_v0 = vsel %vm1069_vm4, %v1232_v43, %v1236_v16  ;;  %v5432_v37 = vld [vmem:[#allocation2 + $0x90] sm:$0xff]   ;;  %v1244_v51 = vor.u32 %v1243_v23, %v1239_v35  ;;  %v1405_v43 = vrot.slane %v1403_v44, 1  ;;  %v4702_v44 = vld [vmem:[%s6057_s3 + $0x1c8] sm:$0xff]   ;;  %v4707_v50 = vld [vmem:[%s6057_s3 + $0x198] sm:$0xff]  }
  0x93   : > { %4386 = vmatprep.subr.bf16.mxu1 %v5383_v5  ;;  %v1282_v23 = vrot.slane %v4738_v60, 1  ;;  %v1280_v13 = vrot.slane %v5195_v15, 1  ;;  %v4711_v15 = vld [vmem:[%s6057_s3 + $0x1e8] sm:$0xff]  }
  0x94   : > { %2141 = vmatmul.mubr.bf16.gmra.mrb[32].mxu1 %v5278_v34  ;;  %v5439_v59 = vsel %vm1069_vm4, %v1244_v51, %v1248_v46  ;;  %v1406_v16 = vor.u32 %v1405_v43, %v1401_v39  ;;  %v1283_v51 = vrot.slane %v4739_v4, 1  ;;  %v5485_v39 = vsel %vm1278_vm3, %v1288_v12, %v1289_v52 }
  0x95   : > { %1699 = vmatmul.mubr.bf16.gmra.mrb[28].mxu0 %v5345_v14  ;;  %2148 = vmatprep.mubr.bf16.mxu1 %v5312_v40  ;;  %v1294_v43 = vrot.slane %v5285_v42, 1  ;;  %v1298_v4 = vrot.slane %v5292_v56, 1  ;;  %v1300_v12 = vrot.slane %v5332_v1, 1  ;;  %v1301_v52 = vrot.slane %v5326_v6, 1  ;;  %v4710_v56 = vld [vmem:[%s6057_s3 + $0x1a0] sm:$0xff]   ;;  %v4712_v6 = vld [vmem:[%s6057_s3 + $0x1a8] sm:$0xff]  }
  0x96   : > { %1706 = vmatprep.mubr.bf16.mxu0 %v5386_v28  ;;  %v5458_v35 = vsel %vm1069_vm4, %v1406_v16, %v1410_v29  ;;  %v5465_v46 = vsel %vm1278_vm3, %v1282_v23, %v1283_v51  ;;  %v5502_v16 = vsel %vm1278_vm3, %v1291_v36, %v1292_v45  ;;  %v4705_v29 = vld [vmem:[%s6057_s3 + $0x190] sm:$0xff]   ;;  %v1297_v23 = vrot.slane %v5288_v58, 1  ;;  %v4740_v51 = vld [vmem:[#allocation2] sm:$0xff]  }
  0x97   : > { %v5511_v60 = vsel %vm1278_vm3, %v1294_v43, %v1295_v8  ;;  %v1279_v38 = vrot.slane %v4740_v51, 1  ;;  %v1303_v36 = vrot.slane %v5345_v14, 1  ;;  %v1304_v45 = vrot.slane %v5343_v11, 1  ;;  %v4714_v43 = vld [vmem:[%s6057_s3 + $0x1b0] sm:$0xff]   ;;  %v4715_v8 = vld [vmem:[%s6057_s3 + $0x1f8] sm:$0xff]   ;;  %v4718_v11 = vld [vmem:[%s6057_s3 + $0x208] sm:$0xff]  }
  0x9c   : > { %2149 = vmatmul.mubr.bf16.gmra.mrb[36].mxu1 %v5285_v42 }
  0x9d   : > { %1707 = vmatmul.mubr.bf16.gmra.mrb[32].mxu0 %v5363_v30  ;;  %2156 = vmatprep.mubr.bf16.mxu1 %v5324_v48 }
  0x9e   : > { %1714 = vmatprep.mubr.bf16.mxu0 %v5398_v63 }
  0xa4   : > { %2157 = vmatmul.mubr.bf16.gmra.mrb[40].mxu1 %v5288_v58 }
  0xa5   : > { %1715 = vmatmul.mubr.bf16.gmra.mrb[36].mxu0 %v5377_v61  ;;  %2164 = vmatprep.mubr.bf16.mxu1 %v5353_v53 }
  0xa6   : > { %1722 = vmatprep.mubr.bf16.mxu0 %v5407_v47 }
  0xac   : > { %2165 = vmatmul.mubr.bf16.gmra.mrb[44].mxu1 %v5332_v1 }
  0xad   : > { %1723 = vmatmul.mubr.bf16.gmra.mrb[40].mxu0 %v5394_v25  ;;  %2172 = vmatprep.mubr.bf16.mxu1 %v5367_v19 }
  0xae   : > { %1730 = vmatprep.mubr.bf16.mxu0 %v5417_v20 }
  0xb4   : > { %2173 = vmatmul.mubr.bf16.gmra.mrb[48].mxu1 %v5345_v14 }
  0xb5   : > { %1731 = vmatmul.mubr.bf16.gmra.mrb[44].mxu0 %v5432_v37  ;;  %2180 = vmatprep.mubr.bf16.mxu1 %v5386_v28 }
  0xb6   : > { %1738 = vmatprep.mubr.bf16.mxu0 %v5427_v0 }
  0xbc   : > { %2181 = vmatmul.mubr.bf16.gmra.mrb[52].mxu1 %v5363_v30 }
  0xbd   : > { %1739 = vmatmul.mubr.bf16.gmra.mrb[48].mxu0 %v5143_v18  ;;  %2188 = vmatprep.mubr.bf16.mxu1 %v5398_v63 }
  0xbe   : > { %1746 = vmatprep.mubr.bf16.mxu0 %v5439_v59 }
  0xc4   : > { %2189 = vmatmul.mubr.bf16.gmra.mrb[56].mxu1 %v5377_v61 }
  0xc5   : > { %1747 = vmatmul.mubr.bf16.gmra.mrb[52].mxu0 %v5151_v26  ;;  %2196 = vmatprep.mubr.bf16.mxu1 %v5407_v47 }
  0xc6   : > { %1754 = vmatprep.mubr.bf16.mxu0 %v5449_v62 }
  0xcc   : > { %2197 = vmatmul.mubr.bf16.gmra.mrb[60].mxu1 %v5394_v25 }
  0xcd   : > { %1755 = vmatmul.mubr.bf16.gmra.mrb[56].mxu0 %v5238_v22  ;;  %2204 = vmatprep.mubr.bf16.mxu1 %v5417_v20 }
  0xce   : > { %1762 = vmatprep.mubr.bf16.mxu0 %v5458_v35 }
  0xd4   : > { %2205 = vmatmul.mubr.bf16.gmra.mrb[64].mxu1 %v5432_v37 }
  0xd5   : > { %1763 = vmatmul.mubr.bf16.gmra.mrb[60].mxu0 %v5267_v17  ;;  %2212 = vmatprep.mubr.bf16.mxu1 %v5427_v0 }
  0xd6   : > { %4306 = vmatprep.mubr.bf16.mxu0 %v5465_v46 }
  0xdc   : > { %2213 = vmatmul.mubr.bf16.gmra.mrb[68].mxu1 %v5143_v18  ;;  %v4704_v18 = vld [vmem:[%s6057_s3 + $0x1d0] sm:$0xff]  }
  0xdd   : > { %4307 = vmatmul.mubr.bf16.vlgmr.msra.gmra.mrb[64].mxu0 %v5476_v9  ;;  %2220 = vmatprep.mubr.bf16.mxu1 %v5439_v59 }
  0xde   : > { %4155 = vmatpush3.bf16.msra.mxu0 %v4701_v7  ;;  %4310 = vmatprep.mubr.bf16.mxu0 %v5485_v39  ;;  %v5529_v7 = vsel %vm1278_vm3, %v1297_v23, %v1298_v4  ;;  %v4724_v23 = vld [vmem:[%s6057_s3 + $0x238] sm:$0xff]  }
  0xdf   : > { %4156 = vmatprep.subr.bf16.mxu0 %v4702_v44  ;;  %v1281_v44 = vsel %vm1278_vm3, %v1279_v38, %v1280_v13 }
  0xe2   : > { %4157 = vmatpush3.bf16.msra.mxu0 %v4703_v24  ;;  %v5539_v24 = vsel %vm1278_vm3, %v1300_v12, %v1301_v52 }
  0xe3   : > { %4158 = vmatprep.subr.bf16.mxu0 %v4704_v18  ;;  %v4713_v18 = vld [vmem:[%s6057_s3 + $0x1f0] sm:$0xff]  }
  0xe4   : > { %2221 = vmatmul.mubr.bf16.gmra.mrb[72].mxu1 %v5151_v26  ;;  %v4709_v26 = vld [vmem:[%s6057_s3 + $0x1e0] sm:$0xff]  }
  0xe5   : > { %4311 = vmatmul.mubr.bf16.gmra.mrb[68].mxu0 %v5502_v16  ;;  %2228 = vmatprep.mubr.bf16.mxu1 %v5449_v62 }
  0xe6   : > { %4159 = vmatpush3.bf16.msra.mxu0 %v4705_v29  ;;  %4314 = vmatprep.mubr.bf16.mxu0 %v5511_v60  ;;  %v4716_v29 = vld [vmem:[%s6057_s3 + $0x1b8] sm:$0xff]  }
  0xe7   : > { %4160 = vmatprep.subr.bf16.mxu0 %v4706_v31  ;;  %v4719_v31 = vld [vmem:[%s6057_s3 + $0x210] sm:$0xff]  }
  0xea   : > { %4161 = vmatpush3.bf16.msra.mxu0 %v4707_v50  ;;  %v4722_v50 = vld [vmem:[%s6057_s3 + $0x228] sm:$0xff]  }
  0xeb   : > { %4162 = vmatprep.subr.bf16.mxu0 %v4709_v26 }
  0xec   : > { %2229 = vmatmul.mubr.bf16.gmra.mrb[76].mxu1 %v5238_v22  ;;  %v5553_v22 = vsel %vm1278_vm3, %v1303_v36, %v1304_v45 }
  0xed   : > { %4315 = vmatmul.mubr.bf16.gmra.mrb[72].mxu0 %v5529_v7  ;;  %4354 = vmatprep.mubr.bf16.mxu1 %v1281_v44 }
  0xee   : > { %4163 = vmatpush3.bf16.msra.mxu0 %v4710_v56  ;;  %4318 = vmatprep.mubr.bf16.mxu0 %v5539_v24 }
  0xef   : > { %4164 = vmatprep.subr.bf16.mxu0 %v4711_v15 }
  0xf2   : > { %4165 = vmatpush3.bf16.msra.mxu0 %v4712_v6 }
  0xf3   : > { %4166 = vmatprep.subr.bf16.mxu0 %v4713_v18 }
  0xf4   : > { %4355 = vmatmul.mubr.bf16.vlgmr.msra.gmra.mrb[80].mxu1 %v5465_v46  ;;  %v4741_v46 = vld [vmem:[#allocation2 + $0x18] sm:$0xff]  }
  0xf5   : > { %4319 = vmatmul.mubr.bf16.gmra.mrb[76].mxu0 %v5553_v22  ;;  %4387 = vmatpush3.bf16.msra.mxu1 %v5383_v5  ;;  %v4720_v5 = vld [vmem:[%s6057_s3 + $0x218] sm:$0xff]  }
  0xf6   : > { %4167 = vmatpush3.bf16.msra.mxu0 %v4714_v43  ;;  %2649 = vmatprep.mubr.bf16.mxu0 %v5149_v10  ;;  %v4721_v10 = vld [vmem:[%s6057_s3 + $0x220] sm:$0xff]  }
  0xf7   : > { %4168 = vmatprep.subr.bf16.mxu0 %v4715_v8  ;;  %4358 = vmatprep.mubr.bf16.mxu1 %v5476_v9 }
  0xf8   : > { %4388 = vmatprep.subr.bf16.mxu1 %v4718_v11 }
  0xf9   : > { %4389 = vmatpush3.bf16.msra.mxu1 %v4718_v11 }
  0xfa   : > { %4169 = vmatpush3.bf16.msra.mxu0 %v4716_v29  ;;  %4390 = vmatprep.subr.bf16.mxu1 %v4719_v31 }
  0xfc   : > { %4359 = vmatmul.mubr.bf16.gmra.mrb[84].mxu1 %v5485_v39 }
  0xfd   : > { %2650 = vmatmul.mubr.bf16.vlgmr.msra.gmra.mrb[80].mxu0 %v4741_v46  ;;  %4362 = vmatprep.mubr.bf16.mxu1 %v5502_v16 }
  0xfe   : > { %2657 = vmatprep.mubr.bf16.mxu0 %v5203_v27  ;;  %4391 = vmatpush3.bf16.msra.mxu1 %v4719_v31  ;;  %v4723_v27 = vld [vmem:[%s6057_s3 + $0x230] sm:$0xff]  }
  0xff   : > { %4392 = vmatprep.subr.bf16.mxu1 %v4720_v5 }
 0x102   : > { %4393 = vmatpush3.bf16.msra.mxu1 %v4720_v5 }
 0x103   : > { %4394 = vmatprep.subr.bf16.mxu1 %v4721_v10 }
 0x104   : > { %4363 = vmatmul.mubr.bf16.gmra.mrb[88].mxu1 %v5511_v60 }
 0x105   : > { %2658 = vmatmul.mubr.bf16.gmra.mrb[84].mxu0 %v5161_v3  ;;  %4366 = vmatprep.mubr.bf16.mxu1 %v5529_v7 }
 0x106   : > { %2665 = vmatprep.mubr.bf16.mxu0 %v5305_v21  ;;  %4395 = vmatpush3.bf16.msra.mxu1 %v4721_v10 }
 0x107   : > { %4396 = vmatprep.subr.bf16.mxu1 %v4722_v50 }
 0x10a   : > { %4397 = vmatpush3.bf16.msra.mxu1 %v4722_v50 }
 0x10b   : > { %4398 = vmatprep.subr.bf16.mxu1 %v4723_v27 }
 0x10c   : > { %4367 = vmatmul.mubr.bf16.gmra.mrb[92].mxu1 %v5539_v24 }
 0x10d   : > { %2666 = vmatmul.mubr.bf16.gmra.mrb[88].mxu0 %v5278_v34  ;;  %4370 = vmatprep.mubr.bf16.mxu1 %v5553_v22 }
 0x10e   : > { %2673 = vmatprep.mubr.bf16.mxu0 %v5312_v40  ;;  %4399 = vmatpush3.bf16.msra.mxu1 %v4723_v27 }
 0x10f   : > { %4400 = vmatprep.subr.bf16.mxu1 %v4724_v23 }
 0x112   : > { %4401 = vmatpush3.bf16.msra.mxu1 %v4724_v23 }
 0x114   : > { %4371 = vmatmul.mubr.bf16.gmra.mrb[0].mxu1 %v4994_v41 }
 0x115   : > { %2674 = vmatmul.mubr.bf16.gmra.mrb[92].mxu0 %v5285_v42  ;;  %4374 = vmatprep.mubr.bf16.mxu1 %v5013_v57 }
 0x116   : > { %v3898_v3 = vpop.f32.mrb[0].mxu0  ;;  %2681 = vmatprep.mubr.bf16.mxu0 %v5324_v48 }
 0x117   : > { %v3899_v21 = vpop.f32.mrb[1].mxu0 }
 0x118   : > { %v5602_v4 = vadd.f32 %v3899_v21, %v3898_v3  ;;  %v3901_v51 = vpop.f32.mrb[2].mxu0  ;;  %v4726_v21 = vld [vmem:[#allocation2 + $0xd4] ss:$0 sps:$4 sm:$0x11]  }
 0x119   : > { %v3902_v38 = vpop.f32.mrb[3].mxu0 }
 0x11a   : > { %v5607_v34 = vadd.f32 %v3902_v38, %v3901_v51 }
 0x11c   : > { %4375 = vmatmul.mubr.bf16.gmra.mrb[4].mxu1 %v5039_v33 }
 0x11d   : > { %2682 = vmatmul.mubr.bf16.gmra.mrb[96].mxu0 %v5288_v58  ;;  %4378 = vmatprep.mubr.bf16.mxu1 %v5072_v2 }
 0x11e   : > { %2689 = vmatprep.mubr.bf16.mxu0 %v5353_v53 }
 0x124   : > { %4379 = vmatmul.mubr.bf16.gmra.mrb[8].mxu1 %v5174_v49 }
 0x125   : > { %v3904_v40 = vpop.f32.mrb[4].mxu0  ;;  %2690 = vmatmul.mubr.bf16.gmra.mrb[100].mxu0 %v5332_v1  ;;  %4382 = vmatprep.mubr.bf16.mxu1 %v5186_v54 }
 0x126   : > { %v3905_v42 = vpop.f32.mrb[5].mxu0  ;;  %2697 = vmatprep.mubr.bf16.mxu0 %v5367_v19 }
 0x127   : > { %v5617_v48 = vadd.f32 %v3905_v42, %v3904_v40  ;;  %v3907_v13 = vpop.f32.mrb[6].mxu0 }
 0x128   : > { %v3908_v26 = vpop.f32.mrb[7].mxu0 }
 0x129   : > { %v5619_v12 = vadd.f32 %v3908_v26, %v3907_v13 }
 0x12c   : > { %4383 = vmatmul.mubr.bf16.gmra.mrb[12].mxu1 %v5255_v55 }
 0x12d   : > { %2698 = vmatmul.mubr.bf16.gmra.mrb[104].mxu0 %v5345_v14  ;;  %4402 = vmatprep.mubr.bf16.mxu1 %v5476_v9 }
 0x12e   : > { %2705 = vmatprep.mubr.bf16.mxu0 %v5386_v28 }
 0x12f   : > { %v3910_v58 = vpop.f32.mrb[8].mxu0 }
 0x130   : > { %v3911_v1 = vpop.f32.mrb[9].mxu0 }
 0x131   : > { %v5625_v53 = vadd.f32 %v3911_v1, %v3910_v58  ;;  %v3913_v52 = vpop.f32.mrb[10].mxu0 }
 0x132   : > { %v3914_v19 = vpop.f32.mrb[11].mxu0 }
 0x133   : > { %v5627_v56 = vadd.f32 %v3914_v19, %v3913_v52 }
 0x134   : > { %4403 = vmatmul.mubr.bf16.vlgmr.msra.gmra.mrb[80].mxu1 %v5485_v39 }
 0x135   : > { %2706 = vmatmul.mubr.bf16.gmra.mrb[108].mxu0 %v5363_v30  ;;  %4406 = vmatprep.mubr.bf16.mxu1 %v5502_v16 }
 0x136   : > { %2713 = vmatprep.mubr.bf16.mxu0 %v5398_v63 }
 0x13c   : > { %4407 = vmatmul.mubr.bf16.gmra.mrb[84].mxu1 %v5511_v60 }
 0x13d   : > { %2714 = vmatmul.mubr.bf16.gmra.mrb[112].mxu0 %v5377_v61  ;;  %4410 = vmatprep.mubr.bf16.mxu1 %v5529_v7 }
 0x13e   : > { %2721 = vmatprep.mubr.bf16.mxu0 %v5407_v47 }
 0x144   : > { %4411 = vmatmul.mubr.bf16.gmra.mrb[88].mxu1 %v5539_v24 }
 0x145   : > { %2722 = vmatmul.mubr.bf16.gmra.mrb[116].mxu0 %v5394_v25  ;;  %4414 = vmatprep.mubr.bf16.mxu1 %v5553_v22 }
 0x146   : > { %2729 = vmatprep.mubr.bf16.mxu0 %v5417_v20 }
 0x147   : > { %v4034_v14 = vpop.f32.mrb[16].mxu1 }
 0x148   : > { %v3916_v30 = vpop.f32.mrb[12].mxu0  ;;  %v4035_v28 = vpop.f32.mrb[17].mxu1 }
 0x149   : > { %v3917_v63 = vpop.f32.mrb[13].mxu0  ;;  %v5641_v9 = vadd.f32 %v4035_v28, %v4034_v14  ;;  %v4037_v39 = vpop.f32.mrb[18].mxu1  ;;  %v4744_v28 = vld [vmem:[#allocation2 + $0xb4] sm:$0xff]  }
 0x14a   : > { %v5643_v61 = vadd.f32 %v3917_v63, %v3916_v30  ;;  %v3919_v16 = vpop.f32.mrb[14].mxu0  ;;  %v4038_v60 = vpop.f32.mrb[19].mxu1  ;;  %v2415_v30 = vshll.u32 %v4726_v21, 16 }
 0x14b   : > { %v3920_v47 = vpop.f32.mrb[15].mxu0  ;;  %v5645_v7 = vadd.f32 %v4038_v60, %v4037_v39  ;;  %v2421_v39 = vrot.slane %v4726_v21, 1 }
 0x14c   : > { %v5647_v44 = vadd.f32 %v3920_v47, %v3919_v16  ;;  %4415 = vmatmul.mubr.bf16.gmra.mrb[92].mxu1 %v4994_v41  ;;  %v2417_v47 = vrot.slane %v2415_v30, 1 }
 0x14d   : > { %2730 = vmatmul.mubr.bf16.gmra.mrb[120].mxu0 %v5432_v37  ;;  %4418 = vmatprep.mubr.bf16.mxu1 %v5013_v57  ;;  %v4742_v57 = vld [vmem:[#allocation2 + $0x9c] sm:$0xff]  }
 0x14e   : > { %2737 = vmatprep.mubr.bf16.mxu0 %v5427_v0 }
 0x14f   : > { %v4040_v25 = vpop.f32.mrb[20].mxu1 }
 0x150   : > { %v3922_v20 = vpop.f32.mrb[16].mxu0  ;;  %v4041_v15 = vpop.f32.mrb[21].mxu1 }
 0x151   : > { %v3923_v24 = vpop.f32.mrb[17].mxu0  ;;  %v5653_v6 = vadd.f32 %v4041_v15, %v4040_v25  ;;  %v4043_v36 = vpop.f32.mrb[22].mxu1 }
 0x152   : > { %v5655_v45 = vadd.f32 %v3923_v24, %v3922_v20  ;;  %v3925_v18 = vpop.f32.mrb[18].mxu0  ;;  %v4044_v22 = vpop.f32.mrb[23].mxu1 }
 0x153   : > { %v3926_v43 = vpop.f32.mrb[19].mxu0  ;;  %v5657_v8 = vadd.f32 %v4044_v22, %v4043_v36 }
 0x154   : > { %v5659_v41 = vadd.f32 %v3926_v43, %v3925_v18  ;;  %4419 = vmatmul.mubr.bf16.gmra.mrb[0].mxu1 %v5039_v33  ;;  %v4725_v33 = vld [vmem:[#allocation2 + $0xcc] sm:$0xff]  }
 0x155   : > { %2738 = vmatmul.mubr.bf16.gmra.mrb[124].mxu0 %v4742_v57  ;;  %4422 = vmatprep.mubr.bf16.mxu1 %v5072_v2  ;;  %v4743_v2 = vld [vmem:[#allocation2 + $0xa8] sm:$0xff]   ;;  %v2410_v51 = vshll.u32 %v4725_v33, 16  ;;  %v2408_v14 = vshrl.u32 %v4725_v33, 16  ;;  %v2420_v63 = vrot.slane %v4725_v33, 1 }
 0x156   : > { %2745 = vmatprep.mubr.bf16.mxu0 %v5439_v59 }
 0x157   : > { %v4046_v0 = vpop.f32.mrb[24].mxu1  ;;  %v2422_v18 = vsel %vm1278_vm3, %v2420_v63, %v2421_v39 }
 0x158   : > { %v3928_v37 = vpop.f32.mrb[20].mxu0  ;;  %v4047_v11 = vpop.f32.mrb[25].mxu1 }
 0x159   : > { %v3929_v29 = vpop.f32.mrb[21].mxu0  ;;  %v5664_v31 = vadd.f32 %v4047_v11, %v4046_v0  ;;  %v4049_v5 = vpop.f32.mrb[26].mxu1 }
 0x15a   : > { %v5666_v46 = vadd.f32 %v3929_v29, %v3928_v37  ;;  %v3931_v10 = vpop.f32.mrb[22].mxu0  ;;  %v4050_v50 = vpop.f32.mrb[27].mxu1 }
 0x15b   : > { %v3932_v27 = vpop.f32.mrb[23].mxu0  ;;  %v5668_v23 = vadd.f32 %v4050_v50, %v4049_v5 }
 0x15c   : > { %v5670_v3 = vadd.f32 %v3932_v27, %v3931_v10  ;;  %4423 = vmatmul.mubr.bf16.gmra.mrb[4].mxu1 %v5174_v49 }
 0x15d   : > { %2746 = vmatmul.mubr.bf16.gmra.mrb[128].mxu0 %v4743_v2  ;;  %4426 = vmatprep.mubr.bf16.mxu1 %v5186_v54  ;;  %v2412_v54 = vrot.slane %v2410_v51, 1 }
 0x15e   : > { %2753 = vmatprep.mubr.bf16.mxu0 %v5449_v62 }
 0x15f   : > { %v4052_v59 = vpop.f32.mrb[28].mxu1  ;;  %v2413_v60 = vor.u32 %v2412_v54, %v2408_v14 }
 0x160   : > { %v3934_v38 = vpop.f32.mrb[24].mxu0  ;;  %v4053_v40 = vpop.f32.mrb[29].mxu1 }
 0x161   : > { %v3935_v42 = vpop.f32.mrb[25].mxu0  ;;  %v5675_v13 = vadd.f32 %v4053_v40, %v4052_v59  ;;  %v4055_v26 = vpop.f32.mrb[30].mxu1 }
 0x162   : > { %v5677_v58 = vadd.f32 %v3935_v42, %v3934_v38  ;;  %v3937_v1 = vpop.f32.mrb[26].mxu0  ;;  %v4056_v52 = vpop.f32.mrb[31].mxu1 }
 0x163   : > { %v3938_v49 = vpop.f32.mrb[27].mxu0  ;;  %v5679_v19 = vadd.f32 %v4056_v52, %v4055_v26 }
 0x164   : > { %v5681_v62 = vadd.f32 %v3938_v49, %v3937_v1  ;;  %4427 = vmatmul.mubr.bf16.gmra.mrb[8].mxu1 %v5255_v55 }
 0x165   : > { %2754 = vmatmul.mubr.bf16.gmra.mrb[132].mxu0 %v4744_v28  ;;  %4430 = vmatprep.mubr.bf16.mxu1 %v5276_v32 }
 0x166   : > { %2761 = vmatprep.mubr.bf16.mxu0 %v5458_v35  ;;  %v2418_v35 = vsel %vm1069_vm4, %v2413_v60, %v2417_v47 }
 0x167   : > { %v4058_v16 = vpop.f32.mrb[32].mxu1 }
 0x168   : > { %v3940_v25 = vpop.f32.mrb[28].mxu0  ;;  %v4059_v20 = vpop.f32.mrb[33].mxu1 }
 0x169   : > { %v3941_v15 = vpop.f32.mrb[29].mxu0  ;;  %v5686_v24 = vadd.f32 %v4059_v20, %v4058_v16  ;;  %v4061_v36 = vpop.f32.mrb[34].mxu1 }
 0x16a   : > { %v5689_v55 = vadd.f32 %v3941_v15, %v3940_v25  ;;  %v3943_v22 = vpop.f32.mrb[30].mxu0  ;;  %v4062_v43 = vpop.f32.mrb[35].mxu1 }
 0x16b   : > { %v3944_v32 = vpop.f32.mrb[31].mxu0  ;;  %v5691_v57 = vadd.f32 %v4062_v43, %v4061_v36 }
 0x16c   : > { %v5694_v0 = vadd.f32 %v3944_v32, %v3943_v22  ;;  %4431 = vmatmul.mubr.bf16.gmra.mrb[12].mxu1 %v2422_v18 }
 0x16d   : > { %2762 = vmatmul.mubr.bf16.gmra.mrb[136].mxu0 %v5267_v17 }
 0x16e   : > { %2769 = vmatprep.mubr.bf16.mxu0 %v2418_v35 }
 0x16f   : > { %v4064_v37 = vpop.f32.mrb[36].mxu1 }
 0x170   : > { %v3946_v11 = vpop.f32.mrb[32].mxu0  ;;  %v4065_v29 = vpop.f32.mrb[37].mxu1 }
 0x171   : > { %v3947_v5 = vpop.f32.mrb[33].mxu0  ;;  %v5697_v10 = vadd.f32 %v4065_v29, %v4064_v37  ;;  %v4067_v50 = vpop.f32.mrb[38].mxu1 }
 0x172   : > { %v3948_v27 = vadd.f32 %v3947_v5, %v3946_v11  ;;  %v3949_v2 = vpop.f32.mrb[34].mxu0  ;;  %v4068_v59 = vpop.f32.mrb[39].mxu1 }
 0x173   : > { %v3950_v21 = vpop.f32.mrb[35].mxu0  ;;  %v5699_v51 = vadd.f32 %v4068_v59, %v4067_v50 }
 0x174   : > { %v3951_v38 = vadd.f32 %v3950_v21, %v3949_v2 }
 0x175   : > { %2770 = vmatmul.mubr.bf16.gmra.mrb[140].mxu0 %v4725_v33 }
 0x177   : > { %v4070_v40 = vpop.f32.mrb[40].mxu1 }
 0x178   : > { %v3952_v42 = vpop.f32.mrb[36].mxu0  ;;  %v4071_v26 = vpop.f32.mrb[41].mxu1 }
 0x179   : > { %v3953_v17 = vpop.f32.mrb[37].mxu0  ;;  %v5701_v1 = vadd.f32 %v4071_v26, %v4070_v40  ;;  %v4073_v52 = vpop.f32.mrb[42].mxu1 }
 0x17a   : > { %v3954_v49 = vadd.f32 %v3953_v17, %v3952_v42  ;;  %v3955_v14 = vpop.f32.mrb[38].mxu0  ;;  %v4074_v54 = vpop.f32.mrb[43].mxu1 }
 0x17b   : > { %v3956_v30 = vpop.f32.mrb[39].mxu0  ;;  %v5703_v28 = vadd.f32 %v4074_v54, %v4073_v52 }
 0x17c   : > { %v3957_v63 = vadd.f32 %v3956_v30, %v3955_v14 }
 0x17f   : > { %v4076_v39 = vpop.f32.mrb[44].mxu1 }
 0x180   : > { %v3958_v16 = vpop.f32.mrb[40].mxu0  ;;  %v4077_v60 = vpop.f32.mrb[45].mxu1 }
 0x181   : > { %v3959_v47 = vpop.f32.mrb[41].mxu0  ;;  %v5705_v25 = vadd.f32 %v4077_v60, %v4076_v39  ;;  %v4079_v33 = vpop.f32.mrb[46].mxu1 }
 0x182   : > { %v3960_v20 = vadd.f32 %v3959_v47, %v3958_v16  ;;  %v3961_v15 = vpop.f32.mrb[42].mxu0  ;;  %v4080_v36 = vpop.f32.mrb[47].mxu1 }
 0x183   : > { %v3962_v18 = vpop.f32.mrb[43].mxu0  ;;  %v5707_v22 = vadd.f32 %v4080_v36, %v4079_v33 }
 0x184   : > { %v3963_v43 = vadd.f32 %v3962_v18, %v3961_v15 }
 0x187   : > { %v4082_v32 = vpop.f32.mrb[48].mxu1 }
 0x188   : > { %v3964_v35 = vpop.f32.mrb[44].mxu0  ;;  %v4083_v37 = vpop.f32.mrb[49].mxu1 }
 0x189   : > { %v3965_v11 = vpop.f32.mrb[45].mxu0  ;;  %v4084_v29 = vadd.f32 %v4083_v37, %v4082_v32  ;;  %v4085_v5 = vpop.f32.mrb[50].mxu1 }
 0x18a   : > { %v3966_v50 = vadd.f32 %v3965_v11, %v3964_v35  ;;  %v3967_v2 = vpop.f32.mrb[46].mxu0  ;;  %v4086_v59 = vpop.f32.mrb[51].mxu1 }
 0x18b   : > { %v3968_v21 = vpop.f32.mrb[47].mxu0  ;;  %v5709_v40 = vadd.f32 %v4084_v29, %v3948_v27  ;;  %v4087_v42 = vadd.f32 %v4086_v59, %v4085_v5 }
 0x18c   : > { %v3969_v26 = vadd.f32 %v3968_v21, %v3967_v2 }
 0x18d   : > { %v5711_v17 = vadd.f32 %v4087_v42, %v3951_v38 }
 0x18f   : > { %v4088_v52 = vpop.f32.mrb[52].mxu1 }
 0x190   : > { %v3970_v14 = vpop.f32.mrb[48].mxu0  ;;  %v4089_v54 = vpop.f32.mrb[53].mxu1 }
 0x191   : > { %v3971_v30 = vpop.f32.mrb[49].mxu0  ;;  %v4090_v39 = vadd.f32 %v4089_v54, %v4088_v52  ;;  %v4091_v16 = vpop.f32.mrb[54].mxu1 }
 0x192   : > { %v3972_v60 = vadd.f32 %v3971_v30, %v3970_v14  ;;  %v3973_v47 = vpop.f32.mrb[50].mxu0  ;;  %v4092_v33 = vpop.f32.mrb[55].mxu1 }
 0x193   : > { %v3974_v15 = vpop.f32.mrb[51].mxu0  ;;  %v5713_v36 = vadd.f32 %v4090_v39, %v3954_v49  ;;  %v4093_v18 = vadd.f32 %v4092_v33, %v4091_v16 }
 0x194   : > { %v3975_v32 = vadd.f32 %v3974_v15, %v3973_v47 }
 0x195   : > { %v5715_v27 = vadd.f32 %v4093_v18, %v3957_v63 }
 0x197   : > { %6063 = vst [vmem:[#allocation3_spill] sm:$0xff] %v5715_v27  ;;  %v4094_v35 = vpop.f32.mrb[56].mxu1 }
 0x198   : > { %v3976_v37 = vpop.f32.mrb[52].mxu0  ;;  %v4095_v38 = vpop.f32.mrb[57].mxu1 }
 0x199   : > { %v3977_v11 = vpop.f32.mrb[53].mxu0  ;;  %v4096_v29 = vadd.f32 %v4095_v38, %v4094_v35  ;;  %v4097_v5 = vpop.f32.mrb[58].mxu1 }
 0x19a   : > { %v3978_v2 = vadd.f32 %v3977_v11, %v3976_v37  ;;  %v3979_v59 = vpop.f32.mrb[54].mxu0  ;;  %v4098_v21 = vpop.f32.mrb[59].mxu1 }
 0x19b   : > { %v3980_v42 = vpop.f32.mrb[55].mxu0  ;;  %v5717_v52 = vadd.f32 %v4096_v29, %v3960_v20  ;;  %v4099_v14 = vadd.f32 %v4098_v21, %v4097_v5 }
 0x19c   : > { %v3981_v54 = vadd.f32 %v3980_v42, %v3979_v59 }
 0x19d   : > { %6064 = vst [vmem:[#allocation4_spill] sm:$0xff] %v5717_v52  ;;  %v5719_v49 = vadd.f32 %v4099_v14, %v3963_v43 }
 0x19f   : > { %6065 = vst [vmem:[#allocation5_spill] sm:$0xff] %v5719_v49  ;;  %v4100_v30 = vpop.f32.mrb[60].mxu1 }
 0x1a0   : > { %v3982_v39 = vpop.f32.mrb[56].mxu0  ;;  %v4101_v63 = vpop.f32.mrb[61].mxu1 }
 0x1a1   : > { %v3983_v16 = vpop.f32.mrb[57].mxu0  ;;  %v4102_v47 = vadd.f32 %v4101_v63, %v4100_v30  ;;  %v4103_v33 = vpop.f32.mrb[62].mxu1 }
 0x1a2   : > { %v3984_v15 = vadd.f32 %v3983_v16, %v3982_v39  ;;  %v3985_v18 = vpop.f32.mrb[58].mxu0  ;;  %v4104_v35 = vpop.f32.mrb[63].mxu1 }
 0x1a3   : > { %v3986_v38 = vpop.f32.mrb[59].mxu0  ;;  %v5721_v37 = vadd.f32 %v4102_v47, %v3966_v50  ;;  %v4105_v11 = vadd.f32 %v4104_v35, %v4103_v33 }
 0x1a4   : > { %v3987_v27 = vadd.f32 %v3986_v38, %v3985_v18 }
 0x1a5   : > { %v5723_v20 = vadd.f32 %v4105_v11, %v3969_v26 }
 0x1a7   : > { %v4106_v29 = vpop.f32.mrb[64].mxu1 }
 0x1a8   : > { %v3988_v5 = vpop.f32.mrb[60].mxu0  ;;  %v4107_v43 = vpop.f32.mrb[65].mxu1 }
 0x1a9   : > { %v3989_v59 = vpop.f32.mrb[61].mxu0  ;;  %v4108_v21 = vadd.f32 %v4107_v43, %v4106_v29  ;;  %v4109_v42 = vpop.f32.mrb[66].mxu1 }
 0x1aa   : > { %v3990_v14 = vadd.f32 %v3989_v59, %v3988_v5  ;;  %v3991_v49 = vpop.f32.mrb[62].mxu0  ;;  %v4110_v30 = vpop.f32.mrb[67].mxu1 }
 0x1ab   : > { %v3992_v63 = vpop.f32.mrb[63].mxu0  ;;  %v5725_v39 = vadd.f32 %v4108_v21, %v3972_v60  ;;  %v4111_v16 = vadd.f32 %v4110_v30, %v4109_v42 }
 0x1ac   : > { %v3993_v52 = vadd.f32 %v3992_v63, %v3991_v49 }
 0x1ad   : > { %v5727_v50 = vadd.f32 %v4111_v16, %v3975_v32 }
 0x1af   : > { %v4112_v47 = vpop.f32.mrb[68].mxu1 }
 0x1b0   : > { %v4308_v33 = vpop.f32.mrb[64].mxu0  ;;  %v4113_v26 = vpop.f32.mrb[69].mxu1 }
 0x1b1   : > { %v1814_v18 = vadd.f32 %v4308_v33, %v5617_v48  ;;  %v1805_v35 = vpop.f32.mrb[65].mxu0  ;;  %v4114_v38 = vadd.f32 %v4113_v26, %v4112_v47  ;;  %v4115_v11 = vpop.f32.mrb[70].mxu1 }
 0x1b2   : > { %v1806_v29 = vadd.f32 %v5602_v4, %v1805_v35  ;;  %v4309_v5 = vpop.f32.mrb[66].mxu0  ;;  %v4116_v43 = vpop.f32.mrb[71].mxu1 }
 0x1b3   : > { %v5732_v59 = vadd.f32 %v5653_v6, %v1814_v18  ;;  %v1817_v60 = vadd.f32 %v4309_v5, %v5619_v12  ;;  %v1808_v49 = vpop.f32.mrb[67].mxu0  ;;  %v5735_v32 = vadd.f32 %v4114_v38, %v3978_v2  ;;  %v4117_v21 = vadd.f32 %v4116_v43, %v4115_v11 }
 0x1b4   : > { %v5738_v42 = vadd.f32 %v5641_v9, %v1806_v29  ;;  %v1809_v48 = vadd.f32 %v5607_v34, %v1808_v49 }
 0x1b5   : > { %v5742_v30 = vadd.f32 %v5657_v8, %v1817_v60  ;;  %v5744_v4 = vadd.f32 %v4117_v21, %v3981_v54 }
 0x1b6   : > { %v2114_v63 = vadd.f32 %v5645_v7, %v1809_v48 }
 0x1b7   : > { %v4118_v6 = vpop.f32.mrb[72].mxu1 }
 0x1b8   : > { %v4312_v16 = vpop.f32.mrb[68].mxu0  ;;  %v4119_v47 = vpop.f32.mrb[73].mxu1 }
 0x1b9   : > { %v1830_v12 = vadd.f32 %v4312_v16, %v5643_v61  ;;  %v1821_v2 = vpop.f32.mrb[69].mxu0  ;;  %v4120_v33 = vadd.f32 %v4119_v47, %v4118_v6  ;;  %v4121_v26 = vpop.f32.mrb[74].mxu1 }
 0x1ba   : > { %v1822_v9 = vadd.f32 %v5625_v53, %v1821_v2  ;;  %v4313_v18 = vpop.f32.mrb[70].mxu0  ;;  %v4122_v35 = vpop.f32.mrb[75].mxu1 }
 0x1bb   : > { %v5750_v34 = vadd.f32 %v5675_v13, %v1830_v12  ;;  %v1833_v8 = vadd.f32 %v4313_v18, %v5647_v44  ;;  %v1824_v54 = vpop.f32.mrb[71].mxu0  ;;  %v5753_v38 = vadd.f32 %v4120_v33, %v3984_v15  ;;  %v4123_v7 = vadd.f32 %v4122_v35, %v4121_v26 }
 0x1bc   : > { %v2127_v11 = vadd.f32 %v5664_v31, %v1822_v9  ;;  %v1825_v61 = vadd.f32 %v5627_v56, %v1824_v54 }
 0x1bd   : > { %v5758_v29 = vadd.f32 %v5679_v19, %v1833_v8  ;;  %v5760_v5 = vadd.f32 %v4123_v7, %v3987_v27 }
 0x1be   : > { %v2130_v53 = vadd.f32 %v5668_v23, %v1825_v61 }
 0x1bf   : > { %v4124_v43 = vpop.f32.mrb[76].mxu1 }
 0x1c0   : > { %v4316_v13 = vpop.f32.mrb[72].mxu0  ;;  %v4125_v60 = vpop.f32.mrb[77].mxu1 }
 0x1c1   : > { %v1846_v44 = vadd.f32 %v4316_v13, %v5666_v46  ;;  %v1837_v49 = vpop.f32.mrb[73].mxu0  ;;  %v4126_v15 = vadd.f32 %v4125_v60, %v4124_v43  ;;  %v4127_v21 = vpop.f32.mrb[78].mxu1 }
 0x1c2   : > { %v1838_v48 = vadd.f32 %v5655_v45, %v1837_v49  ;;  %v4317_v31 = vpop.f32.mrb[74].mxu0  ;;  %v4128_v6 = vpop.f32.mrb[79].mxu1 }
 0x1c3   : > { %v5766_v56 = vadd.f32 %v5697_v10, %v1846_v44  ;;  %v1849_v19 = vadd.f32 %v4317_v31, %v5670_v3  ;;  %v1840_v27 = vpop.f32.mrb[75].mxu0  ;;  %v5769_v16 = vadd.f32 %v4126_v15, %v3990_v14  ;;  %v4129_v23 = vadd.f32 %v4128_v6, %v4127_v21 }
 0x1c4   : > { %v2143_v47 = vadd.f32 %v5686_v24, %v1838_v48  ;;  %v1841_v46 = vadd.f32 %v5659_v41, %v1840_v27 }
 0x1c5   : > { %v2154_v12 = vadd.f32 %v5699_v51, %v1849_v19  ;;  %v5774_v2 = vadd.f32 %v4129_v23, %v3993_v52 }
 0x1c6   : > { %v2146_v45 = vadd.f32 %v5691_v57, %v1841_v46 }
 0x1c8   : > { %v4320_v33 = vpop.f32.mrb[76].mxu0 }
 0x1c9   : > { %v1862_v10 = vadd.f32 %v4320_v33, %v5689_v55  ;;  %v1853_v26 = vpop.f32.mrb[77].mxu0 }
 0x1ca   : > { %v1854_v3 = vadd.f32 %v5677_v58, %v1853_v26  ;;  %v4321_v9 = vpop.f32.mrb[78].mxu0 }
 0x1cb   : > { %v5780_v14 = vadd.f32 %v5705_v25, %v1862_v10  ;;  %v1865_v24 = vadd.f32 %v4321_v9, %v5694_v0  ;;  %v1856_v18 = vpop.f32.mrb[79].mxu0 }
 0x1cc   : > { %v2159_v41 = vadd.f32 %v5701_v1, %v1854_v3  ;;  %v1857_v51 = vadd.f32 %v5681_v62, %v1856_v18 }
 0x1cd   : > { %v5786_v52 = vadd.f32 %v5707_v22, %v1865_v24 }
 0x1ce   : > { %v2162_v57 = vadd.f32 %v5703_v28, %v1857_v51 }
 0x1d0   : > { %v4170_v55 = vpop.f32.mrb[80].mxu0 }
 0x1d1   : > { %v4171_v35 = vpop.f32.mrb[81].mxu0 }
 0x1d2   : > { %v4172_v8 = vadd.f32 %v4171_v35, %v4170_v55  ;;  %v4173_v58 = vpop.f32.mrb[82].mxu0 }
 0x1d3   : > { %v4174_v54 = vpop.f32.mrb[83].mxu0 }
 0x1d4   : > { %v4175_v7 = vadd.f32 %v4174_v54, %v4173_v58  ;;  %v4456_v25 = vadd.f32 %v4172_v8, %v5738_v42 }
 0x1d6   : > { %v4464_v61 = vadd.f32 %v4175_v7, %v2114_v63 }
 0x1d8   : > { %v4176_v0 = vpop.f32.mrb[84].mxu0 }
 0x1d9   : > { %v4177_v43 = vpop.f32.mrb[85].mxu0 }
 0x1da   : > { %v4178_v13 = vadd.f32 %v4177_v43, %v4176_v0  ;;  %v4179_v1 = vpop.f32.mrb[86].mxu0 }
 0x1db   : > { %v4180_v60 = vpop.f32.mrb[87].mxu0 }
 0x1dc   : > { %v4181_v62 = vadd.f32 %v4180_v60, %v4179_v1  ;;  %v4452_v22 = vadd.f32 %v4178_v13, %v5732_v59 }
 0x1de   : > { %v4460_v44 = vadd.f32 %v4181_v62, %v5742_v30 }
 0x1e0   : > { %v4182_v28 = vpop.f32.mrb[88].mxu0 }
 0x1e1   : > { %v4183_v49 = vpop.f32.mrb[89].mxu0 }
 0x1e2   : > { %v4184_v15 = vadd.f32 %v4183_v49, %v4182_v28  ;;  %v4185_v21 = vpop.f32.mrb[90].mxu0 }
 0x1e3   : > { %v4186_v48 = vpop.f32.mrb[91].mxu0 }
 0x1e4   : > { %v4187_v31 = vadd.f32 %v4186_v48, %v4185_v21  ;;  %v4472_v6 = vadd.f32 %v4184_v15, %v2127_v11 }
 0x1e6   : > { %v5792_v19 = vadd.f32 %v4187_v31, %v2130_v53 }
 0x1e8   : > { %v4188_v42 = vpop.f32.mrb[92].mxu0 }
 0x1e9   : > { %v4189_v63 = vpop.f32.mrb[93].mxu0 }
 0x1ea   : > { %v4190_v27 = vadd.f32 %v4189_v63, %v4188_v42  ;;  %v4191_v23 = vpop.f32.mrb[94].mxu0 }
 0x1eb   : > { %v4192_v46 = vpop.f32.mrb[95].mxu0 }
 0x1ec   : > { %v4193_v33 = vadd.f32 %v4192_v46, %v4191_v23  ;;  %v4468_v10 = vadd.f32 %v4190_v27, %v5750_v34 }
 0x1ee   : > { %v4476_v59 = vadd.f32 %v4193_v33, %v5758_v29 }
 0x1f0   : > { %v4194_v30 = vpop.f32.mrb[96].mxu0 }
 0x1f1   : > { %v4195_v26 = vpop.f32.mrb[97].mxu0 }
 0x1f2   : > { %v4196_v3 = vadd.f32 %v4195_v26, %v4194_v30  ;;  %v4197_v9 = vpop.f32.mrb[98].mxu0 }
 0x1f3   : > { %v4198_v24 = vpop.f32.mrb[99].mxu0 }
 0x1f4   : > { %v4199_v18 = vadd.f32 %v4198_v24, %v4197_v9  ;;  %v5796_v51 = vadd.f32 %v4196_v3, %v2143_v47 }
 0x1f6   : > { %v5798_v11 = vadd.f32 %v4199_v18, %v2146_v45 }
 0x1f8   : > { %v4200_v53 = vpop.f32.mrb[100].mxu0 }
 0x1f9   : > { %v4201_v55 = vpop.f32.mrb[101].mxu0 }
 0x1fa   : > { %v4202_v35 = vadd.f32 %v4201_v55, %v4200_v53  ;;  %v4203_v8 = vpop.f32.mrb[102].mxu0 }
 0x1fb   : > { %v4204_v58 = vpop.f32.mrb[103].mxu0 }
 0x1fc   : > { %v4205_v54 = vadd.f32 %v4204_v58, %v4203_v8  ;;  %v4484_v34 = vadd.f32 %v4202_v35, %v5766_v56 }
 0x1fe   : > { %v5801_v7 = vadd.f32 %v4205_v54, %v2154_v12 }
 0x200   : > { %v4206_v29 = vpop.f32.mrb[104].mxu0 }
 0x201   : > { %v4207_v0 = vpop.f32.mrb[105].mxu0 }
 0x202   : > { %v4208_v43 = vadd.f32 %v4207_v0, %v4206_v29  ;;  %v4209_v13 = vpop.f32.mrb[106].mxu0 }
 0x203   : > { %v4210_v1 = vpop.f32.mrb[107].mxu0 }
 0x204   : > { %v4211_v47 = vadd.f32 %v4210_v1, %v4209_v13  ;;  %v5803_v60 = vadd.f32 %v4208_v43, %v2159_v41 }
 0x206   : > { %v5805_v45 = vadd.f32 %v4211_v47, %v2162_v57 }
 0x207   : > { %v4404_v62 = vpop.f32.mrb[80].mxu1 }
 0x208   : > { %v4212_v28 = vpop.f32.mrb[108].mxu0  ;;  %v5807_v49 = vadd.f32 %v4452_v22, %v4404_v62  ;;  %v2812_v15 = vpop.f32.mrb[81].mxu1 }
 0x209   : > { %v4213_v21 = vpop.f32.mrb[109].mxu0  ;;  %v5809_v56 = vadd.f32 %v4456_v25, %v2812_v15  ;;  %v4405_v12 = vpop.f32.mrb[82].mxu1 }
 0x20a   : > { %v4214_v48 = vadd.f32 %v4213_v21, %v4212_v28  ;;  %v4215_v31 = vpop.f32.mrb[110].mxu0  ;;  %v5811_v42 = vadd.f32 %v4460_v44, %v4405_v12  ;;  %v2815_v63 = vpop.f32.mrb[83].mxu1 }
 0x20b   : > { %v4216_v27 = vpop.f32.mrb[111].mxu0  ;;  %v5820_v41 = vadd.f32 %v4464_v61, %v2815_v63 }
 0x20c   : > { %v4217_v57 = vadd.f32 %v4216_v27, %v4215_v31  ;;  %v3780_v25 = vpack.c.bf16 %v5811_v42, %v5807_v49  ;;  %v4500_v22 = vadd.f32 %v4214_v48, %v5780_v14 }
 0x20d   : > { %v3775_v44 = vpack.c.bf16 %v5820_v41, %v5809_v56  ;;  %v3131_v23 = vadd.f32 %v5820_v41, %v5809_v56 }
 0x20e   : > { %3867 = vst [vmem:[%s5818_s14 + $0x8] sm:$0xff] %v3780_v25   ;;  %v4508_v46 = vadd.f32 %v4217_v57, %v5786_v52 }
 0x20f   : > { %3776 = vst [vmem:[%s5818_s14] sm:$0xff] %v3775_v44   ;;  %v3132_v33 = vadd.f32 %v5807_v49, %v3131_v23  ;;  %v4408_v61 = vpop.f32.mrb[84].mxu1 }
 0x210   : > { %v4218_v30 = vpop.f32.mrb[112].mxu0  ;;  %v5833_v26 = vadd.f32 %v4468_v10, %v4408_v61  ;;  %v2828_v3 = vpop.f32.mrb[85].mxu1 }
 0x211   : > { %v4219_v9 = vpop.f32.mrb[113].mxu0  ;;  %v5835_v14 = vadd.f32 %v4472_v6, %v2828_v3  ;;  %v3133_v24 = vadd.f32 %v5811_v42, %v3132_v33  ;;  %v4409_v18 = vpop.f32.mrb[86].mxu1 }
 0x212   : > { %v4220_v53 = vadd.f32 %v4219_v9, %v4218_v30  ;;  %v4221_v55 = vpop.f32.mrb[114].mxu0  ;;  %v5838_v35 = vadd.f32 %v4476_v59, %v4409_v18  ;;  %v2831_v52 = vpop.f32.mrb[87].mxu1 }
 0x213   : > { %v4222_v8 = vpop.f32.mrb[115].mxu0  ;;  %v3134_v58 = vadd.f32 %v5835_v14, %v3133_v24  ;;  %v5842_v10 = vadd.f32 %v5792_v19, %v2831_v52 }
 0x214   : > { %v4223_v54 = vadd.f32 %v4222_v8, %v4221_v55  ;;  %v3790_v6 = vpack.c.bf16 %v5838_v35, %v5833_v26  ;;  %v4518_v29 = vadd.f32 %v5709_v40, %v4220_v53 }
 0x215   : > { %v3785_v0 = vpack.c.bf16 %v5842_v10, %v5835_v14  ;;  %v3135_v43 = vadd.f32 %v5842_v10, %v3134_v58 }
 0x216   : > { %3869 = vst [vmem:[%s5818_s14 + $0x18] sm:$0xff] %v3790_v6   ;;  %v5852_v59 = vadd.f32 %v5711_v17, %v4223_v54 }
 0x217   : > { %3868 = vst [vmem:[%s5818_s14 + $0x10] sm:$0xff] %v3785_v0   ;;  %v3136_v13 = vadd.f32 %v5833_v26, %v3135_v43  ;;  %v4412_v19 = vpop.f32.mrb[88].mxu1  ;;  %v6067_v43 = vld [vmem:[#allocation4_spill] sm:$0xff] }
 0x218   : > { %v4224_v1 = vpop.f32.mrb[116].mxu0  ;;  %v5856_v47 = vadd.f32 %v4484_v34, %v4412_v19  ;;  %v2844_v62 = vpop.f32.mrb[89].mxu1 }
 0x219   : > { %v4225_v28 = vpop.f32.mrb[117].mxu0  ;;  %v5859_v40 = vadd.f32 %v5796_v51, %v2844_v62  ;;  %v3137_v15 = vadd.f32 %v5838_v35, %v3136_v13  ;;  %v4413_v21 = vpop.f32.mrb[90].mxu1 }
 0x21a   : > { %v4226_v12 = vadd.f32 %v4225_v28, %v4224_v1  ;;  %v4227_v17 = vpop.f32.mrb[118].mxu0  ;;  %v5863_v48 = vadd.f32 %v5801_v7, %v4413_v21  ;;  %v2847_v31 = vpop.f32.mrb[91].mxu1  ;;  %v6066_v7 = vld [vmem:[#allocation3_spill] sm:$0xff] }
 0x21b   : > { %v4228_v63 = vpop.f32.mrb[119].mxu0  ;;  %v3138_v34 = vadd.f32 %v5859_v40, %v3137_v15  ;;  %v5867_v27 = vadd.f32 %v5798_v11, %v2847_v31 }
 0x21c   : > { %v4229_v57 = vadd.f32 %v4228_v63, %v4227_v17  ;;  %v3800_v51 = vpack.c.bf16 %v5863_v48, %v5856_v47  ;;  %v4515_v25 = vadd.f32 %v5713_v36, %v4226_v12 }
 0x21d   : > { %v3795_v44 = vpack.c.bf16 %v5867_v27, %v5859_v40  ;;  %v3139_v23 = vadd.f32 %v5867_v27, %v3138_v34 }
 0x21e   : > { %3871 = vst [vmem:[%s5818_s14 + $0x28] sm:$0xff] %v3800_v51   ;;  %v4521_v33 = vadd.f32 %v6066_v7, %v4229_v57 }
 0x21f   : > { %3870 = vst [vmem:[%s5818_s14 + $0x20] sm:$0xff] %v3795_v44   ;;  %v3140_v61 = vadd.f32 %v5856_v47, %v3139_v23  ;;  %v4416_v30 = vpop.f32.mrb[92].mxu1 }
 0x220   : > { %v4230_v11 = vpop.f32.mrb[120].mxu0  ;;  %v5879_v3 = vadd.f32 %v4500_v22, %v4416_v30  ;;  %v2860_v9 = vpop.f32.mrb[93].mxu1 }
 0x221   : > { %v4231_v24 = vpop.f32.mrb[121].mxu0  ;;  %v5882_v36 = vadd.f32 %v5803_v60, %v2860_v9  ;;  %v3141_v18 = vadd.f32 %v5863_v48, %v3140_v61  ;;  %v4417_v53 = vpop.f32.mrb[94].mxu1 }
 0x222   : > { %v4232_v55 = vadd.f32 %v4231_v24, %v4230_v11  ;;  %v4233_v52 = vpop.f32.mrb[122].mxu0  ;;  %v5885_v8 = vadd.f32 %v4508_v46, %v4417_v53  ;;  %v2863_v58 = vpop.f32.mrb[95].mxu1  ;;  %v6068_v46 = vld [vmem:[#allocation5_spill] sm:$0xff] }
 0x223   : > { %v4234_v54 = vpop.f32.mrb[123].mxu0  ;;  %v3142_v6 = vadd.f32 %v5882_v36, %v3141_v18  ;;  %v5889_v22 = vadd.f32 %v5805_v45, %v2863_v58 }
 0x224   : > { %v4235_v0 = vadd.f32 %v4234_v54, %v4233_v52  ;;  %v3810_v60 = vpack.c.bf16 %v5885_v8, %v5879_v3  ;;  %v4530_v13 = vadd.f32 %v6067_v43, %v4232_v55 }
 0x225   : > { %v3805_v19 = vpack.c.bf16 %v5889_v22, %v5882_v36  ;;  %v3143_v1 = vadd.f32 %v5889_v22, %v3142_v6 }
 0x226   : > { %3873 = vst [vmem:[%s5818_s14 + $0x38] sm:$0xff] %v3810_v60   ;;  %v4536_v62 = vadd.f32 %v6068_v46, %v4235_v0 }
 0x227   : > { %3872 = vst [vmem:[%s5818_s14 + $0x30] sm:$0xff] %v3805_v19   ;;  %v3144_v28 = vadd.f32 %v5879_v3, %v3143_v1  ;;  %v4420_v15 = vpop.f32.mrb[0].mxu1 }
 0x228   : > { %v4236_v45 = vpop.f32.mrb[124].mxu0  ;;  %v5901_v21 = vadd.f32 %v4515_v25, %v4420_v15  ;;  %v2876_v12 = vpop.f32.mrb[1].mxu1 }
 0x229   : > { %v4237_v17 = vpop.f32.mrb[125].mxu0  ;;  %v5903_v31 = vadd.f32 %v4518_v29, %v2876_v12  ;;  %v3145_v63 = vadd.f32 %v5885_v8, %v3144_v28  ;;  %v4421_v34 = vpop.f32.mrb[2].mxu1 }
 0x22a   : > { %v4238_v57 = vadd.f32 %v4237_v17, %v4236_v45  ;;  %v4239_v51 = vpop.f32.mrb[126].mxu0  ;;  %v5906_v44 = vadd.f32 %v4521_v33, %v4421_v34  ;;  %v2879_v23 = vpop.f32.mrb[3].mxu1 }
 0x22b   : > { %v4240_v7 = vpop.f32.mrb[127].mxu0  ;;  %v3146_v61 = vadd.f32 %v5903_v31, %v3145_v63  ;;  %v5910_v25 = vadd.f32 %v5852_v59, %v2879_v23 }
 0x22c   : > { %v4241_v30 = vadd.f32 %v4240_v7, %v4239_v51  ;;  %v3820_v29 = vpack.c.bf16 %v5906_v44, %v5901_v21  ;;  %v4527_v11 = vadd.f32 %v5721_v37, %v4238_v57 }
 0x22d   : > { %v3815_v9 = vpack.c.bf16 %v5910_v25, %v5903_v31  ;;  %v3147_v24 = vadd.f32 %v5910_v25, %v3146_v61 }
 0x22e   : > { %3875 = vst [vmem:[%s5818_s14 + $0x48] sm:$0xff] %v3820_v29   ;;  %v4533_v33 = vadd.f32 %v5723_v20, %v4241_v30 }
 0x22f   : > { %3874 = vst [vmem:[%s5818_s14 + $0x40] sm:$0xff] %v3815_v9   ;;  %v3148_v18 = vadd.f32 %v5901_v21, %v3147_v24  ;;  %v4424_v53 = vpop.f32.mrb[4].mxu1 }
 0x230   : > { %v4242_v59 = vpop.f32.mrb[128].mxu0  ;;  %v5922_v55 = vadd.f32 %v4527_v11, %v4424_v53  ;;  %v2892_v52 = vpop.f32.mrb[5].mxu1 }
 0x231   : > { %v4243_v58 = vpop.f32.mrb[129].mxu0  ;;  %v5924_v54 = vadd.f32 %v4530_v13, %v2892_v52  ;;  %v3149_v37 = vadd.f32 %v5906_v44, %v3148_v18  ;;  %v4425_v6 = vpop.f32.mrb[6].mxu1 }
 0x232   : > { %v4244_v0 = vadd.f32 %v4243_v58, %v4242_v59  ;;  %v4245_v60 = vpop.f32.mrb[130].mxu0  ;;  %v5927_v43 = vadd.f32 %v4533_v33, %v4425_v6  ;;  %v2895_v20 = vpop.f32.mrb[7].mxu1 }
 0x233   : > { %v4246_v19 = vpop.f32.mrb[131].mxu0  ;;  %v3150_v1 = vadd.f32 %v5924_v54, %v3149_v37  ;;  %v5930_v46 = vadd.f32 %v4536_v62, %v2895_v20 }
 0x234   : > { %v4247_v28 = vadd.f32 %v4246_v19, %v4245_v60  ;;  %v3830_v15 = vpack.c.bf16 %v5927_v43, %v5922_v55  ;;  %v4542_v13 = vadd.f32 %v5725_v39, %v4244_v0 }
 0x235   : > { %v3825_v45 = vpack.c.bf16 %v5930_v46, %v5924_v54  ;;  %v3151_v12 = vadd.f32 %v5930_v46, %v3150_v1 }
 0x236   : > { %3877 = vst [vmem:[%s5818_s14 + $0x58] sm:$0xff] %v3830_v15   ;;  %v4548_v17 = vadd.f32 %v5727_v50, %v4247_v28 }
 0x237   : > { %3876 = vst [vmem:[%s5818_s14 + $0x50] sm:$0xff] %v3825_v45   ;;  %v3152_v63 = vadd.f32 %v5922_v55, %v3151_v12  ;;  %v4428_v34 = vpop.f32.mrb[8].mxu1 }
 0x238   : > { %v4248_v62 = vpop.f32.mrb[132].mxu0  ;;  %v2908_v57 = vpop.f32.mrb[9].mxu1 }
 0x239   : > { %v4249_v51 = vpop.f32.mrb[133].mxu0  ;;  %v5942_v23 = vadd.f32 %v4542_v13, %v2908_v57  ;;  %v3153_v39 = vadd.f32 %v5927_v43, %v3152_v63  ;;  %v4429_v7 = vpop.f32.mrb[10].mxu1 }
 0x23a   : > { %v4250_v61 = vadd.f32 %v4249_v51, %v4248_v62  ;;  %v4251_v30 = vpop.f32.mrb[134].mxu0  ;;  %v2911_v29 = vpop.f32.mrb[11].mxu1 }
 0x23b   : > { %v4252_v11 = vpop.f32.mrb[135].mxu0  ;;  %v3154_v9 = vadd.f32 %v5942_v23, %v3153_v39  ;;  %v5946_v50 = vadd.f32 %v4548_v17, %v2911_v29 }
 0x23c   : > { %v4253_v24 = vadd.f32 %v4252_v11, %v4251_v30  ;;  %v4539_v33 = vadd.f32 %v5735_v32, %v4250_v61 }
 0x23d   : > { %v3835_v18 = vpack.c.bf16 %v5946_v50, %v5942_v23  ;;  %v3155_v53 = vadd.f32 %v5946_v50, %v3154_v9 }
 0x23e   : > { %v4540_v59 = vadd.f32 %v4539_v33, %v4428_v34  ;;  %v4545_v52 = vadd.f32 %v5744_v4, %v4253_v24 }
 0x23f   : > { %3878 = vst [vmem:[%s5818_s14 + $0x60] sm:$0xff] %v3835_v18   ;;  %v4432_v58 = vpop.f32.mrb[12].mxu1 }
 0x240   : > { %v4546_v37 = vadd.f32 %v4545_v52, %v4429_v7  ;;  %v3156_v6 = vadd.f32 %v4540_v59, %v3155_v53  ;;  %v4254_v0 = vpop.f32.mrb[136].mxu0  ;;  %v2924_v60 = vpop.f32.mrb[13].mxu1 }
 0x241   : > { %v4255_v20 = vpop.f32.mrb[137].mxu0  ;;  %v4433_v19 = vpop.f32.mrb[14].mxu1 }
 0x242   : > { %v3840_v1 = vpack.c.bf16 %v4546_v37, %v4540_v59  ;;  %v4256_v28 = vadd.f32 %v4255_v20, %v4254_v0  ;;  %v4257_v32 = vpop.f32.mrb[138].mxu0  ;;  %v3157_v15 = vadd.f32 %v4546_v37, %v3156_v6  ;;  %v2927_v13 = vpop.f32.mrb[15].mxu1 }
 0x243   : > { %v4258_v45 = vpop.f32.mrb[139].mxu0 }
 0x244   : > { %3879 = vst [vmem:[%s5818_s14 + $0x68] sm:$0xff] %v3840_v1   ;;  %v4259_v12 = vadd.f32 %v4258_v45, %v4257_v32  ;;  %v4554_v17 = vadd.f32 %v5753_v38, %v4256_v28 }
 0x246   : > { %v4555_v4 = vadd.f32 %v4554_v17, %v2924_v60  ;;  %v4560_v63 = vadd.f32 %v5760_v5, %v4259_v12 }
 0x248   : > { %v3158_v34 = vadd.f32 %v4555_v4, %v3157_v15  ;;  %v4561_v62 = vadd.f32 %v4560_v63, %v2927_v13  ;;  %v4260_v57 = vpop.f32.mrb[140].mxu0 }
 0x249   : > { %v4261_v51 = vpop.f32.mrb[141].mxu0 }
 0x24a   : > { %v3845_v39 = vpack.c.bf16 %v4561_v62, %v4555_v4  ;;  %v3159_v7 = vadd.f32 %v4561_v62, %v3158_v34  ;;  %v4262_v61 = vadd.f32 %v4261_v51, %v4260_v57  ;;  %v4263_v30 = vpop.f32.mrb[142].mxu0 }
 0x24b   : > { %v4264_v29 = vpop.f32.mrb[143].mxu0 }
 0x24c   : > { %3880 = vst [vmem:[%s5818_s14 + $0x70] sm:$0xff] %v3845_v39   ;;  %v4551_v11 = vadd.f32 %v5769_v16, %v4262_v61  ;;  %v4265_v9 = vadd.f32 %v4264_v29, %v4263_v30 }
 0x24e   : > { %v4552_v24 = vadd.f32 %v4551_v11, %v4432_v58  ;;  %v4557_v38 = vadd.f32 %v5774_v2, %v4265_v9 }
 0x250   : > { %v3160_v33 = vadd.f32 %v4552_v24, %v3159_v7  ;;  %v4558_v5 = vadd.f32 %v4557_v38, %v4433_v19 }
 0x252   : > { %v3850_v18 = vpack.c.bf16 %v4558_v5, %v4552_v24  ;;  %v3161_v53 = vadd.f32 %v4558_v5, %v3160_v33 }
 0x254   : > { %3881 = vst [vmem:[%s5818_s14 + $0x78] sm:$0xff] %v3850_v18   ;;  %v3162_v52 = vrot.slane %v3161_v53, 4 }
 0x256   : > { %v3163_v6 = vadd.f32 %v3162_v52, %v3161_v53 }
 0x258   : > { %v3164_v0 = vrot.slane %v3163_v6, 2 }
 0x25a   : > { %v3165_v60 = vadd.f32 %v3164_v0, %v3163_v6 }
 0x25c   : > { %v3166_v20 = vrot.slane %v3165_v60, 1 }
 0x25e   : > { %v3167_v1 = vadd.f32 %v3166_v20, %v3165_v60 }
 0x260   : > { %v3168_v16 = vmul.f32 0.00390625, %v3167_v1 }
 0x262   : > { %3169 = vst [vmem:[%s265_s16] sm:$0x1] %v3168_v16  ;;  %v3183_v58 = vsub.f32 %v5889_v22, %v3168_v16  ;;  %v3186_v2 = vsub.f32 %v5903_v31, %v3168_v16  ;;  %v3187_v19 = vsub.f32 %v5910_v25, %v3168_v16  ;;  %v5969_v28 = vsub.f32 %v5901_v21, %v3168_v16 }
 0x263   : > { %v5972_v32 = vsub.f32 %v5906_v44, %v3168_v16  ;;  %v5975_v15 = vsub.f32 %v5924_v54, %v3168_v16  ;;  %v5978_v13 = vsub.f32 %v5930_v46, %v3168_v16  ;;  %v5981_v45 = vsub.f32 %v5922_v55, %v3168_v16 }
 0x264   : > { %v5984_v22 = vsub.f32 %v5927_v43, %v3168_v16  ;;  %v5987_v31 = vsub.f32 %v5942_v23, %v3168_v16  ;;  %v5990_v21 = vsub.f32 %v5946_v50, %v3168_v16  ;;  %v5992_v44 = vsub.f32 %v4540_v59, %v3168_v16 }
 0x265   : > { %v5994_v25 = vsub.f32 %v4546_v37, %v3168_v16  ;;  %v5996_v54 = vsub.f32 %v4555_v4, %v3168_v16  ;;  %v5998_v46 = vsub.f32 %v4561_v62, %v3168_v16  ;;  %v6000_v12 = vsub.f32 %v4552_v24, %v3168_v16 }
 0x266   : > { %v6002_v55 = vsub.f32 %v4558_v5, %v3168_v16  ;;  %v3170_v43 = vsub.f32 %v5809_v56, %v3168_v16  ;;  %v3171_v23 = vsub.f32 %v5820_v41, %v3168_v16  ;;  %v3172_v17 = vsub.f32 %v5807_v49, %v3168_v16 }
 0x267   : > { %v3173_v59 = vsub.f32 %v5811_v42, %v3168_v16  ;;  %v3174_v37 = vsub.f32 %v5835_v14, %v3168_v16  ;;  %v3175_v62 = vsub.f32 %v5842_v10, %v3168_v16  ;;  %v3176_v39 = vsub.f32 %v5833_v26, %v3168_v16 }
 0x268   : > { %v3202_v50 = vmul.f32 %v3170_v43, %v3170_v43  ;;  %v3203_v63 = vmul.f32 %v3171_v23, %v3171_v23  ;;  %v3204_v4 = vmul.f32 %v3172_v17, %v3172_v17  ;;  %v3177_v41 = vsub.f32 %v5838_v35, %v3168_v16 }
 0x269   : > { %v3205_v57 = vmul.f32 %v3173_v59, %v3173_v59  ;;  %v3206_v7 = vmul.f32 %v3174_v37, %v3174_v37  ;;  %v3207_v61 = vmul.f32 %v3175_v62, %v3175_v62  ;;  %v3178_v30 = vsub.f32 %v5859_v40, %v3168_v16 }
 0x26a   : > { %v3234_v34 = vadd.f32 %v3203_v63, %v3202_v50  ;;  %v3208_v29 = vmul.f32 %v3176_v39, %v3176_v39  ;;  %v3179_v14 = vsub.f32 %v5867_v27, %v3168_v16  ;;  %v3209_v11 = vmul.f32 %v3177_v41, %v3177_v41 }
 0x26b   : > { %v3180_v10 = vsub.f32 %v5856_v47, %v3168_v16  ;;  %v3210_v24 = vmul.f32 %v3178_v30, %v3178_v30  ;;  %v3181_v26 = vsub.f32 %v5863_v48, %v3168_v16  ;;  %v3182_v35 = vsub.f32 %v5882_v36, %v3168_v16 }
 0x26c   : > { %v3235_v51 = vadd.f32 %v3234_v34, %v3204_v4  ;;  %v3211_v33 = vmul.f32 %v3179_v14, %v3179_v14  ;;  %v3184_v6 = vsub.f32 %v5879_v3, %v3168_v16  ;;  %v3185_v60 = vsub.f32 %v5885_v8, %v3168_v16 }
 0x26d   : > { %v3212_v18 = vmul.f32 %v3180_v10, %v3180_v10  ;;  %v3213_v52 = vmul.f32 %v3181_v26, %v3181_v26  ;;  %v3214_v0 = vmul.f32 %v3182_v35, %v3182_v35  ;;  %v3215_v20 = vmul.f32 %v3183_v58, %v3183_v58 }
 0x26e   : > { %v3236_v56 = vadd.f32 %v3235_v51, %v3205_v57  ;;  %v3216_v1 = vmul.f32 %v3184_v6, %v3184_v6  ;;  %v3217_v23 = vmul.f32 %v3185_v60, %v3185_v60  ;;  %v3218_v17 = vmul.f32 %v3186_v2, %v3186_v2 }
 0x26f   : > { %v3219_v63 = vmul.f32 %v3187_v19, %v3187_v19  ;;  %v3220_v59 = vmul.f32 %v5969_v28, %v5969_v28  ;;  %v3221_v3 = vmul.f32 %v5972_v32, %v5972_v32  ;;  %v3222_v8 = vmul.f32 %v5975_v15, %v5975_v15 }
 0x270   : > { %v3237_v49 = vadd.f32 %v3236_v56, %v3206_v7  ;;  %v3223_v58 = vmul.f32 %v5978_v13, %v5978_v13  ;;  %v3224_v2 = vmul.f32 %v5981_v45, %v5981_v45  ;;  %v3225_v28 = vmul.f32 %v5984_v22, %v5984_v22 }
 0x271   : > { %v3226_v32 = vmul.f32 %v5987_v31, %v5987_v31  ;;  %v3227_v15 = vmul.f32 %v5990_v21, %v5990_v21  ;;  %v3228_v13 = vmul.f32 %v5992_v44, %v5992_v44  ;;  %v3229_v45 = vmul.f32 %v5994_v25, %v5994_v25 }
 0x272   : > { %v3238_v42 = vadd.f32 %v3237_v49, %v3207_v61  ;;  %v3230_v22 = vmul.f32 %v5996_v54, %v5996_v54  ;;  %v3231_v31 = vmul.f32 %v5998_v46, %v5998_v46  ;;  %v3232_v21 = vmul.f32 %v6000_v12, %v6000_v12 }
 0x273   : > { %v3233_v44 = vmul.f32 %v6002_v55, %v6002_v55 }
 0x274   : > { %v3239_v9 = vadd.f32 %v3238_v42, %v3208_v29 }
 0x276   : > { %v3240_v38 = vadd.f32 %v3239_v9, %v3209_v11 }
 0x278   : > { %v3241_v5 = vadd.f32 %v3240_v38, %v3210_v24 }
 0x27a   : > { %v3242_v53 = vadd.f32 %v3241_v5, %v3211_v33 }
 0x27c   : > { %v3243_v40 = vadd.f32 %v3242_v53, %v3212_v18 }
 0x27e   : > { %v3244_v27 = vadd.f32 %v3243_v40, %v3213_v52 }
 0x280   : > { %v3245_v47 = vadd.f32 %v3244_v27, %v3214_v0 }
 0x282   : > { %v3246_v43 = vadd.f32 %v3245_v47, %v3215_v20 }
 0x284   : > { %v3247_v48 = vadd.f32 %v3246_v43, %v3216_v1 }
 0x286   : > { %v3248_v50 = vadd.f32 %v3247_v48, %v3217_v23 }
 0x288   : > { %v3249_v36 = vadd.f32 %v3248_v50, %v3218_v17 }
 0x28a   : > { %v3250_v37 = vadd.f32 %v3249_v36, %v3219_v63 }
 0x28c   : > { %v3251_v4 = vadd.f32 %v3250_v37, %v3220_v59 }
 0x28e   : > { %v3252_v16 = vadd.f32 %v3251_v4, %v3221_v3 }
 0x290   : > { %v3253_v34 = vadd.f32 %v3252_v16, %v3222_v8 }
 0x292   : > { %v3254_v19 = vadd.f32 %v3253_v34, %v3223_v58 }
 0x294   : > { %v3255_v62 = vadd.f32 %v3254_v19, %v3224_v2 }
 0x296   : > { %v3256_v57 = vadd.f32 %v3255_v62, %v3225_v28 }
 0x298   : > { %v3257_v51 = vadd.f32 %v3256_v57, %v3226_v32 }
 0x29a   : > { %v3258_v39 = vadd.f32 %v3257_v51, %v3227_v15 }
 0x29c   : > { %v3259_v7 = vadd.f32 %v3258_v39, %v3228_v13 }
 0x29e   : > { %v3260_v56 = vadd.f32 %v3259_v7, %v3229_v45 }
 0x2a0   : > { %v3261_v41 = vadd.f32 %v3260_v56, %v3230_v22 }
 0x2a2   : > { %v3262_v61 = vadd.f32 %v3261_v41, %v3231_v31 }
 0x2a4   : > { %v3263_v49 = vadd.f32 %v3262_v61, %v3232_v21 }
 0x2a6   : > { %v3264_v30 = vadd.f32 %v3263_v49, %v3233_v44 }
 0x2a8   : > { %v3265_v25 = vrot.slane %v3264_v30, 4 }
 0x2aa   : > { %v3266_v29 = vadd.f32 %v3265_v25, %v3264_v30 }
 0x2ac   : > { %v3267_v42 = vrot.slane %v3266_v29, 2 }
 0x2ae   : > { %v3268_v14 = vadd.f32 %v3267_v42, %v3266_v29 }
 0x2b0   : > { %v3269_v11 = vrot.slane %v3268_v14, 1 }
 0x2b2   : > { %v3270_v54 = vadd.f32 %v3269_v11, %v3268_v14 }
 0x2b4   : > { %3271 = vst [vmem:[%s268_s20] sm:$0x1] %v3270_v54 }
 0x2b5 PF: > { %s17_s21 = sadd.s32 1, %s4751_s21  }
 0x2b6   : > { %p14_p4 = scmp.ge.s32.totalorder %s17_s21, 4  }
 0x2b8   :  { %16 = sbr.rel (!%p14_p4) target bundleno = 1 (0x1), region = 94 }

// kernel: basic_block_forward.3
= control target key start
LH: loop header
LB: loop body
LE: loop exit
PB: predicated region body
PF: predicated region fallthrough
CT: control target
= control target key end

     0   :  { %s5219_s24 = smov 0   ;;  %s6790_s0 = inlined_call_operand.vmem [shape: bf16[2,16,16,128], index: 0, kind: input, shape index: {}]   ;;  %s6791_s1 = inlined_call_operand.vmem [shape: bf16[3,384,128], index: 1, kind: input, shape index: {}]   ;;  %s6792_s2 = inlined_call_operand.vmem [shape: bf16[128,128], index: 2, kind: input, shape index: {}]   ;;  %s6793_s3 = inlined_call_operand.vmem [shape: bf16[2,16,16,128], index: 3, kind: output, shape index: {0}]   ;;  %s6794_s4 = inlined_call_operand.vmem [shape: f32[2,1,128], index: 4, kind: output, shape index: {1}]   ;;  %s6795_s5 = inlined_call_operand.vmem [shape: f32[2,1,128], index: 5, kind: output, shape index: {2}]   ;;  %s6796_s6 = inlined_call_operand.vmem [shape: f32[2,1,128], index: 6, kind: output, shape index: {3}]   ;;  %s6797_s7 = inlined_call_operand.vmem [shape: f32[2,1,128], index: 7, kind: output, shape index: {4}]  }
   0x1 LB: > { %s3774_s25 = sadd.s32 4294967295, %s5176_s24   ;;  %p3778_p0 = scmp.ge.s32.totalorder %s5176_s24, 1  ;;  %s5176_s24 = sphi %s5219_s24, %s18_s24  }
   0x2   : > { %p246_p1 = scmp.lt.s32.totalorder %s5176_s24, 3 }
   0x4   : > { %p247_p2 = pnand %p3778_p0, %p246_p1 }
   0x6   : > { %250 = sbr.rel (%p247_p2) target bundleno = 693 (0x2b5), region = 32 }
   0xd   : > { %v5015_v0 = vld [vmem:[%s6791_s1 + $0x140] sm:$0xff]   ;;  %v5018_v3 = vld [vmem:[%s6791_s1 + $0x148] sm:$0xff]   ;;  %v5021_v6 = vld [vmem:[%s6791_s1 + $0x150] sm:$0xff]   ;;  %v5178_v7 = vmov 0   ;;  %p290_p3 = scmp.lt.s32.totalorder %s3774_s25, 1  ;;  %vm576_vm0 = vcmask 1040384  }
   0xe   : > { %v5016_v1 = vld [vmem:[%s6791_s1 + $0x100] sm:$0xff]   ;;  %4654 = vmatprep.subr.bf16.mxu1 %v5015_v0  ;;  %v5019_v4 = vld [vmem:[%s6791_s1 + $0x108] sm:$0xff]   ;;  %345 = vst [vmem:[#allocation2] sm:$0xf] %v5178_v7  ;;  %346 = vst [vmem:[#allocation2 + $0x4] sm:$0xf] %v5178_v7 }
   0xf   : > { %v5017_v2 = vld [vmem:[%s6791_s1 + $0xc0] sm:$0xff]   ;;  %4222 = vmatprep.subr.bf16.mxu0 %v5016_v1  ;;  %4655 = vmatpush3.bf16.msra.mxu1 %v5015_v0  ;;  %v5020_v5 = vld [vmem:[%s6791_s1 + $0xc8] sm:$0xff]   ;;  %347 = vst [vmem:[#allocation2 + $0x8] sm:$0x1] %v5178_v7  ;;  %349 = vst [vmem:[#allocation2 + $0xcc] sm:$0xf] %v5178_v7 }
  0x10   : > { %4223 = vmatpush3.bf16.msra.mxu0 %v5017_v2  ;;  %4656 = vmatprep.subr.bf16.mxu1 %v5018_v3  ;;  %350 = vst [vmem:[#allocation2 + $0xd0] sm:$0xf] %v5178_v7  ;;  %351 = vst [vmem:[#allocation2 + $0xd4] sm:$0x1] %v5178_v7  ;;  %v5022_v8 = vld [vmem:[%s6791_s1 + $0x110] sm:$0xff]   ;;  %v5024_v10 = vld [vmem:[%s6791_s1 + $0x158] sm:$0xff]  }
  0x11   : > { %4224 = vmatprep.subr.bf16.mxu0 %v5019_v4  ;;  %v5023_v9 = vld [vmem:[%s6791_s1 + $0xd0] sm:$0xff]   ;;  %v5025_v11 = vld [vmem:[%s6791_s1 + $0x118] sm:$0xff]   ;;  %v5027_v13 = vld [vmem:[%s6791_s1 + $0x160] sm:$0xff]   ;;  %s6871_s25 = smov (!%p290_p3, %s3774_s25), 1  ;;  %vm577_vm1 = vsmask.f32 256 }
  0x12   : > { %v5026_v12 = vld [vmem:[%s6791_s1 + $0xd8] sm:$0xff]   ;;  %v5028_v14 = vld [vmem:[%s6791_s1 + $0x120] sm:$0xff]   ;;  %v5030_v16 = vld [vmem:[%s6791_s1 + $0x168] sm:$0xff]   ;;  %s4093_s16 = sshll.u32 %s6871_s25, 7  ;;  %vm1243_vm3 = vcmask 1046528   ;;  %s308_s14 = scalar_lea.vmem %s6796_s6, %s6871_s25 }
  0x13   : > { %4657 = vmatpush3.bf16.msra.mxu1 %v5018_v3  ;;  %v5029_v15 = vld [vmem:[%s6791_s1 + $0xe0] sm:$0xff]   ;;  %v5031_v17 = vld [vmem:[%s6791_s1 + $0x128] sm:$0xff]   ;;  %v5033_v19 = vld [vmem:[%s6791_s1 + $0x170] sm:$0xff]   ;;  %s5299_s27 = scalar_lea.vmem %s6790_s0, %s4093_s16  ;;  %vm1034_vm4 = vsmask.f32 7424  ;;  %s6252_s12 = scalar_lea.vmem %s6793_s3, %s4093_s16 }
  0x14   : > { %4225 = vmatpush3.bf16.msra.mxu0 %v5020_v5  ;;  %4658 = vmatprep.subr.bf16.mxu1 %v5021_v6  ;;  %v5032_v18 = vld [vmem:[%s6791_s1 + $0xe8] sm:$0xff]   ;;  %v5034_v20 = vld [vmem:[%s6791_s1 + $0x130] sm:$0xff]   ;;  %v5036_v22 = vld [vmem:[%s6791_s1 + $0x178] sm:$0xff]   ;;  %s302_s18 = scalar_lea.vmem %s6794_s4, %s6871_s25  ;;  %s305_s21 = scalar_lea.vmem %s6795_s5, %s6871_s25 }
  0x15   : > { %4226 = vmatprep.subr.bf16.mxu0 %v5022_v8  ;;  %v5035_v21 = vld [vmem:[%s6791_s1 + $0xf0] sm:$0xff]   ;;  %v5039_v23 = vld [vmem:[%s5299_s27] sm:$0xff]   ;;  %v5037_v24 = vld [vmem:[%s6791_s1 + $0x138] sm:$0xff]   ;;  %s311_s26 = scalar_lea.vmem %s6797_s7, %s6871_s25 }
  0x16   : > { %v433_v25 = vshrl.u32 %v5039_v23, 16  ;;  %v436_v26 = vshll.u32 %v5039_v23, 16  ;;  %v5042_v27 = vld [vmem:[%s5299_s27 + $0x8] sm:$0xff]   ;;  %v5038_v28 = vld [vmem:[%s6791_s1 + $0xf8] sm:$0xff]   ;;  %vm5315_vm2 = vmand %vm576_vm0, %vm577_vm1 }
  0x17   : > { %4659 = vmatpush3.bf16.msra.mxu1 %v5021_v6  ;;  %v440_v31 = vshrl.u32 %v5042_v27, 16  ;;  %v443_v32 = vshll.u32 %v5042_v27, 16  ;;  %v5045_v33 = vld [vmem:[%s6791_s1 + $0x40] sm:$0xff]   ;;  %v5049_v42 = vld [vmem:[%s5299_s27 + $0x10] sm:$0xff]   ;;  %v5052_v43 = vld [vmem:[%s5299_s27 + $0x18] sm:$0xff]  }
  0x18   : > { %4227 = vmatpush3.bf16.msra.mxu0 %v5023_v9  ;;  %4660 = vmatprep.subr.bf16.mxu1 %v5024_v10  ;;  %v435_v29 = vrot.slane %v433_v25, 7  ;;  %v5047_v37 = vld [vmem:[%s6791_s1 + $0x1c0] sm:$0xff]   ;;  %v447_v48 = vshrl.u32 %v5049_v42, 16  ;;  %v450_v49 = vshll.u32 %v5049_v42, 16  ;;  %v454_v50 = vshrl.u32 %v5052_v43, 16  ;;  %v5055_v27 = vld [vmem:[%s6791_s1 + $0x48] sm:$0xff]  }
  0x19   : > { %4228 = vmatprep.subr.bf16.mxu0 %v5025_v11  ;;  %v442_v36 = vrot.slane %v440_v31, 7  ;;  %v457_v53 = vshll.u32 %v5052_v43, 16  ;;  %v5057_v54 = vld [vmem:[%s5299_s27 + $0x20] sm:$0xff]  }
  0x1a   : > { %v438_v34 = vor.u32 %v436_v26, %v435_v29  ;;  %v595_v35 = vsel %vm5315_vm2, %v435_v29, 0  ;;  %v449_v55 = vrot.slane %v447_v48, 7  ;;  %v456_v56 = vrot.slane %v454_v50, 7  ;;  %v5065_v48 = vld [vmem:[%s6791_s1 + $0x1c8] sm:$0xff]   ;;  %v5658_v30 = vld [vmem:[%s6791_s1 + $0x80] sm:$0xff]  }
  0x1b   : > { %4661 = vmatpush3.bf16.msra.mxu1 %v5024_v10  ;;  %v3801_v38 = vcombine.low %v595_v35, %v595_v35  ;;  %v445_v40 = vor.u32 %v443_v32, %v442_v36  ;;  %v596_v41 = vsel %vm5315_vm2, %v442_v36, 0  ;;  %v461_v57 = vshrl.u32 %v5057_v54, 16 }
  0x1c   : > { %4229 = vmatpush3.bf16.msra.mxu0 %v5026_v12  ;;  %4662 = vmatprep.subr.bf16.mxu1 %v5027_v13  ;;  %v579_v39 = vsel %vm5315_vm2, 0, %v438_v34  ;;  %v3804_v46 = vcombine.low %v596_v41, %v596_v41  ;;  %v464_v58 = vshll.u32 %v5057_v54, 16  ;;  %v452_v59 = vor.u32 %v450_v49, %v449_v55  ;;  %v5060_v34 = vld [vmem:[%s5299_s27 + $0x28] sm:$0xff]   ;;  %v5067_v41 = vld [vmem:[%s5299_s27 + $0x30] sm:$0xff]  }
  0x1d   : > { %4230 = vmatprep.subr.bf16.mxu0 %v5028_v14  ;;  %v3799_v44 = vcombine.low %v579_v39, %v579_v39  ;;  %v3800_v45 = vcombine.high %v579_v39, %v579_v39  ;;  %790 = vst [vmem:[#allocation2 + $0x14] sm:$0x1] %v3801_v38  ;;  %v580_v47 = vsel %vm5315_vm2, 0, %v445_v40  ;;  %v597_v60 = vsel %vm5315_vm2, %v449_v55, 0  ;;  %v5056_v38 = vld [vmem:[%s6791_s1 + $0x8] sm:$0xff]  }
  0x1e   : > { %v3802_v51 = vcombine.low %v580_v47, %v580_v47  ;;  %v3803_v52 = vcombine.high %v580_v47, %v580_v47  ;;  %793 = vst [vmem:[#allocation2 + $0x20] sm:$0x1] %v3804_v46  ;;  %v459_v61 = vor.u32 %v457_v53, %v456_v56  ;;  %v598_v62 = vsel %vm5315_vm2, %v456_v56, 0 }
  0x1f   : > { %4663 = vmatpush3.bf16.msra.mxu1 %v5027_v13  ;;  %788 = vst [vmem:[#allocation2 + $0xc] sm:$0xf] %v3799_v44  ;;  %789 = vst [vmem:[#allocation2 + $0x10] sm:$0xf] %v3800_v45  ;;  %v3807_v63 = vcombine.low %v597_v60, %v597_v60  ;;  %v3810_v0 = vcombine.low %v598_v62, %v598_v62  ;;  %v463_v1 = vrot.slane %v461_v57, 7  ;;  %v581_v3 = vsel %vm5315_vm2, 0, %v452_v59 }
  0x20   : > { %4231 = vmatpush3.bf16.msra.mxu0 %v5029_v15  ;;  %4664 = vmatprep.subr.bf16.mxu1 %v5030_v16  ;;  %791 = vst [vmem:[#allocation2 + $0x18] sm:$0xf] %v3802_v51  ;;  %792 = vst [vmem:[#allocation2 + $0x1c] sm:$0xf] %v3803_v52  ;;  %v3805_v4 = vcombine.low %v581_v3, %v581_v3  ;;  %v3806_v5 = vcombine.high %v581_v3, %v581_v3  ;;  %v582_v6 = vsel %vm5315_vm2, 0, %v459_v61  ;;  %v5063_v44 = vld [vmem:[%s6791_s1 + $0x50] sm:$0xff]  }
  0x21   : > { %4232 = vmatprep.subr.bf16.mxu0 %v5031_v17  ;;  %796 = vst [vmem:[#allocation2 + $0x2c] sm:$0x1] %v3807_v63  ;;  %799 = vst [vmem:[#allocation2 + $0x38] sm:$0x1] %v3810_v0  ;;  %v466_v7 = vor.u32 %v464_v58, %v463_v1  ;;  %v3808_v10 = vcombine.low %v582_v6, %v582_v6  ;;  %v3809_v11 = vcombine.high %v582_v6, %v582_v6  ;;  %v5066_v60 = vld [vmem:[%s6791_s1 + $0x188] sm:$0xff]   ;;  %v5064_v0 = vld [vmem:[%s6791_s1 + $0x10] sm:$0xff]  }
  0x22   : > { %794 = vst [vmem:[#allocation2 + $0x24] sm:$0xf] %v3805_v4  ;;  %795 = vst [vmem:[#allocation2 + $0x28] sm:$0xf] %v3806_v5  ;;  %v599_v32 = vsel %vm5315_vm2, %v463_v1, 0  ;;  %v468_v58 = vshrl.u32 %v5060_v34, 16 }
  0x23   : > { %4665 = vmatpush3.bf16.msra.mxu1 %v5030_v16  ;;  %797 = vst [vmem:[#allocation2 + $0x30] sm:$0xf] %v3808_v10  ;;  %798 = vst [vmem:[#allocation2 + $0x34] sm:$0xf] %v3809_v11  ;;  %v3813_v40 = vcombine.low %v599_v32, %v599_v32  ;;  %v471_v59 = vshll.u32 %v5060_v34, 16  ;;  %v475_v1 = vshrl.u32 %v5067_v41, 16 }
  0x24   : > { %4233 = vmatpush3.bf16.msra.mxu0 %v5032_v18  ;;  %4666 = vmatprep.subr.bf16.mxu1 %v5033_v19  ;;  %v5041_v2 = vld [vmem:[#allocation2 + $0x14] ss:$0 sps:$4 sm:$0x11]   ;;  %v5046_v18 = vld [vmem:[%s6791_s1] sm:$0xff]   ;;  %v470_v3 = vrot.slane %v468_v58, 7  ;;  %v478_v4 = vshll.u32 %v5067_v41, 16 }
  0x25   : > { %4234 = vmatprep.subr.bf16.mxu0 %v5034_v20  ;;  %v1248_v9 = vrot.slane %v5041_v2, 1  ;;  %v1055_v12 = vshll.u32 %v5041_v2, 16  ;;  %v5044_v13 = vld [vmem:[#allocation2 + $0x20] ss:$0 sps:$4 sm:$0x11]   ;;  %v5073_v6 = vld [vmem:[%s6791_s1 + $0x58] sm:$0xff]  }
  0x26   : > { %v5040_v8 = vld [vmem:[#allocation2 + $0xc] sm:$0xff]   ;;  %v1251_v20 = vrot.slane %v5044_v13, 1  ;;  %802 = vst [vmem:[#allocation2 + $0x44] sm:$0x1] %v3813_v40  ;;  %v5070_v11 = vld [vmem:[%s5299_s27 + $0x38] sm:$0xff]   ;;  %v5082_v40 = vld [vmem:[%s6791_s1 + $0x20] sm:$0xff]  }
  0x27   : > { %4667 = vmatpush3.bf16.msra.mxu1 %v5033_v19  ;;  %v1247_v14 = vrot.slane %v5040_v8, 1  ;;  %v1048_v15 = vshrl.u32 %v5040_v8, 16  ;;  %v1050_v16 = vshll.u32 %v5040_v8, 16  ;;  %v5344_v17 = vld [vmem:[#allocation2 + $0x18] sm:$0xff]   ;;  %v1057_v19 = vrot.slane %v1055_v12, 1 }
  0x28   : > { %4235 = vmatpush3.bf16.msra.mxu0 %v5035_v21  ;;  %4668 = vmatprep.subr.bf16.mxu1 %v5036_v22  ;;  %v1067_v21 = vshll.u32 %v5044_v13, 16  ;;  %v1250_v25 = vrot.slane %v5344_v17, 1  ;;  %v1060_v26 = vshrl.u32 %v5344_v17, 16  ;;  %v1062_v29 = vshll.u32 %v5344_v17, 16  ;;  %v5074_v12 = vld [vmem:[%s6791_s1 + $0x18] sm:$0xff]   ;;  %v5075_v13 = vld [vmem:[%s5299_s27 + $0x40] sm:$0xff]  }
  0x29   : > { %4236 = vmatprep.subr.bf16.mxu0 %v5037_v24  ;;  %v5352_v23 = vsel %vm1243_vm3, %v1247_v14, %v1248_v9  ;;  %v1052_v24 = vrot.slane %v1050_v16, 1  ;;  %v5375_v43 = vld [vmem:[#allocation2 + $0x38] ss:$0 sps:$4 sm:$0x11]   ;;  %v5383_v46 = vld [vmem:[#allocation2 + $0x24] sm:$0xff]   ;;  %v600_v16 = vsel %vm5315_vm2, %v470_v3, 0 }
  0x2a   : > { %4670 = vmatprep.mubr.bf16.mxu1 %v5352_v23  ;;  %v1069_v31 = vrot.slane %v1067_v21, 1  ;;  %v5368_v36 = vsel %vm1243_vm3, %v1250_v25, %v1251_v20  ;;  %v1064_v42 = vrot.slane %v1062_v29, 1  ;;  %v5389_v50 = vld [vmem:[#allocation2 + $0x30] sm:$0xff]   ;;  %v1257_v51 = vrot.slane %v5375_v43, 1  ;;  %v5081_v29 = vld [vmem:[%s6791_s1 + $0x60] sm:$0xff]  }
  0x2b   : > { %4669 = vmatpush3.bf16.msra.mxu1 %v5036_v22  ;;  %v583_v22 = vsel %vm5315_vm2, 0, %v466_v7  ;;  %v1053_v35 = vor.u32 %v1052_v24, %v1048_v15  ;;  %v1253_v52 = vrot.slane %v5383_v46, 1  ;;  %v1072_v53 = vshrl.u32 %v5383_v46, 16  ;;  %v5435_v24 = vld [vmem:[%s5299_s27 + $0x48] sm:$0xff]  }
  0x2c   : > { %4237 = vmatpush3.bf16.msra.mxu0 %v5038_v28  ;;  %4358 = vmatprep.subr.bf16.mxu1 %v5045_v33  ;;  %v5048_v28 = vld [vmem:[%s6791_s1 + $0x180] sm:$0xff]   ;;  %v3811_v33 = vcombine.low %v583_v22, %v583_v22  ;;  %v3812_v39 = vcombine.high %v583_v22, %v583_v22  ;;  %v1065_v49 = vor.u32 %v1064_v42, %v1060_v26  ;;  %v1074_v54 = vshll.u32 %v5383_v46, 16 }
  0x2d   : > { %4494 = vmatprep.subr.bf16.mxu0 %v5047_v37  ;;  %v5051_v37 = vld [vmem:[#allocation2 + $0x2c] ss:$0 sps:$4 sm:$0x11]   ;;  %v5381_v45 = vsel %vm1034_vm4, %v1053_v35, %v1057_v19  ;;  %v1256_v57 = vrot.slane %v5389_v50, 1  ;;  %v1084_v5 = vshrl.u32 %v5389_v50, 16  ;;  %v1086_v9 = vshll.u32 %v5389_v50, 16 }
  0x2e   : > { %4671 = vmatmul.mubr.bf16.vlgmr.msra.gmra.mrb[0].mxu1 %v5368_v36  ;;  %800 = vst [vmem:[#allocation2 + $0x3c] sm:$0xf] %v3811_v33  ;;  %v1254_v47 = vrot.slane %v5051_v37, 1  ;;  %801 = vst [vmem:[#allocation2 + $0x40] sm:$0xf] %v3812_v39  ;;  %1607 = vmatprep.mubr.bf16.mxu0 %v5381_v45  ;;  %v1079_v55 = vshll.u32 %v5051_v37, 16  ;;  %v5396_v56 = vsel %vm1034_vm4, %v1065_v49, %v1069_v31 }
  0x2f   : > { %4359 = vmatpush3.bf16.msra.mxu1 %v5046_v18  ;;  %1608 = vmatmul.mubr.bf16.vlgmr.msra.gmra.mrb[0].mxu0 %v5040_v8  ;;  %v1076_v62 = vrot.slane %v1074_v54, 1  ;;  %v5411_v2 = vsel %vm1243_vm3, %v1256_v57, %v1257_v51  ;;  %v477_v8 = vrot.slane %v475_v1, 7  ;;  %v1091_v10 = vshll.u32 %v5375_v43, 16  ;;  %v5059_v18 = vld [vmem:[#allocation2 + $0x44] ss:$0 sps:$4 sm:$0x11]  }
  0x30   : > { %4360 = vmatprep.subr.bf16.mxu1 %v5055_v27  ;;  %4495 = vmatpush3.bf16.msra.mxu0 %v5048_v28  ;;  %v5403_v61 = vsel %vm1243_vm3, %v1253_v52, %v1254_v47  ;;  %v1081_v63 = vrot.slane %v1079_v55, 1  ;;  %v473_v15 = vor.u32 %v471_v59, %v470_v3  ;;  %v3816_v20 = vcombine.low %v600_v16, %v600_v16  ;;  %v5084_v51 = vld [vmem:[%s6791_s1 + $0x190] sm:$0xff]  }
  0x31   : > { %1615 = vmatprep.mubr.bf16.mxu0 %v5396_v56  ;;  %4674 = vmatprep.mubr.bf16.mxu1 %v5403_v61  ;;  %v1077_v7 = vor.u32 %v1076_v62, %v1072_v53  ;;  %v480_v21 = vor.u32 %v478_v4, %v477_v8  ;;  %v601_v22 = vsel %vm5315_vm2, %v477_v8, 0  ;;  %v1088_v28 = vrot.slane %v1086_v9, 1 }
  0x32   : > { %4496 = vmatprep.subr.bf16.mxu0 %v5065_v48  ;;  %v584_v26 = vsel %vm5315_vm2, 0, %v473_v15  ;;  %v3819_v27 = vcombine.low %v601_v22, %v601_v22  ;;  %v1260_v31 = vrot.slane %v5059_v18, 1  ;;  %805 = vst [vmem:[#allocation2 + $0x50] sm:$0x1] %v3816_v20  ;;  %v1093_v39 = vrot.slane %v1091_v10, 1 }
  0x33   : > { %4361 = vmatpush3.bf16.msra.mxu1 %v5056_v38  ;;  %v5430_v19 = vsel %vm1034_vm4, %v1077_v7, %v1081_v63  ;;  %v3814_v32 = vcombine.low %v584_v26, %v584_v26  ;;  %v3815_v33 = vcombine.high %v584_v26, %v584_v26  ;;  %v585_v34 = vsel %vm5315_vm2, 0, %v480_v21  ;;  %v5085_v21 = vld [vmem:[%s5299_s27 + $0x50] sm:$0xff]  }
  0x34   : > { %4362 = vmatprep.subr.bf16.mxu1 %v5063_v44  ;;  %4497 = vmatpush3.bf16.msra.mxu0 %v5066_v60  ;;  %v3817_v35 = vcombine.low %v585_v34, %v585_v34  ;;  %v3818_v37 = vcombine.high %v585_v34, %v585_v34  ;;  %808 = vst [vmem:[#allocation2 + $0x5c] sm:$0x1] %v3819_v27  ;;  %v482_v41 = vshrl.u32 %v5070_v11, 16  ;;  %v485_v42 = vshll.u32 %v5070_v11, 16  ;;  %v5083_v44 = vld [vmem:[%s6791_s1 + $0x1d0] sm:$0xff]  }
  0x35   : > { %v5425_v14 = vld [vmem:[#allocation2 + $0x3c] sm:$0xff]   ;;  %v1089_v38 = vor.u32 %v1088_v28, %v1084_v5  ;;  %803 = vst [vmem:[#allocation2 + $0x48] sm:$0xf] %v3814_v32  ;;  %804 = vst [vmem:[#allocation2 + $0x4c] sm:$0xf] %v3815_v33  ;;  %v489_v43 = vshrl.u32 %v5075_v13, 16  ;;  %4498 = vmatprep.subr.bf16.mxu0 %v5083_v44 }
  0x36   : > { %4675 = vmatmul.mubr.bf16.gmra.mrb[4].mxu1 %v5411_v2  ;;  %v1259_v25 = vrot.slane %v5425_v14, 1  ;;  %806 = vst [vmem:[#allocation2 + $0x54] sm:$0xf] %v3817_v35  ;;  %807 = vst [vmem:[#allocation2 + $0x58] sm:$0xf] %v3818_v37  ;;  %v492_v47 = vshll.u32 %v5075_v13, 16 }
  0x37   : > { %4363 = vmatpush3.bf16.msra.mxu1 %v5064_v0  ;;  %1616 = vmatmul.mubr.bf16.gmra.mrb[4].mxu0 %v5344_v17  ;;  %v1096_v48 = vshrl.u32 %v5425_v14, 16  ;;  %v1098_v49 = vshll.u32 %v5425_v14, 16  ;;  %v484_v52 = vrot.slane %v482_v41, 7  ;;  %v491_v53 = vrot.slane %v489_v43, 7 }
  0x38   : > { %4364 = vmatprep.subr.bf16.mxu1 %v5073_v6  ;;  %1623 = vmatprep.mubr.bf16.mxu0 %v5430_v19  ;;  %v5451_v17 = vsel %vm1243_vm3, %v1259_v25, %v1260_v31  ;;  %v1103_v54 = vshll.u32 %v5059_v18, 16  ;;  %v496_v55 = vshrl.u32 %v5435_v24, 16  ;;  %v5464_v57 = vsel %vm1034_vm4, %v1089_v38, %v1093_v39 }
  0x39   : > { %4678 = vmatprep.mubr.bf16.mxu1 %v5451_v17  ;;  %v1100_v58 = vrot.slane %v1098_v49, 1  ;;  %v499_v59 = vshll.u32 %v5435_v24, 16  ;;  %4499 = vmatpush3.bf16.msra.mxu0 %v5084_v51  ;;  %v487_v60 = vor.u32 %v485_v42, %v484_v52  ;;  %v602_v62 = vsel %vm5315_vm2, %v484_v52, 0  ;;  %v5062_v1 = vld [vmem:[#allocation2 + $0x50] ss:$0 sps:$4 sm:$0x11]  }
  0x3a   : > { %v494_v63 = vor.u32 %v492_v47, %v491_v53  ;;  %v603_v0 = vsel %vm5315_vm2, %v491_v53, 0  ;;  %v3822_v3 = vcombine.low %v602_v62, %v602_v62  ;;  %v1105_v6 = vrot.slane %v1103_v54, 1 }
  0x3b   : > { %4365 = vmatpush3.bf16.msra.mxu1 %v5074_v12  ;;  %v3825_v4 = vcombine.low %v603_v0, %v603_v0  ;;  %v1101_v5 = vor.u32 %v1100_v58, %v1096_v48  ;;  %v5472_v7 = vld [vmem:[#allocation2 + $0x5c] ss:$0 sps:$4 sm:$0x11]   ;;  %v586_v8 = vsel %vm5315_vm2, 0, %v487_v60  ;;  %v1263_v10 = vrot.slane %v5062_v1, 1 }
  0x3c   : > { %4366 = vmatprep.subr.bf16.mxu1 %v5081_v29  ;;  %v5476_v9 = vld [vmem:[#allocation2 + $0x48] sm:$0xff]   ;;  %v3820_v11 = vcombine.low %v586_v8, %v586_v8  ;;  %v3821_v12 = vcombine.high %v586_v8, %v586_v8  ;;  %811 = vst [vmem:[#allocation2 + $0x68] sm:$0x1] %v3822_v3  ;;  %v1266_v15 = vrot.slane %v5472_v7, 1  ;;  %v587_v16 = vsel %vm5315_vm2, 0, %v494_v63 }
  0x3d   : > { %814 = vst [vmem:[#allocation2 + $0x74] sm:$0x1] %v3825_v4  ;;  %v5479_v13 = vld [vmem:[#allocation2 + $0x54] sm:$0xff]   ;;  %v5486_v18 = vsel %vm1034_vm4, %v1101_v5, %v1105_v6  ;;  %v498_v20 = vrot.slane %v496_v55, 7  ;;  %v3823_v24 = vcombine.low %v587_v16, %v587_v16  ;;  %v3824_v25 = vcombine.high %v587_v16, %v587_v16  ;;  %v5092_v3 = vld [vmem:[%s6791_s1 + $0x28] sm:$0xff]  }
  0x3e   : > { %809 = vst [vmem:[#allocation2 + $0x60] sm:$0xf] %v3820_v11  ;;  %810 = vst [vmem:[#allocation2 + $0x64] sm:$0xf] %v3821_v12  ;;  %v1265_v22 = vrot.slane %v5479_v13, 1  ;;  %v1108_v26 = vshrl.u32 %v5476_v9, 16 }
  0x3f   : > { %4367 = vmatpush3.bf16.msra.mxu1 %v5082_v40  ;;  %1624 = vmatmul.mubr.bf16.gmra.mrb[8].mxu0 %v5383_v46  ;;  %v1262_v46 = vrot.slane %v5476_v9, 1  ;;  %v501_v28 = vor.u32 %v499_v59, %v498_v20  ;;  %v604_v29 = vsel %vm5315_vm2, %v498_v20, 0  ;;  %v503_v31 = vshrl.u32 %v5085_v21, 16  ;;  %812 = vst [vmem:[#allocation2 + $0x6c] sm:$0xf] %v3823_v24  ;;  %v5088_v40 = vld [vmem:[%s5299_s27 + $0x58] sm:$0xff]  }
  0x40   : > { %1631 = vmatprep.mubr.bf16.mxu0 %v5464_v57  ;;  %v5498_v32 = vsel %vm1243_vm3, %v1265_v22, %v1266_v15  ;;  %813 = vst [vmem:[#allocation2 + $0x70] sm:$0xf] %v3824_v25  ;;  %v3828_v33 = vcombine.low %v604_v29, %v604_v29  ;;  %v506_v34 = vshll.u32 %v5085_v21, 16  ;;  %v1110_v35 = vshll.u32 %v5476_v9, 16 }
  0x41   : > { %v5492_v27 = vsel %vm1243_vm3, %v1262_v46, %v1263_v10  ;;  %v588_v37 = vsel %vm5315_vm2, 0, %v501_v28  ;;  %v505_v38 = vrot.slane %v503_v31, 7  ;;  %v1115_v39 = vshll.u32 %v5062_v1, 16  ;;  %v5091_v1 = vld [vmem:[%s6791_s1 + $0x68] sm:$0xff]   ;;  %v5093_v46 = vld [vmem:[%s5299_s27 + $0x60] sm:$0xff]  }
  0x42   : > { %4679 = vmatmul.mubr.bf16.gmra.mrb[8].mxu1 %v5492_v27  ;;  %v3826_v42 = vcombine.low %v588_v37, %v588_v37  ;;  %v3827_v43 = vcombine.high %v588_v37, %v588_v37  ;;  %817 = vst [vmem:[#allocation2 + $0x80] sm:$0x1] %v3828_v33  ;;  %v1112_v44 = vrot.slane %v1110_v35, 1  ;;  %v510_v59 = vshrl.u32 %v5088_v40, 16  ;;  %4368 = vmatprep.subr.bf16.mxu1 %v5091_v1 }
  0x43   : > { %4682 = vmatprep.mubr.bf16.mxu1 %v5498_v32  ;;  %v5505_v41 = vld [vmem:[#allocation2 + $0x68] ss:$0 sps:$4 sm:$0x11]   ;;  %v508_v48 = vor.u32 %v506_v34, %v505_v38  ;;  %v605_v49 = vsel %vm5315_vm2, %v505_v38, 0  ;;  %v1117_v58 = vrot.slane %v1115_v39, 1  ;;  %v513_v0 = vshll.u32 %v5088_v40, 16  ;;  %4369 = vmatpush3.bf16.msra.mxu1 %v5092_v3 }
  0x44   : > { %v5508_v47 = vld [vmem:[#allocation2 + $0x74] ss:$0 sps:$4 sm:$0x11]   ;;  %v1269_v52 = vrot.slane %v5505_v41, 1  ;;  %815 = vst [vmem:[#allocation2 + $0x78] sm:$0xf] %v3826_v42  ;;  %v3831_v53 = vcombine.low %v605_v49, %v605_v49 }
  0x45   : > { %v5513_v51 = vld [vmem:[#allocation2 + $0x60] sm:$0xff]   ;;  %816 = vst [vmem:[#allocation2 + $0x7c] sm:$0xf] %v3827_v43  ;;  %v1272_v54 = vrot.slane %v5508_v47, 1  ;;  %v589_v55 = vsel %vm5315_vm2, 0, %v508_v48  ;;  %v512_v5 = vrot.slane %v510_v59, 7 }
  0x46   : > { %v1268_v60 = vrot.slane %v5513_v51, 1  ;;  %v3829_v62 = vcombine.low %v589_v55, %v589_v55  ;;  %v3830_v63 = vcombine.high %v589_v55, %v589_v55  ;;  %820 = vst [vmem:[#allocation2 + $0x8c] sm:$0x1] %v3831_v53  ;;  %v1120_v16 = vshrl.u32 %v5479_v13, 16  ;;  %v5096_v40 = vld [vmem:[%s5299_s27 + $0x68] sm:$0xff]   ;;  %v5099_v42 = vld [vmem:[%s6791_s1 + $0x70] sm:$0xff]  }
  0x47   : > { %1632 = vmatmul.mubr.bf16.gmra.mrb[12].mxu0 %v5389_v50  ;;  %v1113_v50 = vor.u32 %v1112_v44, %v1108_v26  ;;  %v5526_v4 = vld [vmem:[#allocation2 + $0x6c] sm:$0xff]   ;;  %v515_v12 = vor.u32 %v513_v0, %v512_v5  ;;  %v606_v15 = vsel %vm5315_vm2, %v512_v5, 0  ;;  %v1122_v20 = vshll.u32 %v5479_v13, 16  ;;  %4370 = vmatprep.subr.bf16.mxu1 %v5099_v42  ;;  %v5101_v3 = vld [vmem:[%s6791_s1 + $0x1d8] sm:$0xff]  }
  0x48   : > { %1639 = vmatprep.mubr.bf16.mxu0 %v5486_v18  ;;  %v5529_v6 = vsel %vm1243_vm3, %v1268_v60, %v1269_v52  ;;  %818 = vst [vmem:[#allocation2 + $0x84] sm:$0xf] %v3829_v62  ;;  %819 = vst [vmem:[#allocation2 + $0x88] sm:$0xf] %v3830_v63  ;;  %v1271_v10 = vrot.slane %v5526_v4, 1  ;;  %v517_v26 = vshrl.u32 %v5093_v46, 16  ;;  %4500 = vmatprep.subr.bf16.mxu0 %v5101_v3 }
  0x49   : > { %v5532_v8 = vsel %vm1034_vm4, %v1113_v50, %v1117_v58  ;;  %v5536_v11 = vld [vmem:[#allocation2 + $0x80] ss:$0 sps:$4 sm:$0x11]   ;;  %v590_v25 = vsel %vm5315_vm2, 0, %v515_v12  ;;  %v520_v28 = vshll.u32 %v5093_v46, 16  ;;  %v1124_v29 = vrot.slane %v1122_v20, 1 }
  0x4a   : > { %4683 = vmatmul.mubr.bf16.gmra.mrb[12].mxu1 %v5529_v6  ;;  %v5545_v21 = vsel %vm1243_vm3, %v1271_v10, %v1272_v54  ;;  %v1275_v24 = vrot.slane %v5536_v11, 1  ;;  %v3832_v34 = vcombine.low %v590_v25, %v590_v25  ;;  %v3833_v35 = vcombine.high %v590_v25, %v590_v25  ;;  %v5100_v50 = vld [vmem:[%s6791_s1 + $0x30] sm:$0xff]  }
  0x4b   : > { %4686 = vmatprep.mubr.bf16.mxu1 %v5545_v21  ;;  %v519_v37 = vrot.slane %v517_v26, 7  ;;  %v1125_v38 = vor.u32 %v1124_v29, %v1120_v16  ;;  %v1127_v39 = vshll.u32 %v5472_v7, 16  ;;  %v524_v7 = vshrl.u32 %v5096_v40, 16  ;;  %4371 = vmatpush3.bf16.msra.mxu1 %v5100_v50  ;;  %v5102_v16 = vld [vmem:[%s6791_s1 + $0x198] sm:$0xff]   ;;  %v5103_v26 = vld [vmem:[%s5299_s27 + $0x70] sm:$0xff]  }
  0x4c   : > { %v5547_v22 = vld [vmem:[#allocation2 + $0x78] sm:$0xff]   ;;  %821 = vst [vmem:[#allocation2 + $0x90] sm:$0xf] %v3832_v34  ;;  %822 = vst [vmem:[#allocation2 + $0x94] sm:$0xf] %v3833_v35  ;;  %v527_v58 = vshll.u32 %v5096_v40, 16  ;;  %4501 = vmatpush3.bf16.msra.mxu0 %v5102_v16 }
  0x4d   : > { %v1274_v31 = vrot.slane %v5547_v22, 1  ;;  %v5555_v33 = vld [vmem:[#allocation2 + $0x8c] ss:$0 sps:$4 sm:$0x11]   ;;  %v522_v49 = vor.u32 %v520_v28, %v519_v37  ;;  %v607_v52 = vsel %vm5315_vm2, %v519_v37, 0  ;;  %v1129_v53 = vrot.slane %v1127_v39, 1 }
  0x4e   : > { %v1278_v48 = vrot.slane %v5555_v33, 1  ;;  %v3837_v55 = vcombine.low %v607_v52, %v607_v52  ;;  %v526_v62 = vrot.slane %v524_v7, 7  ;;  %v1132_v5 = vshrl.u32 %v5513_v51, 16  ;;  %v5106_v37 = vld [vmem:[%s5299_s27 + $0x78] sm:$0xff]  }
  0x4f   : > { %1640 = vmatmul.mubr.bf16.gmra.mrb[16].mxu0 %v5425_v14  ;;  %v3834_v14 = vcombine.low %v606_v15, %v606_v15  ;;  %v5563_v43 = vsel %vm1243_vm3, %v1274_v31, %v1275_v24  ;;  %v5565_v44 = vld [vmem:[#allocation2 + $0x84] sm:$0xff]   ;;  %v591_v59 = vsel %vm5315_vm2, 0, %v522_v49  ;;  %v5579_v60 = vsel %vm1034_vm4, %v1125_v38, %v1129_v53 }
  0x50   : > { %1647 = vmatprep.mubr.bf16.mxu0 %v5532_v8  ;;  %v1277_v54 = vrot.slane %v5565_v44, 1  ;;  %v3835_v0 = vcombine.low %v591_v59, %v591_v59  ;;  %v3836_v1 = vcombine.high %v591_v59, %v591_v59  ;;  %826 = vst [vmem:[#allocation2 + $0xa4] sm:$0x1] %v3837_v55  ;;  %v529_v12 = vor.u32 %v527_v58, %v526_v62 }
  0x51   : > { %823 = vst [vmem:[#allocation2 + $0x98] sm:$0x1] %v3834_v14  ;;  %v608_v15 = vsel %vm5315_vm2, %v526_v62, 0  ;;  %v1134_v20 = vshll.u32 %v5513_v51, 16  ;;  %v1139_v29 = vshll.u32 %v5505_v41, 16  ;;  %v531_v38 = vshrl.u32 %v5103_v26, 16 }
  0x52   : > { %4687 = vmatmul.mubr.bf16.gmra.mrb[16].mxu1 %v5563_v43  ;;  %v5582_v63 = vsel %vm1243_vm3, %v1277_v54, %v1278_v48  ;;  %824 = vst [vmem:[#allocation2 + $0x9c] sm:$0xf] %v3835_v0  ;;  %825 = vst [vmem:[#allocation2 + $0xa0] sm:$0xf] %v3836_v1  ;;  %v3840_v46 = vcombine.low %v608_v15, %v608_v15  ;;  %v592_v25 = vsel %vm5315_vm2, 0, %v529_v12  ;;  %v534_v39 = vshll.u32 %v5103_v26, 16 }
  0x53   : > { %4690 = vmatprep.mubr.bf16.mxu1 %v5582_v63  ;;  %v5598_v24 = vld [vmem:[#allocation2 + $0x90] sm:$0xff]   ;;  %v1136_v28 = vrot.slane %v1134_v20, 1  ;;  %v3838_v34 = vcombine.low %v592_v25, %v592_v25  ;;  %v3839_v35 = vcombine.high %v592_v25, %v592_v25  ;;  %v1141_v42 = vrot.slane %v1139_v29, 1  ;;  %v5109_v48 = vld [vmem:[%s6791_s1 + $0x78] sm:$0xff]   ;;  %v5629_v1 = vld [vmem:[#allocation2] sm:$0xff]  }
  0x54   : > { %829 = vst [vmem:[#allocation2 + $0xb0] sm:$0x1] %v3840_v46  ;;  %v1280_v31 = vrot.slane %v5598_v24, 1  ;;  %v538_v41 = vshrl.u32 %v5106_v37, 16  ;;  %v533_v53 = vrot.slane %v531_v38, 7  ;;  %v541_v50 = vshll.u32 %v5106_v37, 16  ;;  %4372 = vmatprep.subr.bf16.mxu1 %v5109_v48 }
  0x55   : > { %v1137_v40 = vor.u32 %v1136_v28, %v1132_v5  ;;  %827 = vst [vmem:[#allocation2 + $0xa8] sm:$0xf] %v3838_v34  ;;  %828 = vst [vmem:[#allocation2 + $0xac] sm:$0xf] %v3839_v35  ;;  %v5110_v0 = vld [vmem:[%s6791_s1 + $0x38] sm:$0xff]   ;;  %v1038_v38 = vshll.u32 %v5629_v1, 16 }
  0x56   : > { %v536_v58 = vor.u32 %v534_v39, %v533_v53  ;;  %v609_v59 = vsel %vm5315_vm2, %v533_v53, 0  ;;  %v540_v62 = vrot.slane %v538_v41, 7  ;;  %4373 = vmatpush3.bf16.msra.mxu1 %v5110_v0  ;;  %v5642_v28 = vld [vmem:[#allocation2 + $0x8] ss:$0 sps:$4 sm:$0x11]   ;;  %v1146_v48 = vshll.u32 %v5526_v4, 16 }
  0x57   : > { %1648 = vmatmul.mubr.bf16.gmra.mrb[20].mxu0 %v5476_v9  ;;  %v5613_v52 = vld [vmem:[#allocation2 + $0xa4] ss:$0 sps:$4 sm:$0x11]   ;;  %v5618_v7 = vsel %vm1034_vm4, %v1137_v40, %v1141_v42  ;;  %v3843_v12 = vcombine.low %v609_v59, %v609_v59  ;;  %v1036_v40 = vshrl.u32 %v5629_v1, 16  ;;  %v1144_v42 = vshrl.u32 %v5526_v4, 16  ;;  %4702 = vmatprep.subr.bf16.mxu1 %v5658_v30 }
  0x58   : > { %1655 = vmatprep.mubr.bf16.mxu0 %v5579_v60  ;;  %v5590_v10 = vld [vmem:[#allocation2 + $0x98] ss:$0 sps:$4 sm:$0x11]   ;;  %v1284_v55 = vrot.slane %v5613_v52, 1  ;;  %v593_v15 = vsel %vm5315_vm2, 0, %v536_v58  ;;  %v543_v46 = vor.u32 %v541_v50, %v540_v62  ;;  %v610_v16 = vsel %vm5315_vm2, %v540_v62, 0 }
  0x59   : > { %v1281_v14 = vrot.slane %v5590_v10, 1  ;;  %v5620_v54 = vld [vmem:[#allocation2 + $0x9c] sm:$0xff]   ;;  %v3841_v25 = vcombine.low %v593_v15, %v593_v15  ;;  %v3842_v26 = vcombine.high %v593_v15, %v593_v15  ;;  %832 = vst [vmem:[#allocation2 + $0xbc] sm:$0x1] %v3843_v12  ;;  %v3846_v34 = vcombine.low %v610_v16, %v610_v16 }
  0x5a   : > { %v1283_v3 = vrot.slane %v5620_v54, 1  ;;  %v5114_v41 = vld [vmem:[%s6791_s1 + $0x1e0] sm:$0xff]   ;;  %v1043_v53 = vshll.u32 %v5642_v28, 16  ;;  %v1151_v50 = vshll.u32 %v5508_v47, 16  ;;  %v1040_v58 = vrot.slane %v1038_v38, 1 }
  0x5b   : > { %v5611_v49 = vsel %vm1243_vm3, %v1280_v31, %v1281_v14  ;;  %v5632_v5 = vld [vmem:[#allocation2 + $0xb0] ss:$0 sps:$4 sm:$0x11]   ;;  %v594_v31 = vsel %vm5315_vm2, 0, %v543_v46  ;;  %830 = vst [vmem:[#allocation2 + $0xb4] sm:$0xf] %v3841_v25  ;;  %4502 = vmatprep.subr.bf16.mxu0 %v5114_v41 }
  0x5c   : > { %4691 = vmatmul.mubr.bf16.gmra.mrb[20].mxu1 %v5611_v49  ;;  %v5639_v20 = vsel %vm1243_vm3, %v1283_v3, %v1284_v55  ;;  %v1287_v14 = vrot.slane %v5632_v5, 1  ;;  %v5645_v29 = vld [vmem:[#allocation2 + $0xa8] sm:$0xff]   ;;  %831 = vst [vmem:[#allocation2 + $0xb8] sm:$0xf] %v3842_v26  ;;  %v3844_v35 = vcombine.low %v594_v31, %v594_v31  ;;  %v3845_v37 = vcombine.high %v594_v31, %v594_v31  ;;  %v5115_v0 = vld [vmem:[%s6791_s1 + $0x1a0] sm:$0xff]  }
  0x5d   : > { %4694 = vmatprep.mubr.bf16.mxu1 %v5639_v20  ;;  %v1286_v39 = vrot.slane %v5645_v29, 1  ;;  %835 = vst [vmem:[#allocation2 + $0xc8] sm:$0x1] %v3846_v34  ;;  %v1148_v59 = vrot.slane %v1146_v48, 1  ;;  %v1153_v62 = vrot.slane %v1151_v50, 1  ;;  %v1156_v3 = vshrl.u32 %v5547_v22, 16  ;;  %4503 = vmatpush3.bf16.msra.mxu0 %v5115_v0 }
  0x5e   : > { %833 = vst [vmem:[#allocation2 + $0xc0] sm:$0xf] %v3844_v35  ;;  %834 = vst [vmem:[#allocation2 + $0xc4] sm:$0xf] %v3845_v37  ;;  %v1158_v12 = vshll.u32 %v5547_v22, 16  ;;  %v1163_v46 = vshll.u32 %v5536_v11, 16  ;;  %v1041_v38 = vor.u32 %v1040_v58, %v1036_v40 }
  0x5f   : > { %1656 = vmatmul.mubr.bf16.gmra.mrb[24].mxu0 %v5479_v13  ;;  %v5666_v55 = vsel %vm1243_vm3, %v1286_v39, %v1287_v14  ;;  %v1149_v15 = vor.u32 %v1148_v59, %v1144_v42  ;;  %v1045_v16 = vrot.slane %v1043_v53, 1  ;;  %v1168_v25 = vshrl.u32 %v5565_v44, 16  ;;  %v5117_v40 = vld [vmem:[%s6791_s1 + $0x1e8] sm:$0xff]  }
  0x60   : > { %1663 = vmatprep.mubr.bf16.mxu0 %v5618_v7  ;;  %v5675_v47 = vld [vmem:[#allocation2 + $0xbc] ss:$0 sps:$4 sm:$0x11]   ;;  %v1160_v14 = vrot.slane %v1158_v12, 1  ;;  %v1170_v26 = vshll.u32 %v5565_v44, 16  ;;  %v1165_v39 = vrot.slane %v1163_v46, 1  ;;  %4504 = vmatprep.subr.bf16.mxu0 %v5117_v40 }
  0x61   : > { %v1290_v34 = vrot.slane %v5675_v47, 1  ;;  %v5684_v35 = vsel %vm1034_vm4, %v1149_v15, %v1153_v62  ;;  %v1175_v59 = vshll.u32 %v5555_v33, 16  ;;  %v5118_v0 = vld [vmem:[%s6791_s1 + $0x1a8] sm:$0xff]   ;;  %v1182_v15 = vshll.u32 %v5598_v24, 16  ;;  %v5119_v40 = vld [vmem:[%s6791_s1 + $0x90] sm:$0xff]  }
  0x62   : > { %v1161_v11 = vor.u32 %v1160_v14, %v1156_v3  ;;  %v1172_v50 = vrot.slane %v1170_v26, 1  ;;  %v1046_v3 = vsel %vm1034_vm4, %v1041_v38, %v1045_v16  ;;  %4505 = vmatpush3.bf16.msra.mxu0 %v5118_v0  ;;  %v5120_v14 = vld [vmem:[%s6791_s1 + $0x1f0] sm:$0xff]   ;;  %v1180_v26 = vshrl.u32 %v5598_v24, 16 }
  0x63   : > { %v5680_v31 = vld [vmem:[#allocation2 + $0xb4] sm:$0xff]   ;;  %v1177_v12 = vrot.slane %v1175_v59, 1  ;;  %4506 = vmatprep.subr.bf16.mxu0 %v5120_v14  ;;  %v1192_v59 = vshrl.u32 %v5620_v54, 16 }
  0x64   : > { %4695 = vmatmul.mubr.bf16.gmra.mrb[24].mxu1 %v5666_v55  ;;  %v5686_v37 = vld [vmem:[#allocation2 + $0xc8] ss:$0 sps:$4 sm:$0x11]   ;;  %v1289_v42 = vrot.slane %v5680_v31, 1  ;;  %v5695_v53 = vsel %vm1034_vm4, %v1161_v11, %v1165_v39  ;;  %v1173_v33 = vor.u32 %v1172_v50, %v1168_v25  ;;  %v1184_v25 = vrot.slane %v1182_v15, 1  ;;  %v5121_v38 = vld [vmem:[%s6791_s1 + $0x1b0] sm:$0xff]  }
  0x65   : > { %v5690_v48 = vld [vmem:[#allocation2 + $0xc0] sm:$0xff]   ;;  %v1379_v41 = vrot.slane %v5686_v37, 1  ;;  %v5116_v50 = vld [vmem:[%s6791_s1 + $0x88] sm:$0xff]  }
  0x66   : > { %v5702_v58 = vsel %vm1243_vm3, %v1289_v42, %v1290_v34  ;;  %v1378_v62 = vrot.slane %v5690_v48, 1  ;;  %v5721_v16 = vsel %vm1034_vm4, %v1173_v33, %v1177_v12  ;;  %v1187_v34 = vshll.u32 %v5590_v10, 16  ;;  %4507 = vmatpush3.bf16.msra.mxu0 %v5121_v38  ;;  %v5124_v10 = vld [vmem:[%s6791_s1 + $0x1b8] sm:$0xff]   ;;  %v5753_v33 = vld [vmem:[%s6792_s2] sm:$0xff]  }
  0x67   : > { %1664 = vmatmul.mubr.bf16.gmra.mrb[28].mxu0 %v5513_v51  ;;  %4698 = vmatprep.mubr.bf16.mxu1 %v5702_v58  ;;  %v1185_v11 = vor.u32 %v1184_v25, %v1180_v26  ;;  %v1194_v42 = vshll.u32 %v5620_v54, 16  ;;  %v1244_v12 = vrot.slane %v5629_v1, 1  ;;  %v5122_v26 = vld [vmem:[%s6791_s1 + $0x98] sm:$0xff]   ;;  %v5147_v25 = vld [vmem:[#allocation2 + $0xc] sm:$0xff]  }
  0x68   : > { %1671 = vmatprep.mubr.bf16.mxu0 %v5684_v35  ;;  %v5713_v46 = vsel %vm1243_vm3, %v1378_v62, %v1379_v41  ;;  %v1189_v39 = vrot.slane %v1187_v34, 1  ;;  %v5123_v41 = vld [vmem:[%s6791_s1 + $0x1f8] sm:$0xff]  }
  0x69   : > { %4508 = vmatprep.subr.bf16.mxu0 %v5123_v41  ;;  %v1196_v0 = vrot.slane %v1194_v42, 1  ;;  %v5127_v42 = vld [vmem:[%s6791_s1 + $0xa8] sm:$0xff]  }
  0x6a   : > { %4509 = vmatpush3.bf16.msra.mxu0 %v5124_v10  ;;  %v5747_v62 = vsel %vm1034_vm4, %v1185_v11, %v1189_v39  ;;  %v1218_v11 = vshll.u32 %v5680_v31, 16  ;;  %v5148_v10 = vld [vmem:[#allocation2 + $0x18] sm:$0xff]  }
  0x6b   : > { %4798 = vmatprep.subr.bf16.mxu0 %v5753_v33 }
  0x6c   : > { %4699 = vmatmul.mubr.bf16.gmra.mrb[28].mxu1 %v5713_v46 }
  0x6d   : > { %2073 = vmatprep.mubr.bf16.mxu1 %v1046_v3  ;;  %v1199_v3 = vshll.u32 %v5613_v52, 16  ;;  %v1206_v52 = vshll.u32 %v5645_v29, 16 }
  0x6f   : > { %1672 = vmatmul.mubr.bf16.gmra.mrb[32].mxu0 %v5526_v4  ;;  %v1201_v15 = vrot.slane %v1199_v3, 1  ;;  %v1208_v38 = vrot.slane %v1206_v52, 1  ;;  %v5129_v3 = vld [vmem:[%s6791_s1 + $0xb0] sm:$0xff]  }
  0x70   : > { %1679 = vmatprep.mubr.bf16.mxu0 %v5695_v53 }
  0x74   : > { %2074 = vmatmul.mubr.bf16.vlgmr.msra.gmra.mrb[32].mxu1 %v5629_v1  ;;  %v1211_v1 = vshll.u32 %v5632_v5, 16  ;;  %v5125_v5 = vld [vmem:[%s6791_s1 + $0xa0] sm:$0xff]  }
  0x75   : > { %4703 = vmatpush3.bf16.msra.mxu1 %v5658_v30  ;;  %2081 = vmatprep.mubr.bf16.mxu1 %v5381_v45  ;;  %v1245_v45 = vrot.slane %v5642_v28, 1  ;;  %v1197_v30 = vor.u32 %v1196_v0, %v1192_v59  ;;  %v1204_v28 = vshrl.u32 %v5645_v29, 16  ;;  %v1220_v59 = vrot.slane %v1218_v11, 1 }
  0x76   : > { %4704 = vmatprep.subr.bf16.mxu1 %v5116_v50  ;;  %v1213_v39 = vrot.slane %v1211_v1, 1  ;;  %v1366_v1 = vshrl.u32 %v5690_v48, 16 }
  0x77   : > { %1680 = vmatmul.mubr.bf16.gmra.mrb[36].mxu0 %v5547_v22  ;;  %v5762_v14 = vsel %vm1243_vm3, %v1244_v12, %v1245_v45  ;;  %v5771_v34 = vsel %vm1034_vm4, %v1197_v30, %v1201_v15  ;;  %v1209_v41 = vor.u32 %v1208_v38, %v1204_v28  ;;  %v1368_v30 = vshll.u32 %v5690_v48, 16  ;;  %v5149_v15 = vld [vmem:[#allocation2 + $0x24] sm:$0xff]  }
  0x78   : > { %1687 = vmatprep.mubr.bf16.mxu0 %v5721_v16  ;;  %v5806_v28 = vld [vmem:[%s6791_s1 + $0x200] sm:$0xff]  }
  0x79   : > { %4705 = vmatpush3.bf16.msra.mxu1 %v5116_v50  ;;  %v1216_v50 = vshrl.u32 %v5680_v31, 16  ;;  %v5786_v0 = vsel %vm1034_vm4, %v1209_v41, %v1213_v39  ;;  %v5150_v39 = vld [vmem:[#allocation2 + $0x30] sm:$0xff]  }
  0x7a   : > { %4706 = vmatprep.subr.bf16.mxu1 %v5119_v40  ;;  %v5130_v41 = vld [vmem:[%s6792_s2 + $0x10] sm:$0xff]  }
  0x7b   : > { %v1221_v12 = vor.u32 %v1220_v59, %v1216_v50  ;;  %v5142_v59 = vld [vmem:[%s6791_s1 + $0x230] sm:$0xff]  }
  0x7c   : > { %2082 = vmatmul.mubr.bf16.gmra.mrb[36].mxu1 %v5147_v25  ;;  %v1373_v25 = vshll.u32 %v5686_v37, 16 }
  0x7d   : > { %2089 = vmatprep.mubr.bf16.mxu1 %v5396_v56  ;;  %4707 = vmatpush3.bf16.msra.mxu1 %v5119_v40  ;;  %v1223_v40 = vshll.u32 %v5675_v47, 16  ;;  %v5131_v47 = vld [vmem:[%s6791_s1 + $0xb8] sm:$0xff]  }
  0x7e   : > { %4708 = vmatprep.subr.bf16.mxu1 %v5122_v26  ;;  %v1375_v11 = vrot.slane %v1373_v25, 1 }
  0x7f   : > { %1688 = vmatmul.mubr.bf16.gmra.mrb[40].mxu0 %v5565_v44  ;;  %v1225_v45 = vrot.slane %v1223_v40, 1 }
  0x80   : > { %1695 = vmatprep.mubr.bf16.mxu0 %v5747_v62 }
  0x81   : > { %4709 = vmatpush3.bf16.msra.mxu1 %v5122_v26  ;;  %v5799_v52 = vsel %vm1034_vm4, %v1221_v12, %v1225_v45  ;;  %v1370_v26 = vrot.slane %v1368_v30, 1  ;;  %v5146_v45 = vld [vmem:[%s6791_s1 + $0x238] sm:$0xff]  }
  0x82   : > { %4710 = vmatprep.subr.bf16.mxu1 %v5125_v5 }
  0x83   : > { %v1371_v38 = vor.u32 %v1370_v26, %v1366_v1 }
  0x84   : > { %2090 = vmatmul.mubr.bf16.gmra.mrb[40].mxu1 %v5148_v10 }
  0x85   : > { %2097 = vmatprep.mubr.bf16.mxu1 %v5430_v19  ;;  %4711 = vmatpush3.bf16.msra.mxu1 %v5125_v5  ;;  %v5813_v37 = vsel %vm1034_vm4, %v1371_v38, %v1375_v11  ;;  %v5151_v5 = vld [vmem:[#allocation2 + $0x3c] sm:$0xff]  }
  0x86   : > { %4712 = vmatprep.subr.bf16.mxu1 %v5127_v42 }
  0x87   : > { %1696 = vmatmul.mubr.bf16.gmra.mrb[44].mxu0 %v5598_v24 }
  0x88   : > { %1703 = vmatprep.mubr.bf16.mxu0 %v5771_v34 }
  0x89   : > { %4713 = vmatpush3.bf16.msra.mxu1 %v5127_v42  ;;  %v5128_v42 = vld [vmem:[%s6792_s2 + $0x8] sm:$0xff]  }
  0x8a   : > { %4714 = vmatprep.subr.bf16.mxu1 %v5129_v3 }
  0x8c   : > { %2098 = vmatmul.mubr.bf16.gmra.mrb[44].mxu1 %v5149_v15 }
  0x8d   : > { %2105 = vmatprep.mubr.bf16.mxu1 %v5464_v57  ;;  %4715 = vmatpush3.bf16.msra.mxu1 %v5129_v3 }
  0x8e   : > { %4716 = vmatprep.subr.bf16.mxu1 %v5131_v47 }
  0x8f   : > { %1704 = vmatmul.mubr.bf16.gmra.mrb[48].mxu0 %v5620_v54 }
  0x90   : > { %1711 = vmatprep.mubr.bf16.mxu0 %v5786_v0 }
  0x91   : > { %4717 = vmatpush3.bf16.msra.mxu1 %v5131_v47 }
  0x92   : > { %4750 = vmatprep.subr.bf16.mxu1 %v5806_v28 }
  0x94   : > { %2106 = vmatmul.mubr.bf16.gmra.mrb[48].mxu1 %v5150_v39 }
  0x95   : > { %2113 = vmatprep.mubr.bf16.mxu1 %v5486_v18 }
  0x97   : > { %1712 = vmatmul.mubr.bf16.gmra.mrb[52].mxu0 %v5645_v29 }
  0x98   : > { %1719 = vmatprep.mubr.bf16.mxu0 %v5799_v52 }
  0x9c   : > { %2114 = vmatmul.mubr.bf16.gmra.mrb[52].mxu1 %v5151_v5 }
  0x9d   : > { %2121 = vmatprep.mubr.bf16.mxu1 %v5532_v8 }
  0x9f   : > { %1720 = vmatmul.mubr.bf16.gmra.mrb[56].mxu0 %v5680_v31 }
  0xa0   : > { %1727 = vmatprep.mubr.bf16.mxu0 %v5813_v37 }
  0xa4   : > { %2122 = vmatmul.mubr.bf16.gmra.mrb[56].mxu1 %v5476_v9  ;;  %v5137_v9 = vld [vmem:[%s6792_s2 + $0x28] sm:$0xff]  }
  0xa5   : > { %2129 = vmatprep.mubr.bf16.mxu1 %v5579_v60 }
  0xa7   : > { %1728 = vmatmul.mubr.bf16.gmra.mrb[60].mxu0 %v5690_v48 }
  0xa8   : > { %2614 = vmatprep.mubr.bf16.mxu0 %v5396_v56  ;;  %v5132_v56 = vld [vmem:[%s6792_s2 + $0x18] sm:$0xff]  }
  0xac   : > { %2130 = vmatmul.mubr.bf16.gmra.mrb[60].mxu1 %v5479_v13  ;;  %v5143_v13 = vld [vmem:[%s6792_s2 + $0x38] sm:$0xff]  }
  0xad   : > { %2137 = vmatprep.mubr.bf16.mxu1 %v5618_v7 }
  0xaf   : > { %2615 = vmatmul.mubr.bf16.vlgmr.msra.gmra.mrb[64].mxu0 %v5148_v10 }
  0xb0   : > { %4799 = vmatpush3.bf16.msra.mxu0 %v5753_v33  ;;  %2622 = vmatprep.mubr.bf16.mxu0 %v5430_v19  ;;  %v5134_v19 = vld [vmem:[%s6792_s2 + $0x20] sm:$0xff]   ;;  %v5153_v33 = vld [vmem:[#allocation2 + $0x54] sm:$0xff]  }
  0xb1   : > { %4800 = vmatprep.subr.bf16.mxu0 %v5128_v42 }
  0xb4   : > { %4801 = vmatpush3.bf16.msra.mxu0 %v5128_v42  ;;  %2138 = vmatmul.mubr.bf16.gmra.mrb[64].mxu1 %v5513_v51 }
  0xb5   : > { %4802 = vmatprep.subr.bf16.mxu0 %v5130_v41  ;;  %2145 = vmatprep.mubr.bf16.mxu1 %v5684_v35 }
  0xb7   : > { %2623 = vmatmul.mubr.bf16.gmra.mrb[68].mxu0 %v5149_v15 }
  0xb8   : > { %2630 = vmatprep.mubr.bf16.mxu0 %v5464_v57  ;;  %4803 = vmatpush3.bf16.msra.mxu0 %v5130_v41  ;;  %v5140_v57 = vld [vmem:[%s6792_s2 + $0x30] sm:$0xff]  }
  0xb9   : > { %4804 = vmatprep.subr.bf16.mxu0 %v5132_v56 }
  0xbc   : > { %4805 = vmatpush3.bf16.msra.mxu0 %v5132_v56  ;;  %2146 = vmatmul.mubr.bf16.gmra.mrb[68].mxu1 %v5526_v4 }
  0xbd   : > { %4806 = vmatprep.subr.bf16.mxu0 %v5134_v19  ;;  %2153 = vmatprep.mubr.bf16.mxu1 %v5695_v53 }
  0xbf   : > { %2631 = vmatmul.mubr.bf16.gmra.mrb[72].mxu0 %v5150_v39 }
  0xc0   : > { %2638 = vmatprep.mubr.bf16.mxu0 %v5486_v18  ;;  %4807 = vmatpush3.bf16.msra.mxu0 %v5134_v19  ;;  %v5152_v18 = vld [vmem:[#allocation2 + $0x48] sm:$0xff]  }
  0xc1   : > { %4808 = vmatprep.subr.bf16.mxu0 %v5137_v9 }
  0xc4   : > { %4809 = vmatpush3.bf16.msra.mxu0 %v5137_v9  ;;  %2154 = vmatmul.mubr.bf16.gmra.mrb[72].mxu1 %v5547_v22 }
  0xc5   : > { %4810 = vmatprep.subr.bf16.mxu0 %v5140_v57  ;;  %2161 = vmatprep.mubr.bf16.mxu1 %v5721_v16 }
  0xc7   : > { %2639 = vmatmul.mubr.bf16.gmra.mrb[76].mxu0 %v5151_v5 }
  0xc8   : > { %2646 = vmatprep.mubr.bf16.mxu0 %v5532_v8  ;;  %4811 = vmatpush3.bf16.msra.mxu0 %v5140_v57 }
  0xc9   : > { %4812 = vmatprep.subr.bf16.mxu0 %v5143_v13 }
  0xcc   : > { %4813 = vmatpush3.bf16.msra.mxu0 %v5143_v13  ;;  %2162 = vmatmul.mubr.bf16.gmra.mrb[76].mxu1 %v5565_v44 }
  0xcd   : > { %2169 = vmatprep.mubr.bf16.mxu1 %v5747_v62 }
  0xcf   : > { %2647 = vmatmul.mubr.bf16.gmra.mrb[80].mxu0 %v5152_v18  ;;  %v5154_v18 = vld [vmem:[%s5299_s27] sm:$0xff]  }
  0xd0   : > { %2654 = vmatprep.mubr.bf16.mxu0 %v5579_v60 }
  0xd4   : > { %2170 = vmatmul.mubr.bf16.gmra.mrb[80].mxu1 %v5598_v24 }
  0xd5   : > { %2177 = vmatprep.mubr.bf16.mxu1 %v5771_v34 }
  0xd7   : > { %2655 = vmatmul.mubr.bf16.gmra.mrb[84].mxu0 %v5153_v33 }
  0xd8   : > { %2662 = vmatprep.mubr.bf16.mxu0 %v5618_v7 }
  0xdc   : > { %2178 = vmatmul.mubr.bf16.gmra.mrb[84].mxu1 %v5620_v54 }
  0xdd   : > { %2185 = vmatprep.mubr.bf16.mxu1 %v5786_v0 }
  0xdf   : > { %2663 = vmatmul.mubr.bf16.gmra.mrb[88].mxu0 %v5513_v51  ;;  %v5135_v51 = vld [vmem:[%s6791_s1 + $0x208] sm:$0xff]  }
  0xe0   : > { %2670 = vmatprep.mubr.bf16.mxu0 %v5684_v35  ;;  %v5139_v35 = vld [vmem:[%s6791_s1 + $0x220] sm:$0xff]  }
  0xe4   : > { %2186 = vmatmul.mubr.bf16.gmra.mrb[88].mxu1 %v5645_v29 }
  0xe5   : > { %2193 = vmatprep.mubr.bf16.mxu1 %v5799_v52 }
  0xe7   : > { %2671 = vmatmul.mubr.bf16.gmra.mrb[92].mxu0 %v5526_v4  ;;  %v5136_v4 = vld [vmem:[%s6791_s1 + $0x210] sm:$0xff]  }
  0xe8   : > { %2678 = vmatprep.mubr.bf16.mxu0 %v5695_v53 }
  0xec   : > { %2194 = vmatmul.mubr.bf16.gmra.mrb[92].mxu1 %v5680_v31 }
  0xed   : > { %4718 = vmatprep.mubr.bf16.mxu1 %v5762_v14 }
  0xef   : > { %2679 = vmatmul.mubr.bf16.gmra.mrb[96].mxu0 %v5547_v22 }
  0xf0   : > { %2686 = vmatprep.mubr.bf16.mxu0 %v5721_v16 }
  0xf4   : > { %4719 = vmatmul.mubr.bf16.vlgmr.msra.gmra.mrb[0].mxu1 %v5352_v23  ;;  %v5138_v23 = vld [vmem:[%s6791_s1 + $0x218] sm:$0xff]  }
  0xf5   : > { %4751 = vmatpush3.bf16.msra.mxu1 %v5806_v28  ;;  %4722 = vmatprep.mubr.bf16.mxu1 %v5368_v36 }
  0xf6   : > { %4752 = vmatprep.subr.bf16.mxu1 %v5135_v51 }
  0xf7   : > { %2687 = vmatmul.mubr.bf16.gmra.mrb[100].mxu0 %v5565_v44 }
  0xf8   : > { %2694 = vmatprep.mubr.bf16.mxu0 %v5747_v62  ;;  %v5141_v62 = vld [vmem:[%s6791_s1 + $0x228] sm:$0xff]  }
  0xf9   : > { %4753 = vmatpush3.bf16.msra.mxu1 %v5135_v51 }
  0xfa   : > { %4754 = vmatprep.subr.bf16.mxu1 %v5136_v4 }
  0xfc   : > { %4723 = vmatmul.mubr.bf16.gmra.mrb[4].mxu1 %v5403_v61 }
  0xfd   : > { %4726 = vmatprep.mubr.bf16.mxu1 %v5411_v2  ;;  %4755 = vmatpush3.bf16.msra.mxu1 %v5136_v4 }
  0xfe   : > { %4756 = vmatprep.subr.bf16.mxu1 %v5138_v23 }
  0xff   : > { %2695 = vmatmul.mubr.bf16.gmra.mrb[104].mxu0 %v5598_v24 }
 0x100   : > { %2702 = vmatprep.mubr.bf16.mxu0 %v5771_v34 }
 0x101   : > { %4757 = vmatpush3.bf16.msra.mxu1 %v5138_v23  ;;  %v5155_v23 = vld [vmem:[%s5299_s27 + $0x8] sm:$0xff]  }
 0x102   : > { %v4238_v8 = vpop.f32.mrb[0].mxu0  ;;  %4758 = vmatprep.subr.bf16.mxu1 %v5139_v35 }
 0x103   : > { %v4239_v22 = vpop.f32.mrb[1].mxu0 }
 0x104   : > { %v5890_v44 = vadd.f32 %v4239_v22, %v4238_v8  ;;  %v4241_v60 = vpop.f32.mrb[2].mxu0  ;;  %4727 = vmatmul.mubr.bf16.gmra.mrb[8].mxu1 %v5451_v17 }
 0x105   : > { %v4242_v7 = vpop.f32.mrb[3].mxu0  ;;  %4730 = vmatprep.mubr.bf16.mxu1 %v5492_v27  ;;  %4759 = vmatpush3.bf16.msra.mxu1 %v5139_v35 }
 0x106   : > { %v5894_v24 = vadd.f32 %v4242_v7, %v4241_v60  ;;  %4760 = vmatprep.subr.bf16.mxu1 %v5141_v62  ;;  %v5156_v60 = vld [vmem:[%s5299_s27 + $0x10] sm:$0xff]  }
 0x107   : > { %2703 = vmatmul.mubr.bf16.gmra.mrb[108].mxu0 %v5620_v54  ;;  %v5910_v54 = vld [vmem:[#allocation2 + $0xcc] sm:$0xff]  }
 0x108   : > { %2710 = vmatprep.mubr.bf16.mxu0 %v5786_v0  ;;  %v5917_v0 = vld [vmem:[#allocation2 + $0xd4] ss:$0 sps:$4 sm:$0x11]   ;;  %v2375_v3 = vshll.u32 %v5910_v54, 16 }
 0x109   : > { %4761 = vmatpush3.bf16.msra.mxu1 %v5141_v62  ;;  %v2380_v26 = vshll.u32 %v5917_v0, 16 }
 0x10a   : > { %v4244_v53 = vpop.f32.mrb[4].mxu0  ;;  %4762 = vmatprep.subr.bf16.mxu1 %v5142_v59  ;;  %v2377_v1 = vrot.slane %v2375_v3, 1 }
 0x10b   : > { %v4245_v16 = vpop.f32.mrb[5].mxu0  ;;  %v2382_v38 = vrot.slane %v2380_v26, 1 }
 0x10c   : > { %v5904_v14 = vadd.f32 %v4245_v16, %v4244_v53  ;;  %v4247_v34 = vpop.f32.mrb[6].mxu0  ;;  %4731 = vmatmul.mubr.bf16.gmra.mrb[12].mxu1 %v5498_v32 }
 0x10d   : > { %v4248_v10 = vpop.f32.mrb[7].mxu0  ;;  %4734 = vmatprep.mubr.bf16.mxu1 %v5529_v6  ;;  %4763 = vmatpush3.bf16.msra.mxu1 %v5142_v59  ;;  %v5158_v59 = vld [vmem:[%s5299_s27 + $0x20] sm:$0xff]  }
 0x10e   : > { %v5908_v50 = vadd.f32 %v4248_v10, %v4247_v34  ;;  %4764 = vmatprep.subr.bf16.mxu1 %v5146_v45  ;;  %v5157_v10 = vld [vmem:[%s5299_s27 + $0x18] sm:$0xff]  }
 0x10f   : > { %2711 = vmatmul.mubr.bf16.gmra.mrb[112].mxu0 %v5645_v29 }
 0x110   : > { %2718 = vmatprep.mubr.bf16.mxu0 %v5799_v52  ;;  %v2373_v52 = vshrl.u32 %v5910_v54, 16 }
 0x111   : > { %4765 = vmatpush3.bf16.msra.mxu1 %v5146_v45 }
 0x112   : > { %v4250_v40 = vpop.f32.mrb[8].mxu0  ;;  %v2378_v28 = vor.u32 %v2377_v1, %v2373_v52  ;;  %v5160_v52 = vld [vmem:[%s5299_s27 + $0x30] sm:$0xff]  }
 0x113   : > { %v4251_v12 = vpop.f32.mrb[9].mxu0 }
 0x114   : > { %v5923_v30 = vadd.f32 %v4251_v12, %v4250_v40  ;;  %v4253_v47 = vpop.f32.mrb[10].mxu0  ;;  %4735 = vmatmul.mubr.bf16.gmra.mrb[16].mxu1 %v5545_v21 }
 0x115   : > { %v4254_v29 = vpop.f32.mrb[11].mxu0  ;;  %4738 = vmatprep.mubr.bf16.mxu1 %v5563_v43 }
 0x116   : > { %v5927_v15 = vadd.f32 %v4254_v29, %v4253_v47  ;;  %v5159_v29 = vld [vmem:[%s5299_s27 + $0x28] sm:$0xff]  }
 0x117   : > { %2719 = vmatmul.mubr.bf16.gmra.mrb[116].mxu0 %v5680_v31  ;;  %v2383_v31 = vsel %vm1034_vm4, %v2378_v28, %v2382_v38 }
 0x118   : > { %2726 = vmatprep.mubr.bf16.mxu0 %v5813_v37 }
 0x11a   : > { %v4256_v25 = vpop.f32.mrb[12].mxu0 }
 0x11b   : > { %v4257_v11 = vpop.f32.mrb[13].mxu0 }
 0x11c   : > { %v5933_v39 = vadd.f32 %v4257_v11, %v4256_v25  ;;  %v4259_v5 = vpop.f32.mrb[14].mxu0  ;;  %4739 = vmatmul.mubr.bf16.gmra.mrb[20].mxu1 %v5582_v63  ;;  %v5162_v11 = vld [vmem:[%s5299_s27 + $0x40] sm:$0xff]  }
 0x11d   : > { %v4260_v42 = vpop.f32.mrb[15].mxu0  ;;  %4742 = vmatprep.mubr.bf16.mxu1 %v5611_v49 }
 0x11e   : > { %v5937_v41 = vadd.f32 %v4260_v42, %v4259_v5 }
 0x11f   : > { %2727 = vmatmul.mubr.bf16.gmra.mrb[120].mxu0 %v5690_v48 }
 0x120   : > { %2734 = vmatprep.mubr.bf16.mxu0 %v2383_v31 }
 0x122   : > { %v4262_v37 = vpop.f32.mrb[16].mxu0 }
 0x123   : > { %v4263_v56 = vpop.f32.mrb[17].mxu0 }
 0x124   : > { %v5941_v19 = vadd.f32 %v4263_v56, %v4262_v37  ;;  %v4265_v9 = vpop.f32.mrb[18].mxu0  ;;  %4743 = vmatmul.mubr.bf16.gmra.mrb[24].mxu1 %v5639_v20 }
 0x125   : > { %v4266_v57 = vpop.f32.mrb[19].mxu0  ;;  %4746 = vmatprep.mubr.bf16.mxu1 %v5666_v55 }
 0x126   : > { %v5945_v13 = vadd.f32 %v4266_v57, %v4265_v9  ;;  %v5163_v9 = vld [vmem:[%s5299_s27 + $0x48] sm:$0xff]  }
 0x127   : > { %2735 = vmatmul.mubr.bf16.gmra.mrb[124].mxu0 %v5910_v54 }
 0x128   : > { %4814 = vmatprep.mubr.bf16.mxu0 %v5154_v18  ;;  %v5164_v18 = vld [vmem:[%s5299_s27 + $0x50] sm:$0xff]  }
 0x12a   : > { %v4268_v48 = vpop.f32.mrb[20].mxu0 }
 0x12b   : > { %v4269_v33 = vpop.f32.mrb[21].mxu0 }
 0x12c   : > { %v5949_v51 = vadd.f32 %v4269_v33, %v4268_v48  ;;  %v4271_v4 = vpop.f32.mrb[22].mxu0  ;;  %4747 = vmatmul.mubr.bf16.gmra.mrb[28].mxu1 %v5702_v58 }
 0x12d   : > { %v4272_v8 = vpop.f32.mrb[23].mxu0  ;;  %4766 = vmatprep.mubr.bf16.mxu1 %v5368_v36 }
 0x12e   : > { %v5953_v22 = vadd.f32 %v4272_v8, %v4271_v4 }
 0x12f   : > { %4815 = vmatmul.mubr.bf16.vlgmr.msra.gmra.mrb[128].mxu0 %v5155_v23 }
 0x130   : > { %4818 = vmatprep.mubr.bf16.mxu0 %v5156_v60 }
 0x132   : > { %v4274_v7 = vpop.f32.mrb[24].mxu0 }
 0x133   : > { %v4275_v35 = vpop.f32.mrb[25].mxu0 }
 0x134   : > { %v5957_v53 = vadd.f32 %v4275_v35, %v4274_v7  ;;  %v4277_v16 = vpop.f32.mrb[26].mxu0  ;;  %4767 = vmatmul.mubr.bf16.vlgmr.msra.gmra.mrb[0].mxu1 %v5403_v61 }
 0x135   : > { %v4278_v62 = vpop.f32.mrb[27].mxu0  ;;  %4770 = vmatprep.mubr.bf16.mxu1 %v5411_v2  ;;  %v5161_v2 = vld [vmem:[%s5299_s27 + $0x38] sm:$0xff]  }
 0x136   : > { %v5961_v34 = vadd.f32 %v4278_v62, %v4277_v16 }
 0x137   : > { %4819 = vmatmul.mubr.bf16.gmra.mrb[132].mxu0 %v5157_v10 }
 0x138   : > { %4822 = vmatprep.mubr.bf16.mxu0 %v5158_v59  ;;  %v5165_v59 = vld [vmem:[%s5299_s27 + $0x58] sm:$0xff]  }
 0x13a   : > { %v4280_v40 = vpop.f32.mrb[28].mxu0 }
 0x13b   : > { %v4281_v3 = vpop.f32.mrb[29].mxu0 }
 0x13c   : > { %v5965_v12 = vadd.f32 %v4281_v3, %v4280_v40  ;;  %v4283_v45 = vpop.f32.mrb[30].mxu0  ;;  %4771 = vmatmul.mubr.bf16.gmra.mrb[4].mxu1 %v5451_v17  ;;  %v5166_v40 = vld [vmem:[%s5299_s27 + $0x60] sm:$0xff]  }
 0x13d   : > { %v4284_v47 = vpop.f32.mrb[31].mxu0  ;;  %4774 = vmatprep.mubr.bf16.mxu1 %v5492_v27 }
 0x13e   : > { %v5969_v36 = vadd.f32 %v4284_v47, %v4283_v45 }
 0x13f   : > { %4823 = vmatmul.mubr.bf16.gmra.mrb[136].mxu0 %v5159_v29 }
 0x140   : > { %4826 = vmatprep.mubr.bf16.mxu0 %v5160_v52 }
 0x142   : > { %v4286_v1 = vpop.f32.mrb[32].mxu0 }
 0x143   : > { %v4287_v26 = vpop.f32.mrb[33].mxu0 }
 0x144   : > { %v5974_v25 = vadd.f32 %v4287_v26, %v4286_v1  ;;  %v4289_v28 = vpop.f32.mrb[34].mxu0  ;;  %4775 = vmatmul.mubr.bf16.gmra.mrb[8].mxu1 %v5498_v32 }
 0x145   : > { %v4290_v61 = vpop.f32.mrb[35].mxu0  ;;  %4778 = vmatprep.mubr.bf16.mxu1 %v5529_v6 }
 0x146   : > { %v5977_v38 = vadd.f32 %v4290_v61, %v4289_v28 }
 0x147   : > { %4827 = vmatmul.mubr.bf16.gmra.mrb[140].mxu0 %v5161_v2  ;;  %v4374_v56 = vpop.f32.mrb[32].mxu1 }
 0x148   : > { %4830 = vmatprep.mubr.bf16.mxu0 %v5162_v11  ;;  %v4375_v57 = vpop.f32.mrb[33].mxu1  ;;  %v5167_v11 = vld [vmem:[%s5299_s27 + $0x68] sm:$0xff]  }
 0x149   : > { %v4376_v48 = vadd.f32 %v4375_v57, %v4374_v56  ;;  %v4377_v33 = vpop.f32.mrb[34].mxu1 }
 0x14a   : > { %v4292_v5 = vpop.f32.mrb[36].mxu0  ;;  %v4378_v4 = vpop.f32.mrb[35].mxu1 }
 0x14b   : > { %v4293_v42 = vpop.f32.mrb[37].mxu0  ;;  %v5990_v8 = vadd.f32 %v4376_v48, %v5890_v44  ;;  %v4379_v23 = vadd.f32 %v4378_v4, %v4377_v33 }
 0x14c   : > { %v5982_v31 = vadd.f32 %v4293_v42, %v4292_v5  ;;  %v4295_v17 = vpop.f32.mrb[38].mxu0  ;;  %4779 = vmatmul.mubr.bf16.gmra.mrb[12].mxu1 %v5545_v21  ;;  %v5168_v5 = vld [vmem:[%s5299_s27 + $0x70] sm:$0xff]  }
 0x14d   : > { %v4296_v37 = vpop.f32.mrb[39].mxu0  ;;  %v5996_v35 = vadd.f32 %v4379_v23, %v5894_v24  ;;  %4782 = vmatprep.mubr.bf16.mxu1 %v5563_v43 }
 0x14e   : > { %v5985_v27 = vadd.f32 %v4296_v37, %v4295_v17 }
 0x14f   : > { %4831 = vmatmul.mubr.bf16.gmra.mrb[144].mxu0 %v5163_v9  ;;  %v4380_v10 = vpop.f32.mrb[36].mxu1 }
 0x150   : > { %4834 = vmatprep.mubr.bf16.mxu0 %v5164_v18  ;;  %v4381_v44 = vpop.f32.mrb[37].mxu1 }
 0x151   : > { %v4382_v3 = vadd.f32 %v4381_v44, %v4380_v10  ;;  %v4383_v21 = vpop.f32.mrb[38].mxu1 }
 0x152   : > { %v4298_v32 = vpop.f32.mrb[40].mxu0  ;;  %v4384_v45 = vpop.f32.mrb[39].mxu1 }
 0x153   : > { %v4299_v6 = vpop.f32.mrb[41].mxu0  ;;  %v6004_v24 = vadd.f32 %v4382_v3, %v5904_v14  ;;  %v4385_v29 = vadd.f32 %v4384_v45, %v4383_v21  ;;  %v2386_v3 = vrot.slane %v5917_v0, 1 }
 0x154   : > { %v5993_v60 = vadd.f32 %v4299_v6, %v4298_v32  ;;  %v4301_v7 = vpop.f32.mrb[42].mxu0  ;;  %4783 = vmatmul.mubr.bf16.gmra.mrb[16].mxu1 %v5582_v63  ;;  %v5169_v32 = vld [vmem:[%s5299_s27 + $0x78] sm:$0xff]  }
 0x155   : > { %v4302_v16 = vpop.f32.mrb[43].mxu0  ;;  %v6010_v26 = vadd.f32 %v4385_v29, %v5908_v50  ;;  %4786 = vmatprep.mubr.bf16.mxu1 %v5611_v49 }
 0x156   : > { %v5999_v62 = vadd.f32 %v4302_v16, %v4301_v7 }
 0x157   : > { %4835 = vmatmul.mubr.bf16.gmra.mrb[148].mxu0 %v5165_v59  ;;  %v4386_v2 = vpop.f32.mrb[40].mxu1 }
 0x158   : > { %4838 = vmatprep.mubr.bf16.mxu0 %v5166_v40  ;;  %v4387_v14 = vpop.f32.mrb[41].mxu1  ;;  %v2385_v40 = vrot.slane %v5910_v54, 1 }
 0x159   : > { %v4388_v42 = vadd.f32 %v4387_v14, %v4386_v2  ;;  %v4389_v63 = vpop.f32.mrb[42].mxu1 }
 0x15a   : > { %v4304_v47 = vpop.f32.mrb[44].mxu0  ;;  %v4390_v17 = vpop.f32.mrb[43].mxu1 }
 0x15b   : > { %v4305_v43 = vpop.f32.mrb[45].mxu0  ;;  %v6018_v56 = vadd.f32 %v4388_v42, %v5923_v30  ;;  %v4391_v50 = vadd.f32 %v4390_v17, %v4389_v63 }
 0x15c   : > { %v6007_v52 = vadd.f32 %v4305_v43, %v4304_v47  ;;  %v4307_v1 = vpop.f32.mrb[46].mxu0  ;;  %4787 = vmatmul.mubr.bf16.gmra.mrb[20].mxu1 %v5639_v20 }
 0x15d   : > { %v4308_v28 = vpop.f32.mrb[47].mxu0  ;;  %v6024_v18 = vadd.f32 %v4391_v50, %v5927_v15  ;;  %4790 = vmatprep.mubr.bf16.mxu1 %v5666_v55 }
 0x15e   : > { %v6013_v61 = vadd.f32 %v4308_v28, %v4307_v1 }
 0x15f   : > { %4839 = vmatmul.mubr.bf16.gmra.mrb[152].mxu0 %v5167_v11  ;;  %v4392_v4 = vpop.f32.mrb[44].mxu1 }
 0x160   : > { %4842 = vmatprep.mubr.bf16.mxu0 %v5168_v5  ;;  %v4393_v30 = vpop.f32.mrb[45].mxu1 }
 0x161   : > { %v4394_v23 = vadd.f32 %v4393_v30, %v4392_v4  ;;  %v4395_v6 = vpop.f32.mrb[46].mxu1 }
 0x162   : > { %v4310_v37 = vpop.f32.mrb[48].mxu0  ;;  %v4396_v7 = vpop.f32.mrb[47].mxu1 }
 0x163   : > { %v4311_v9 = vpop.f32.mrb[49].mxu0  ;;  %v6031_v20 = vadd.f32 %v4394_v23, %v5933_v39  ;;  %v4397_v10 = vadd.f32 %v4396_v7, %v4395_v6 }
 0x164   : > { %v6021_v49 = vadd.f32 %v4311_v9, %v4310_v37  ;;  %v4313_v57 = vpop.f32.mrb[50].mxu0  ;;  %4791 = vmatmul.mubr.bf16.gmra.mrb[24].mxu1 %v5702_v58  ;;  %v2387_v58 = vsel %vm1243_vm3, %v2385_v40, %v2386_v3 }
 0x165   : > { %v4314_v48 = vpop.f32.mrb[51].mxu0  ;;  %v6037_v44 = vadd.f32 %v4397_v10, %v5937_v41  ;;  %4794 = vmatprep.mubr.bf16.mxu1 %v5713_v46 }
 0x166   : > { %v6027_v33 = vadd.f32 %v4314_v48, %v4313_v57 }
 0x167   : > { %4843 = vmatmul.mubr.bf16.gmra.mrb[156].mxu0 %v5169_v32  ;;  %v4398_v39 = vpop.f32.mrb[48].mxu1 }
 0x168   : > { %v4399_v47 = vpop.f32.mrb[49].mxu1 }
 0x169   : > { %v4400_v29 = vadd.f32 %v4399_v47, %v4398_v39  ;;  %v4401_v43 = vpop.f32.mrb[50].mxu1 }
 0x16a   : > { %v4316_v16 = vpop.f32.mrb[52].mxu0  ;;  %v4402_v1 = vpop.f32.mrb[51].mxu1 }
 0x16b   : > { %v4317_v59 = vpop.f32.mrb[53].mxu0  ;;  %v6046_v41 = vadd.f32 %v4400_v29, %v5941_v19  ;;  %v4403_v2 = vadd.f32 %v4402_v1, %v4401_v43 }
 0x16c   : > { %v6034_v15 = vadd.f32 %v4317_v59, %v4316_v16  ;;  %v4319_v55 = vpop.f32.mrb[54].mxu0  ;;  %4795 = vmatmul.mubr.bf16.gmra.mrb[28].mxu1 %v2387_v58 }
 0x16d   : > { %v4320_v21 = vpop.f32.mrb[55].mxu0  ;;  %v6051_v11 = vadd.f32 %v4403_v2, %v5945_v13 }
 0x16e   : > { %v6042_v45 = vadd.f32 %v4320_v21, %v4319_v55 }
 0x16f   : > { %v4404_v42 = vpop.f32.mrb[52].mxu1 }
 0x170   : > { %v4405_v63 = vpop.f32.mrb[53].mxu1 }
 0x171   : > { %v4406_v17 = vadd.f32 %v4405_v63, %v4404_v42  ;;  %v4407_v37 = vpop.f32.mrb[54].mxu1 }
 0x172   : > { %v4322_v28 = vpop.f32.mrb[56].mxu0  ;;  %v4408_v50 = vpop.f32.mrb[55].mxu1 }
 0x173   : > { %v4323_v46 = vpop.f32.mrb[57].mxu0  ;;  %v6056_v19 = vadd.f32 %v4406_v17, %v5949_v51  ;;  %v4409_v57 = vadd.f32 %v4408_v50, %v4407_v37 }
 0x174   : > { %v6048_v54 = vadd.f32 %v4323_v46, %v4322_v28  ;;  %v4325_v0 = vpop.f32.mrb[58].mxu0 }
 0x175   : > { %v4326_v14 = vpop.f32.mrb[59].mxu0  ;;  %v6061_v13 = vadd.f32 %v4409_v57, %v5953_v22 }
 0x176   : > { %v6053_v5 = vadd.f32 %v4326_v14, %v4325_v0 }
 0x177   : > { %v4410_v6 = vpop.f32.mrb[56].mxu1 }
 0x178   : > { %v4411_v7 = vpop.f32.mrb[57].mxu1 }
 0x179   : > { %v4412_v16 = vadd.f32 %v4411_v7, %v4410_v6  ;;  %v4413_v10 = vpop.f32.mrb[58].mxu1 }
 0x17a   : > { %v4328_v9 = vpop.f32.mrb[60].mxu0  ;;  %v4414_v59 = vpop.f32.mrb[59].mxu1 }
 0x17b   : > { %v4329_v48 = vpop.f32.mrb[61].mxu0  ;;  %v6066_v51 = vadd.f32 %v4412_v16, %v5957_v53  ;;  %v4415_v40 = vadd.f32 %v4414_v59, %v4413_v10 }
 0x17c   : > { %v6058_v4 = vadd.f32 %v4329_v48, %v4328_v9  ;;  %v4331_v32 = vpop.f32.mrb[62].mxu0 }
 0x17d   : > { %v4332_v30 = vpop.f32.mrb[63].mxu0  ;;  %v6069_v47 = vadd.f32 %v4415_v40, %v5961_v34 }
 0x17e   : > { %v6063_v23 = vadd.f32 %v4332_v30, %v4331_v32 }
 0x17f   : > { %v4416_v58 = vpop.f32.mrb[60].mxu1 }
 0x180   : > { %v4417_v1 = vpop.f32.mrb[61].mxu1 }
 0x181   : > { %v4418_v2 = vadd.f32 %v4417_v1, %v4416_v58  ;;  %v4419_v53 = vpop.f32.mrb[62].mxu1 }
 0x182   : > { %v4510_v55 = vpop.f32.mrb[64].mxu0  ;;  %v4420_v46 = vpop.f32.mrb[63].mxu1 }
 0x183   : > { %v4511_v3 = vpop.f32.mrb[65].mxu0  ;;  %v6078_v14 = vadd.f32 %v4418_v2, %v5965_v12  ;;  %v4421_v42 = vadd.f32 %v4420_v46, %v4419_v53 }
 0x184   : > { %v4512_v21 = vadd.f32 %v4511_v3, %v4510_v55  ;;  %v4513_v39 = vpop.f32.mrb[66].mxu0 }
 0x185   : > { %v4514_v22 = vpop.f32.mrb[67].mxu0  ;;  %v6081_v37 = vadd.f32 %v4421_v42, %v5969_v36 }
 0x186   : > { %v4515_v29 = vadd.f32 %v4514_v22, %v4513_v39  ;;  %v6072_v43 = vadd.f32 %v5990_v8, %v4512_v21 }
 0x188   : > { %v6075_v28 = vadd.f32 %v5996_v35, %v4515_v29  ;;  %v4422_v35 = vpop.f32.mrb[64].mxu1 }
 0x189   : > { %v4423_v57 = vpop.f32.mrb[65].mxu1 }
 0x18a   : > { %v4516_v0 = vpop.f32.mrb[68].mxu0  ;;  %v4424_v32 = vadd.f32 %v4423_v57, %v4422_v35  ;;  %v4425_v12 = vpop.f32.mrb[66].mxu1 }
 0x18b   : > { %v4517_v34 = vpop.f32.mrb[69].mxu0  ;;  %v4426_v30 = vpop.f32.mrb[67].mxu1 }
 0x18c   : > { %v4518_v63 = vadd.f32 %v4517_v34, %v4516_v0  ;;  %v4519_v17 = vpop.f32.mrb[70].mxu0  ;;  %v6090_v7 = vadd.f32 %v4424_v32, %v5974_v25  ;;  %v4427_v16 = vadd.f32 %v4426_v30, %v4425_v12 }
 0x18d   : > { %v4520_v8 = vpop.f32.mrb[71].mxu0 }
 0x18e   : > { %v4521_v50 = vadd.f32 %v4520_v8, %v4519_v17  ;;  %v6084_v9 = vadd.f32 %v6004_v24, %v4518_v63  ;;  %v6093_v55 = vadd.f32 %v4427_v16, %v5977_v38 }
 0x190   : > { %v6087_v48 = vadd.f32 %v6010_v26, %v4521_v50  ;;  %v4428_v26 = vpop.f32.mrb[68].mxu1 }
 0x191   : > { %v4429_v21 = vpop.f32.mrb[69].mxu1 }
 0x192   : > { %v4522_v6 = vpop.f32.mrb[72].mxu0  ;;  %v4430_v22 = vadd.f32 %v4429_v21, %v4428_v26  ;;  %v4431_v25 = vpop.f32.mrb[70].mxu1 }
 0x193   : > { %v4523_v36 = vpop.f32.mrb[73].mxu0  ;;  %v4432_v29 = vpop.f32.mrb[71].mxu1 }
 0x194   : > { %v4524_v10 = vadd.f32 %v4523_v36, %v4522_v6  ;;  %v4525_v59 = vpop.f32.mrb[74].mxu0  ;;  %v6102_v1 = vadd.f32 %v4430_v22, %v5982_v31  ;;  %v4433_v2 = vadd.f32 %v4432_v29, %v4431_v25 }
 0x195   : > { %v4526_v24 = vpop.f32.mrb[75].mxu0 }
 0x196   : > { %v4527_v40 = vadd.f32 %v4526_v24, %v4525_v59  ;;  %v6096_v3 = vadd.f32 %v6018_v56, %v4524_v10  ;;  %v6105_v0 = vadd.f32 %v4433_v2, %v5985_v27 }
 0x198   : > { %v6099_v39 = vadd.f32 %v6024_v18, %v4527_v40  ;;  %v4434_v18 = vpop.f32.mrb[72].mxu1 }
 0x199   : > { %v4435_v63 = vpop.f32.mrb[73].mxu1 }
 0x19a   : > { %v4528_v58 = vpop.f32.mrb[76].mxu0  ;;  %v4436_v8 = vadd.f32 %v4435_v63, %v4434_v18  ;;  %v4437_v31 = vpop.f32.mrb[74].mxu1 }
 0x19b   : > { %v4529_v38 = vpop.f32.mrb[77].mxu0  ;;  %v4438_v50 = vpop.f32.mrb[75].mxu1 }
 0x19c   : > { %v4530_v53 = vadd.f32 %v4529_v38, %v4528_v58  ;;  %v4531_v46 = vpop.f32.mrb[78].mxu0  ;;  %v6114_v57 = vadd.f32 %v4436_v8, %v5993_v60  ;;  %v4439_v32 = vadd.f32 %v4438_v50, %v4437_v31 }
 0x19d   : > { %v4532_v56 = vpop.f32.mrb[79].mxu0 }
 0x19e   : > { %v4533_v42 = vadd.f32 %v4532_v56, %v4531_v46  ;;  %v6108_v34 = vadd.f32 %v6031_v20, %v4530_v53  ;;  %v6117_v6 = vadd.f32 %v4439_v32, %v5999_v62 }
 0x1a0   : > { %v6111_v17 = vadd.f32 %v6037_v44, %v4533_v42  ;;  %v4440_v44 = vpop.f32.mrb[76].mxu1 }
 0x1a1   : > { %v4441_v10 = vpop.f32.mrb[77].mxu1 }
 0x1a2   : > { %v4534_v35 = vpop.f32.mrb[80].mxu0  ;;  %v4442_v24 = vadd.f32 %v4441_v10, %v4440_v44  ;;  %v4443_v60 = vpop.f32.mrb[78].mxu1 }
 0x1a3   : > { %v4535_v27 = vpop.f32.mrb[81].mxu0  ;;  %v4444_v40 = vpop.f32.mrb[79].mxu1 }
 0x1a4   : > { %v4536_v12 = vadd.f32 %v4535_v27, %v4534_v35  ;;  %v4537_v30 = vpop.f32.mrb[82].mxu0  ;;  %v6126_v21 = vadd.f32 %v4442_v24, %v6007_v52  ;;  %v4445_v22 = vadd.f32 %v4444_v40, %v4443_v60 }
 0x1a5   : > { %v4538_v20 = vpop.f32.mrb[83].mxu0 }
 0x1a6   : > { %v4539_v16 = vadd.f32 %v4538_v20, %v4537_v30  ;;  %v6120_v36 = vadd.f32 %v6046_v41, %v4536_v12  ;;  %v6129_v58 = vadd.f32 %v4445_v22, %v6013_v61 }
 0x1a8   : > { %v6123_v59 = vadd.f32 %v6051_v11, %v4539_v16  ;;  %v4446_v11 = vpop.f32.mrb[80].mxu1 }
 0x1a9   : > { %v4447_v53 = vpop.f32.mrb[81].mxu1 }
 0x1aa   : > { %v4540_v26 = vpop.f32.mrb[84].mxu0  ;;  %v4448_v56 = vadd.f32 %v4447_v53, %v4446_v11  ;;  %v4449_v52 = vpop.f32.mrb[82].mxu1 }
 0x1ab   : > { %v4541_v62 = vpop.f32.mrb[85].mxu0  ;;  %v4450_v42 = vpop.f32.mrb[83].mxu1 }
 0x1ac   : > { %v4542_v25 = vadd.f32 %v4541_v62, %v4540_v26  ;;  %v4543_v29 = vpop.f32.mrb[86].mxu0  ;;  %v6138_v63 = vadd.f32 %v4448_v56, %v6021_v49  ;;  %v4451_v8 = vadd.f32 %v4450_v42, %v4449_v52 }
 0x1ad   : > { %v4544_v41 = vpop.f32.mrb[87].mxu0 }
 0x1ae   : > { %v4545_v2 = vadd.f32 %v4544_v41, %v4543_v29  ;;  %v6132_v38 = vadd.f32 %v6056_v19, %v4542_v25  ;;  %v6141_v35 = vadd.f32 %v4451_v8, %v6027_v33 }
 0x1b0   : > { %v6135_v46 = vadd.f32 %v6061_v13, %v4545_v2  ;;  %v4452_v13 = vpop.f32.mrb[84].mxu1 }
 0x1b1   : > { %v4453_v12 = vpop.f32.mrb[85].mxu1 }
 0x1b2   : > { %v4546_v18 = vpop.f32.mrb[88].mxu0  ;;  %v4454_v20 = vadd.f32 %v4453_v12, %v4452_v13  ;;  %v4455_v49 = vpop.f32.mrb[86].mxu1 }
 0x1b3   : > { %v4547_v61 = vpop.f32.mrb[89].mxu0  ;;  %v4456_v16 = vpop.f32.mrb[87].mxu1 }
 0x1b4   : > { %v4548_v31 = vadd.f32 %v4547_v61, %v4546_v18  ;;  %v4549_v50 = vpop.f32.mrb[90].mxu0  ;;  %v6150_v10 = vadd.f32 %v4454_v20, %v6034_v15  ;;  %v4457_v24 = vadd.f32 %v4456_v16, %v4455_v49 }
 0x1b5   : > { %v4550_v19 = vpop.f32.mrb[91].mxu0 }
 0x1b6   : > { %v4551_v32 = vadd.f32 %v4550_v19, %v4549_v50  ;;  %v6144_v27 = vadd.f32 %v6066_v51, %v4548_v31  ;;  %v6153_v26 = vadd.f32 %v4457_v24, %v6042_v45 }
 0x1b8   : > { %v6147_v30 = vadd.f32 %v6069_v47, %v4551_v32  ;;  %v4458_v47 = vpop.f32.mrb[88].mxu1 }
 0x1b9   : > { %v4459_v25 = vpop.f32.mrb[89].mxu1 }
 0x1ba   : > { %v4552_v44 = vpop.f32.mrb[92].mxu0  ;;  %v4460_v41 = vadd.f32 %v4459_v25, %v4458_v47  ;;  %v4461_v15 = vpop.f32.mrb[90].mxu1 }
 0x1bb   : > { %v4553_v33 = vpop.f32.mrb[93].mxu0  ;;  %v4462_v2 = vpop.f32.mrb[91].mxu1 }
 0x1bc   : > { %v4554_v60 = vadd.f32 %v4553_v33, %v4552_v44  ;;  %v4555_v40 = vpop.f32.mrb[94].mxu0  ;;  %v6162_v53 = vadd.f32 %v4460_v41, %v6048_v54  ;;  %v4463_v56 = vadd.f32 %v4462_v2, %v4461_v15 }
 0x1bd   : > { %v4556_v51 = vpop.f32.mrb[95].mxu0 }
 0x1be   : > { %v4557_v22 = vadd.f32 %v4556_v51, %v4555_v40  ;;  %v6156_v62 = vadd.f32 %v6078_v14, %v4554_v60  ;;  %v4939_v18 = vadd.f32 %v4463_v56, %v6053_v5 }
 0x1c0   : > { %v6159_v29 = vadd.f32 %v6081_v37, %v4557_v22  ;;  %v4464_v37 = vpop.f32.mrb[92].mxu1 }
 0x1c1   : > { %v4465_v31 = vpop.f32.mrb[93].mxu1 }
 0x1c2   : > { %v4558_v11 = vpop.f32.mrb[96].mxu0  ;;  %v4466_v19 = vadd.f32 %v4465_v31, %v4464_v37  ;;  %v4467_v32 = vpop.f32.mrb[94].mxu1 }
 0x1c3   : > { %v4559_v45 = vpop.f32.mrb[97].mxu0  ;;  %v4468_v54 = vpop.f32.mrb[95].mxu1 }
 0x1c4   : > { %v4560_v52 = vadd.f32 %v4559_v45, %v4558_v11  ;;  %v4561_v42 = vpop.f32.mrb[98].mxu0  ;;  %v4930_v12 = vadd.f32 %v4466_v19, %v6058_v4  ;;  %v4469_v20 = vadd.f32 %v4468_v54, %v4467_v32 }
 0x1c5   : > { %v4562_v14 = vpop.f32.mrb[99].mxu0 }
 0x1c6   : > { %v4563_v8 = vadd.f32 %v4562_v14, %v4561_v42  ;;  %v6166_v61 = vadd.f32 %v6090_v7, %v4560_v52  ;;  %v4936_v44 = vadd.f32 %v4469_v20, %v6063_v23 }
 0x1c8   : > { %v6169_v50 = vadd.f32 %v6093_v55, %v4563_v8 }
 0x1ca   : > { %v4564_v13 = vpop.f32.mrb[100].mxu0 }
 0x1cb   : > { %v4565_v49 = vpop.f32.mrb[101].mxu0 }
 0x1cc   : > { %v4566_v16 = vadd.f32 %v4565_v49, %v4564_v13  ;;  %v4567_v5 = vpop.f32.mrb[102].mxu0 }
 0x1cd   : > { %v4568_v24 = vpop.f32.mrb[103].mxu0 }
 0x1ce   : > { %v4569_v7 = vadd.f32 %v4568_v24, %v4567_v5  ;;  %v6174_v33 = vadd.f32 %v6102_v1, %v4566_v16 }
 0x1d0   : > { %v6177_v55 = vadd.f32 %v6105_v0, %v4569_v7 }
 0x1d2   : > { %v4570_v60 = vpop.f32.mrb[104].mxu0 }
 0x1d3   : > { %v4571_v40 = vpop.f32.mrb[105].mxu0 }
 0x1d4   : > { %v4572_v51 = vadd.f32 %v4571_v40, %v4570_v60  ;;  %v4573_v22 = vpop.f32.mrb[106].mxu0 }
 0x1d5   : > { %v4574_v47 = vpop.f32.mrb[107].mxu0 }
 0x1d6   : > { %v4575_v4 = vadd.f32 %v4574_v47, %v4573_v22  ;;  %v6180_v25 = vadd.f32 %v6114_v57, %v4572_v51 }
 0x1d8   : > { %v6183_v41 = vadd.f32 %v6117_v6, %v4575_v4 }
 0x1da   : > { %v4576_v23 = vpop.f32.mrb[108].mxu0 }
 0x1db   : > { %v4577_v15 = vpop.f32.mrb[109].mxu0 }
 0x1dc   : > { %v4578_v2 = vadd.f32 %v4577_v15, %v4576_v23  ;;  %v4579_v1 = vpop.f32.mrb[110].mxu0 }
 0x1dd   : > { %v4580_v11 = vpop.f32.mrb[111].mxu0 }
 0x1de   : > { %v4581_v56 = vadd.f32 %v4580_v11, %v4579_v1  ;;  %v6186_v0 = vadd.f32 %v6126_v21, %v4578_v2 }
 0x1e0   : > { %v6189_v45 = vadd.f32 %v6129_v58, %v4581_v56 }
 0x1e2   : > { %v4582_v52 = vpop.f32.mrb[112].mxu0 }
 0x1e3   : > { %v4583_v42 = vpop.f32.mrb[113].mxu0 }
 0x1e4   : > { %v4584_v14 = vadd.f32 %v4583_v42, %v4582_v52  ;;  %v4585_v57 = vpop.f32.mrb[114].mxu0 }
 0x1e5   : > { %v4586_v8 = vpop.f32.mrb[115].mxu0 }
 0x1e6   : > { %v4587_v37 = vadd.f32 %v4586_v8, %v4585_v57  ;;  %v6192_v6 = vadd.f32 %v6138_v63, %v4584_v14 }
 0x1e8   : > { %v6195_v31 = vadd.f32 %v6141_v35, %v4587_v37 }
 0x1ea   : > { %v4588_v19 = vpop.f32.mrb[116].mxu0 }
 0x1eb   : > { %v4589_v32 = vpop.f32.mrb[117].mxu0 }
 0x1ec   : > { %v4590_v54 = vadd.f32 %v4589_v32, %v4588_v19  ;;  %v4591_v21 = vpop.f32.mrb[118].mxu0 }
 0x1ed   : > { %v4592_v13 = vpop.f32.mrb[119].mxu0 }
 0x1ee   : > { %v4593_v20 = vadd.f32 %v4592_v13, %v4591_v21  ;;  %v6198_v58 = vadd.f32 %v6150_v10, %v4590_v54 }
 0x1f0   : > { %v6201_v49 = vadd.f32 %v6153_v26, %v4593_v20 }
 0x1f2   : > { %v4594_v16 = vpop.f32.mrb[120].mxu0 }
 0x1f3   : > { %v4595_v5 = vpop.f32.mrb[121].mxu0 }
 0x1f4   : > { %v4596_v24 = vadd.f32 %v4595_v5, %v4594_v16  ;;  %v4597_v63 = vpop.f32.mrb[122].mxu0 }
 0x1f5   : > { %v4598_v7 = vpop.f32.mrb[123].mxu0 }
 0x1f6   : > { %v4599_v60 = vadd.f32 %v4598_v7, %v4597_v63  ;;  %v6204_v35 = vadd.f32 %v6162_v53, %v4596_v24 }
 0x1f8   : > { %v6206_v40 = vadd.f32 %v4939_v18, %v4599_v60 }
 0x1fa   : > { %v4600_v51 = vpop.f32.mrb[124].mxu0 }
 0x1fb   : > { %v4601_v22 = vpop.f32.mrb[125].mxu0 }
 0x1fc   : > { %v4602_v47 = vadd.f32 %v4601_v22, %v4600_v51  ;;  %v4603_v4 = vpop.f32.mrb[126].mxu0 }
 0x1fd   : > { %v4604_v10 = vpop.f32.mrb[127].mxu0 }
 0x1fe   : > { %v4605_v23 = vadd.f32 %v4604_v10, %v4603_v4  ;;  %v6208_v15 = vadd.f32 %v4930_v12, %v4602_v47 }
 0x200   : > { %v6210_v26 = vadd.f32 %v4936_v44, %v4605_v23 }
 0x202   : > { %v6212_v2 = vpop.f32.mrb[128].mxu0 }
 0x203   : > { %v6214_v1 = vpop.f32.mrb[129].mxu0 }
 0x204   : > { %v6216_v11 = vpop.f32.mrb[130].mxu0 }
 0x205   : > { %v6218_v53 = vpop.f32.mrb[131].mxu0 }
 0x206   : > { %v3478_v18 = vadd.f32 %v6218_v53, %v6214_v1 }
 0x207   : > { %v4768_v37 = vpop.f32.mrb[0].mxu1 }
 0x208   : > { %v3479_v56 = vadd.f32 %v6212_v2, %v3478_v18  ;;  %v6235_v19 = vadd.f32 %v6084_v9, %v4768_v37  ;;  %v2777_v32 = vpop.f32.mrb[1].mxu1 }
 0x209   : > { %v6239_v21 = vadd.f32 %v6072_v43, %v2777_v32  ;;  %v4769_v13 = vpop.f32.mrb[2].mxu1 }
 0x20a   : > { %v6223_v52 = vpop.f32.mrb[132].mxu0  ;;  %v3480_v12 = vadd.f32 %v6216_v11, %v3479_v56  ;;  %6814 = vst [vmem:[#allocation3_spill] sm:$0xff] %v6235_v19  ;;  %v6242_v20 = vadd.f32 %v6087_v48, %v4769_v13  ;;  %v2780_v16 = vpop.f32.mrb[3].mxu1 }
 0x20b   : > { %v6226_v44 = vpop.f32.mrb[133].mxu0  ;;  %6815 = vst [vmem:[#allocation4_spill] sm:$0xff] %v6239_v21  ;;  %v6255_v43 = vadd.f32 %v6075_v28, %v2780_v16 }
 0x20c   : > { %v3481_v42 = vadd.f32 %v3480_v12, %v6226_v44  ;;  %v6229_v14 = vpop.f32.mrb[134].mxu0  ;;  %6816 = vst [vmem:[#allocation5_spill] sm:$0xff] %v6242_v20  ;;  %v4135_v48 = vpack.c.bf16 %v6242_v20, %v6235_v19 }
 0x20d   : > { %v6231_v57 = vpop.f32.mrb[135].mxu0  ;;  %6817 = vst [vmem:[#allocation6_spill] sm:$0xff] %v6255_v43  ;;  %v4130_v60 = vpack.c.bf16 %v6255_v43, %v6239_v21  ;;  %v3096_v51 = vadd.f32 %v6255_v43, %v6239_v21 }
 0x20e   : > { %v3482_v8 = vadd.f32 %v3481_v42, %v6231_v57  ;;  %4207 = vst [vmem:[%s6252_s12 + $0x8] sm:$0xff] %v4135_v48  }
 0x20f   : > { %4131 = vst [vmem:[%s6252_s12] sm:$0xff] %v4130_v60   ;;  %v3097_v47 = vadd.f32 %v6235_v19, %v3096_v51  ;;  %v4772_v4 = vpop.f32.mrb[4].mxu1 }
 0x210   : > { %v3483_v54 = vadd.f32 %v6223_v52, %v3482_v8  ;;  %v6275_v10 = vadd.f32 %v6108_v34, %v4772_v4  ;;  %v2793_v23 = vpop.f32.mrb[5].mxu1 }
 0x211   : > { %v6279_v56 = vadd.f32 %v6096_v3, %v2793_v23  ;;  %v3098_v12 = vadd.f32 %v6242_v20, %v3097_v47  ;;  %v4773_v42 = vpop.f32.mrb[6].mxu1 }
 0x212   : > { %v6244_v5 = vpop.f32.mrb[136].mxu0  ;;  %v3484_v24 = vadd.f32 %v6229_v14, %v3483_v54  ;;  %6818 = vst [vmem:[#allocation7_spill] sm:$0xff] %v6275_v10  ;;  %v6283_v8 = vadd.f32 %v6111_v17, %v4773_v42  ;;  %v2796_v37 = vpop.f32.mrb[7].mxu1 }
 0x213   : > { %v6257_v9 = vpop.f32.mrb[137].mxu0  ;;  %6819 = vst [vmem:[#allocation8_spill] sm:$0xff] %v6279_v56  ;;  %v3099_v54 = vadd.f32 %v6279_v56, %v3098_v12  ;;  %v6290_v13 = vadd.f32 %v6099_v39, %v2796_v37 }
 0x214   : > { %v3485_v63 = vadd.f32 %v3484_v24, %v6257_v9  ;;  %v6262_v7 = vpop.f32.mrb[138].mxu0  ;;  %6820 = vst [vmem:[#allocation9_spill] sm:$0xff] %v6283_v8  ;;  %v4145_v16 = vpack.c.bf16 %v6283_v8, %v6275_v10 }
 0x215   : > { %v6268_v22 = vpop.f32.mrb[139].mxu0  ;;  %6821 = vst [vmem:[#allocation10_spill] sm:$0xff] %v6290_v13  ;;  %v4140_v17 = vpack.c.bf16 %v6290_v13, %v6279_v56 }
 0x216   : > { %v3486_v28 = vadd.f32 %v3485_v63, %v6268_v22  ;;  %v3100_v63 = vadd.f32 %v6290_v13, %v3099_v54  ;;  %4209 = vst [vmem:[%s6252_s12 + $0x18] sm:$0xff] %v4145_v16  }
 0x217   : > { %4208 = vst [vmem:[%s6252_s12 + $0x10] sm:$0xff] %v4140_v17  }
 0x218   : > { %v3487_v18 = vadd.f32 %v6244_v5, %v3486_v28  ;;  %v3101_v51 = vadd.f32 %v6275_v10, %v3100_v63  ;;  %v4776_v28 = vpop.f32.mrb[8].mxu1 }
 0x219   : > { %v6309_v47 = vadd.f32 %v6132_v38, %v4776_v28  ;;  %v2809_v4 = vpop.f32.mrb[9].mxu1 }
 0x21a   : > { %v6285_v32 = vpop.f32.mrb[140].mxu0  ;;  %v3488_v34 = vadd.f32 %v6262_v7, %v3487_v18  ;;  %v6313_v18 = vadd.f32 %v6120_v36, %v2809_v4  ;;  %v3102_v12 = vadd.f32 %v6283_v8, %v3101_v51  ;;  %v4777_v42 = vpop.f32.mrb[10].mxu1 }
 0x21b   : > { %v6292_v3 = vpop.f32.mrb[141].mxu0  ;;  %v6317_v37 = vadd.f32 %v6135_v46, %v4777_v42 }
 0x21c   : > { %v3489_v24 = vadd.f32 %v3488_v34, %v6292_v3  ;;  %v6297_v48 = vpop.f32.mrb[142].mxu0  ;;  %v2812_v34 = vpop.f32.mrb[11].mxu1  ;;  %v3103_v16 = vadd.f32 %v6313_v18, %v3102_v12 }
 0x21d   : > { %v6302_v60 = vpop.f32.mrb[143].mxu0  ;;  %v4155_v17 = vpack.c.bf16 %v6317_v37, %v6309_v47 }
 0x21e   : > { %v3490_v39 = vadd.f32 %v3489_v24, %v6302_v60  ;;  %v6324_v24 = vadd.f32 %v6123_v59, %v2812_v34 }
 0x21f   : > { %4211 = vst [vmem:[%s6252_s12 + $0x28] sm:$0xff] %v4155_v17  }
 0x220   : > { %v3491_v23 = vadd.f32 %v6285_v32, %v3490_v39  ;;  %v4150_v46 = vpack.c.bf16 %v6324_v24, %v6313_v18  ;;  %v3104_v51 = vadd.f32 %v6324_v24, %v3103_v16 }
 0x222   : > { %v6319_v54 = vpop.f32.mrb[144].mxu0  ;;  %v3492_v38 = vadd.f32 %v6297_v48, %v3491_v23  ;;  %4210 = vst [vmem:[%s6252_s12 + $0x20] sm:$0xff] %v4150_v46   ;;  %v3105_v4 = vadd.f32 %v6309_v47, %v3104_v51  ;;  %v4780_v23 = vpop.f32.mrb[12].mxu1 }
 0x223   : > { %v6326_v36 = vpop.f32.mrb[145].mxu0  ;;  %v6343_v12 = vadd.f32 %v6156_v62, %v4780_v23  ;;  %v2825_v42 = vpop.f32.mrb[13].mxu1 }
 0x224   : > { %v3493_v63 = vadd.f32 %v3492_v38, %v6326_v36  ;;  %v6331_v39 = vpop.f32.mrb[146].mxu0  ;;  %v6347_v38 = vadd.f32 %v6144_v27, %v2825_v42  ;;  %v3106_v16 = vadd.f32 %v6317_v37, %v3105_v4  ;;  %v4781_v8 = vpop.f32.mrb[14].mxu1 }
 0x225   : > { %v6336_v28 = vpop.f32.mrb[147].mxu0  ;;  %v6351_v17 = vadd.f32 %v6159_v29, %v4781_v8 }
 0x226   : > { %v3494_v59 = vadd.f32 %v3493_v63, %v6336_v28  ;;  %v2828_v63 = vpop.f32.mrb[15].mxu1  ;;  %v3107_v51 = vadd.f32 %v6347_v38, %v3106_v16 }
 0x227   : > { %v4165_v4 = vpack.c.bf16 %v6351_v17, %v6343_v12 }
 0x228   : > { %v3495_v34 = vadd.f32 %v6319_v54, %v3494_v59  ;;  %v6358_v59 = vadd.f32 %v6147_v30, %v2828_v63  ;;  %v4784_v63 = vpop.f32.mrb[16].mxu1 }
 0x229   : > { %4213 = vst [vmem:[%s6252_s12 + $0x38] sm:$0xff] %v4165_v4   ;;  %v6377_v10 = vadd.f32 %v6174_v33, %v4784_v63 }
 0x22a   : > { %v6353_v46 = vpop.f32.mrb[148].mxu0  ;;  %v3496_v62 = vadd.f32 %v6331_v39, %v3495_v34  ;;  %v4160_v29 = vpack.c.bf16 %v6358_v59, %v6347_v38  ;;  %v3108_v8 = vadd.f32 %v6358_v59, %v3107_v51 }
 0x22b   : > { %v6360_v27 = vpop.f32.mrb[149].mxu0  ;;  %6822 = vst [vmem:[#allocation11_spill] sm:$0xff] %v6377_v10 }
 0x22c   : > { %v3497_v23 = vadd.f32 %v3496_v62, %v6360_v27  ;;  %v6365_v42 = vpop.f32.mrb[150].mxu0  ;;  %4212 = vst [vmem:[%s6252_s12 + $0x30] sm:$0xff] %v4160_v29   ;;  %v3109_v16 = vadd.f32 %v6343_v12, %v3108_v8  ;;  %v2841_v62 = vpop.f32.mrb[17].mxu1 }
 0x22d   : > { %v6370_v34 = vpop.f32.mrb[151].mxu0  ;;  %v6381_v56 = vadd.f32 %v6166_v61, %v2841_v62  ;;  %v4785_v20 = vpop.f32.mrb[18].mxu1 }
 0x22e   : > { %v3498_v30 = vadd.f32 %v3497_v23, %v6370_v34  ;;  %v3110_v51 = vadd.f32 %v6351_v17, %v3109_v16  ;;  %v6385_v4 = vadd.f32 %v6177_v55, %v4785_v20  ;;  %v2844_v23 = vpop.f32.mrb[19].mxu1 }
 0x230   : > { %v3499_v13 = vadd.f32 %v6353_v46, %v3498_v30  ;;  %6823 = vst [vmem:[#allocation12_spill] sm:$0xff] %v6385_v4  ;;  %v3111_v8 = vadd.f32 %v6381_v56, %v3110_v51  ;;  %v6392_v30 = vadd.f32 %v6169_v50, %v2844_v23  ;;  %v4175_v16 = vpack.c.bf16 %v6385_v4, %v6377_v10  ;;  %v4788_v23 = vpop.f32.mrb[20].mxu1 }
 0x231   : > { %v6411_v19 = vadd.f32 %v6186_v0, %v4788_v23 }
 0x232   : > { %v6387_v29 = vpop.f32.mrb[152].mxu0  ;;  %v3500_v33 = vadd.f32 %v6365_v42, %v3499_v13  ;;  %6824 = vst [vmem:[#allocation13_spill] sm:$0xff] %v6392_v30  ;;  %v4170_v55 = vpack.c.bf16 %v6392_v30, %v6381_v56  ;;  %v3112_v20 = vadd.f32 %v6392_v30, %v3111_v8  ;;  %4215 = vst [vmem:[%s6252_s12 + $0x48] sm:$0xff] %v4175_v16  }
 0x233   : > { %v6394_v61 = vpop.f32.mrb[153].mxu0  ;;  %6825 = vst [vmem:[#allocation14_spill] sm:$0xff] %v6411_v19 }
 0x234   : > { %v3501_v63 = vadd.f32 %v3500_v33, %v6394_v61  ;;  %v6399_v62 = vpop.f32.mrb[154].mxu0  ;;  %4214 = vst [vmem:[%s6252_s12 + $0x40] sm:$0xff] %v4170_v55   ;;  %v3113_v51 = vadd.f32 %v6377_v10, %v3112_v20  ;;  %v2857_v33 = vpop.f32.mrb[21].mxu1 }
 0x235   : > { %v6404_v13 = vpop.f32.mrb[155].mxu0  ;;  %v6415_v21 = vadd.f32 %v6180_v25, %v2857_v33  ;;  %v4789_v30 = vpop.f32.mrb[22].mxu1 }
 0x236   : > { %v3502_v50 = vadd.f32 %v3501_v63, %v6404_v13  ;;  %v3114_v8 = vadd.f32 %v6385_v4, %v3113_v51  ;;  %v6419_v16 = vadd.f32 %v6189_v45, %v4789_v30  ;;  %v2860_v63 = vpop.f32.mrb[23].mxu1 }
 0x237   : > { %6826 = vst [vmem:[#allocation15_spill] sm:$0xff] %v6415_v21 }
 0x238   : > { %v3503_v43 = vadd.f32 %v6387_v29, %v3502_v50  ;;  %v3115_v20 = vadd.f32 %v6415_v21, %v3114_v8  ;;  %v6426_v50 = vadd.f32 %v6183_v41, %v2860_v63  ;;  %v4185_v51 = vpack.c.bf16 %v6419_v16, %v6411_v19  ;;  %v4792_v63 = vpop.f32.mrb[24].mxu1 }
 0x239   : > { %v6445_v4 = vadd.f32 %v6198_v58, %v4792_v63 }
 0x23a   : > { %v6421_v55 = vpop.f32.mrb[156].mxu0  ;;  %v3504_v0 = vadd.f32 %v6399_v62, %v3503_v43  ;;  %v4180_v45 = vpack.c.bf16 %v6426_v50, %v6415_v21  ;;  %v3116_v30 = vadd.f32 %v6426_v50, %v3115_v20  ;;  %4217 = vst [vmem:[%s6252_s12 + $0x58] sm:$0xff] %v4185_v51  }
 0x23b   : > { %v6428_v25 = vpop.f32.mrb[157].mxu0 }
 0x23c   : > { %v3505_v23 = vadd.f32 %v3504_v0, %v6428_v25  ;;  %v6433_v33 = vpop.f32.mrb[158].mxu0  ;;  %4216 = vst [vmem:[%s6252_s12 + $0x50] sm:$0xff] %v4180_v45   ;;  %v3117_v8 = vadd.f32 %v6411_v19, %v3116_v30  ;;  %v2873_v0 = vpop.f32.mrb[25].mxu1 }
 0x23d   : > { %v6438_v43 = vpop.f32.mrb[159].mxu0  ;;  %v6449_v21 = vadd.f32 %v6192_v6, %v2873_v0  ;;  %v4793_v51 = vpop.f32.mrb[26].mxu1 }
 0x23e   : > { %v3506_v41 = vadd.f32 %v3505_v23, %v6438_v43  ;;  %v3118_v20 = vadd.f32 %v6419_v16, %v3117_v8  ;;  %v6453_v23 = vadd.f32 %v6201_v49, %v4793_v51  ;;  %v2876_v45 = vpop.f32.mrb[27].mxu1 }
 0x23f   : > { %6827 = vst [vmem:[#allocation16_spill] sm:$0xff] %v6449_v21  ;;  %v6458_v58 = vadd.f32 %v6195_v31, %v2876_v45 }
 0x240   : > { %v3507_v10 = vadd.f32 %v6421_v55, %v3506_v41  ;;  %v3119_v19 = vadd.f32 %v6449_v21, %v3118_v20  ;;  %v4195_v41 = vpack.c.bf16 %v6453_v23, %v6445_v4 }
 0x241   : > { %v4190_v6 = vpack.c.bf16 %v6458_v58, %v6449_v21 }
 0x242   : > { %v3508_v30 = vadd.f32 %v6433_v33, %v3507_v10  ;;  %v3120_v8 = vadd.f32 %v6458_v58, %v3119_v19  ;;  %4219 = vst [vmem:[%s6252_s12 + $0x68] sm:$0xff] %v4195_v41   ;;  %v4796_v10 = vpop.f32.mrb[28].mxu1 }
 0x243   : > { %4218 = vst [vmem:[%s6252_s12 + $0x60] sm:$0xff] %v4190_v6   ;;  %v6469_v20 = vadd.f32 %v6208_v15, %v4796_v10  ;;  %v2889_v31 = vpop.f32.mrb[29].mxu1 }
 0x244   : > { %v3509_v63 = vrot.slane %v3508_v30, 4  ;;  %v3121_v0 = vadd.f32 %v6445_v4, %v3120_v8  ;;  %v6472_v45 = vadd.f32 %v6204_v35, %v2889_v31  ;;  %v4797_v19 = vpop.f32.mrb[30].mxu1 }
 0x245   : > { %v2892_v41 = vpop.f32.mrb[31].mxu1 }
 0x246   : > { %v3510_v49 = vadd.f32 %v3509_v63, %v3508_v30  ;;  %v3122_v21 = vadd.f32 %v6453_v23, %v3121_v0  ;;  %v6476_v30 = vadd.f32 %v6210_v26, %v4797_v19  ;;  %v6480_v15 = vadd.f32 %v6206_v40, %v2892_v41 }
 0x248   : > { %v3511_v51 = vrot.slane %v3510_v49, 2  ;;  %v3123_v6 = vadd.f32 %v6472_v45, %v3122_v21  ;;  %v4205_v8 = vpack.c.bf16 %v6476_v30, %v6469_v20  ;;  %v4200_v35 = vpack.c.bf16 %v6480_v15, %v6472_v45 }
 0x24a   : > { %v3512_v63 = vadd.f32 %v3511_v51, %v3510_v49  ;;  %v3124_v0 = vadd.f32 %v6480_v15, %v3123_v6  ;;  %4221 = vst [vmem:[%s6252_s12 + $0x78] sm:$0xff] %v4205_v8   ;;  %4220 = vst [vmem:[%s6252_s12 + $0x70] sm:$0xff] %v4200_v35  }
 0x24c   : > { %v3513_v10 = vrot.slane %v3512_v63, 1  ;;  %v3125_v26 = vadd.f32 %v6469_v20, %v3124_v0 }
 0x24e   : > { %v3514_v31 = vadd.f32 %v3513_v10, %v3512_v63  ;;  %v3126_v21 = vadd.f32 %v6476_v30, %v3125_v26 }
 0x250   : > { %v3515_v40 = vmul.f32 0.00390625, %v3514_v31  ;;  %v3127_v63 = vrot.slane %v3126_v21, 4 }
 0x252   : > { %3516 = vst [vmem:[%s308_s14] sm:$0x1] %v3515_v40  ;;  %v6496_v49 = vsub.f32 %v6214_v1, %v3515_v40  ;;  %v6499_v51 = vsub.f32 %v6218_v53, %v3515_v40  ;;  %v6502_v19 = vsub.f32 %v6212_v2, %v3515_v40  ;;  %v6505_v41 = vsub.f32 %v6216_v11, %v3515_v40 }
 0x253   : > { %v6508_v6 = vsub.f32 %v6226_v44, %v3515_v40  ;;  %v6511_v8 = vsub.f32 %v6231_v57, %v3515_v40  ;;  %v6514_v10 = vsub.f32 %v6223_v52, %v3515_v40  ;;  %v6517_v1 = vsub.f32 %v6229_v14, %v3515_v40 }
 0x254   : > { %v6520_v53 = vsub.f32 %v6257_v9, %v3515_v40  ;;  %v6523_v2 = vsub.f32 %v6268_v22, %v3515_v40  ;;  %v6526_v11 = vsub.f32 %v6244_v5, %v3515_v40  ;;  %v3128_v44 = vadd.f32 %v3127_v63, %v3126_v21 }
 0x255   : > { %v6529_v35 = vsub.f32 %v6262_v7, %v3515_v40  ;;  %v6532_v57 = vsub.f32 %v6292_v3, %v3515_v40  ;;  %v6535_v52 = vsub.f32 %v6302_v60, %v3515_v40  ;;  %v6538_v14 = vsub.f32 %v6285_v32, %v3515_v40 }
 0x256   : > { %v6541_v9 = vsub.f32 %v6297_v48, %v3515_v40  ;;  %v6544_v22 = vsub.f32 %v6326_v36, %v3515_v40  ;;  %v6547_v5 = vsub.f32 %v6336_v28, %v3515_v40  ;;  %v3129_v7 = vrot.slane %v3128_v44, 2 }
 0x257   : > { %v6550_v0 = vsub.f32 %v6319_v54, %v3515_v40  ;;  %v6553_v3 = vsub.f32 %v6331_v39, %v3515_v40  ;;  %v6556_v32 = vsub.f32 %v6360_v27, %v3515_v40  ;;  %v6559_v48 = vsub.f32 %v6370_v34, %v3515_v40 }
 0x258   : > { %v6562_v60 = vsub.f32 %v6353_v46, %v3515_v40  ;;  %v6565_v36 = vsub.f32 %v6365_v42, %v3515_v40  ;;  %v6568_v28 = vsub.f32 %v6394_v61, %v3515_v40  ;;  %v3130_v54 = vadd.f32 %v3129_v7, %v3128_v44 }
 0x259   : > { %v6571_v39 = vsub.f32 %v6404_v13, %v3515_v40  ;;  %v6574_v31 = vsub.f32 %v6387_v29, %v3515_v40  ;;  %v6577_v27 = vsub.f32 %v6399_v62, %v3515_v40  ;;  %v6580_v34 = vsub.f32 %v6428_v25, %v3515_v40 }
 0x25a   : > { %6828 = vst [vmem:[#allocation17_spill] sm:$0xff] %v6568_v28  ;;  %v6583_v46 = vsub.f32 %v6438_v43, %v3515_v40  ;;  %v6586_v42 = vsub.f32 %v6421_v55, %v3515_v40  ;;  %v6589_v61 = vsub.f32 %v6433_v33, %v3515_v40  ;;  %v3131_v13 = vrot.slane %v3130_v54, 1  ;;  %v6855_v28 = vld [vmem:[#allocation9_spill] sm:$0xff] }
 0x25b   : > { %6829 = vst [vmem:[#allocation18_spill] sm:$0xff] %v6571_v39  ;;  %6830 = vst [vmem:[#allocation19_spill] sm:$0xff] %v6574_v31  ;;  %v6851_v31 = vld [vmem:[#allocation5_spill] sm:$0xff] }
 0x25c   : > { %6831 = vst [vmem:[#allocation20_spill] sm:$0xff] %v6577_v27  ;;  %6832 = vst [vmem:[#allocation21_spill] sm:$0xff] %v6580_v34  ;;  %v3132_v26 = vadd.f32 %v3131_v13, %v3130_v54 }
 0x25d   : > { %6833 = vst [vmem:[#allocation22_spill] sm:$0xff] %v6583_v46  ;;  %6834 = vst [vmem:[#allocation23_spill] sm:$0xff] %v6586_v42  ;;  %v6849_v42 = vld [vmem:[#allocation6_spill] sm:$0xff]  ;;  %v6850_v46 = vld [vmem:[#allocation3_spill] sm:$0xff] }
 0x25e   : > { %6835 = vst [vmem:[#allocation24_spill] sm:$0xff] %v6589_v61  ;;  %v3133_v29 = vmul.f32 0.00390625, %v3132_v26  ;;  %v6841_v26 = vld [vmem:[#allocation16_spill] sm:$0xff] }
 0x260   : > { %3134 = vst [vmem:[%s302_s18] sm:$0x1] %v3133_v29  ;;  %v3143_v62 = vsub.f32 %v6313_v18, %v3133_v29  ;;  %v3144_v25 = vsub.f32 %v6324_v24, %v3133_v29  ;;  %v6598_v43 = vsub.f32 %v6309_v47, %v3133_v29  ;;  %v6601_v55 = vsub.f32 %v6317_v37, %v3133_v29  ;;  %v6836_v47 = vld [vmem:[#allocation13_spill] sm:$0xff]  ;;  %v6837_v37 = vld [vmem:[#allocation11_spill] sm:$0xff] }
 0x261   : > { %v6604_v33 = vsub.f32 %v6347_v38, %v3133_v29  ;;  %v6607_v40 = vsub.f32 %v6358_v59, %v3133_v29  ;;  %v6610_v21 = vsub.f32 %v6343_v12, %v3133_v29  ;;  %v6613_v63 = vsub.f32 %v6351_v17, %v3133_v29  ;;  %v6838_v38 = vld [vmem:[#allocation12_spill] sm:$0xff]  ;;  %v6839_v59 = vld [vmem:[#allocation15_spill] sm:$0xff]  ;;  %v6840_v17 = vld [vmem:[#allocation14_spill] sm:$0xff] }
 0x262   : > { %v6616_v18 = vsub.f32 %v6381_v56, %v3133_v29  ;;  %v6619_v24 = vsub.f32 %v6836_v47, %v3133_v29  ;;  %v6622_v44 = vsub.f32 %v6837_v37, %v3133_v29  ;;  %v6625_v7 = vsub.f32 %v6838_v38, %v3133_v29 }
 0x263   : > { %v6628_v54 = vsub.f32 %v6839_v59, %v3133_v29  ;;  %v6631_v12 = vsub.f32 %v6426_v50, %v3133_v29  ;;  %v6634_v13 = vsub.f32 %v6840_v17, %v3133_v29  ;;  %v6637_v56 = vsub.f32 %v6419_v16, %v3133_v29 }
 0x264   : > { %v6640_v47 = vsub.f32 %v6841_v26, %v3133_v29  ;;  %v6643_v37 = vsub.f32 %v6458_v58, %v3133_v29  ;;  %v6646_v38 = vsub.f32 %v6445_v4, %v3133_v29  ;;  %v6649_v59 = vsub.f32 %v6453_v23, %v3133_v29  ;;  %v6848_v58 = vld [vmem:[#allocation4_spill] sm:$0xff] }
 0x265   : > { %v6652_v50 = vsub.f32 %v6472_v45, %v3133_v29  ;;  %v6655_v17 = vsub.f32 %v6480_v15, %v3133_v29  ;;  %v6658_v16 = vsub.f32 %v6469_v20, %v3133_v29  ;;  %v6661_v26 = vsub.f32 %v6476_v30, %v3133_v29 }
 0x266   : > { %6842 = vst [vmem:[#allocation13_spill] sm:$0xff] %v6646_v38  ;;  %6843 = vst [vmem:[#allocation11_spill] sm:$0xff] %v6649_v59  ;;  %v3135_v61 = vsub.f32 %v6848_v58, %v3133_v29  ;;  %v3136_v4 = vsub.f32 %v6849_v42, %v3133_v29  ;;  %v3137_v34 = vsub.f32 %v6850_v46, %v3133_v29 }
 0x267   : > { %6844 = vst [vmem:[#allocation12_spill] sm:$0xff] %v6652_v50  ;;  %6845 = vst [vmem:[#allocation15_spill] sm:$0xff] %v6655_v17  ;;  %v3138_v45 = vsub.f32 %v6851_v31, %v3133_v29  ;;  %v3549_v15 = vmul.f32 %v6496_v49, %v6496_v49  ;;  %v3550_v20 = vmul.f32 %v6499_v51, %v6499_v51  ;;  %v6853_v50 = vld [vmem:[#allocation10_spill] sm:$0xff] }
 0x268   : > { %6846 = vst [vmem:[#allocation14_spill] sm:$0xff] %v6658_v16  ;;  %6847 = vst [vmem:[#allocation16_spill] sm:$0xff] %v6661_v26  ;;  %v3167_v23 = vmul.f32 %v3135_v61, %v3135_v61  ;;  %v3168_v27 = vmul.f32 %v3136_v4, %v3136_v4  ;;  %v6852_v16 = vld [vmem:[#allocation8_spill] sm:$0xff]  ;;  %v3169_v30 = vmul.f32 %v3137_v34, %v3137_v34  ;;  %v6854_v4 = vld [vmem:[#allocation7_spill] sm:$0xff] }
 0x269   : > { %v3139_v17 = vsub.f32 %v6852_v16, %v3133_v29  ;;  %v3140_v58 = vsub.f32 %v6853_v50, %v3133_v29  ;;  %v3170_v59 = vmul.f32 %v3138_v45, %v3138_v45  ;;  %v3551_v46 = vmul.f32 %v6502_v19, %v6502_v19 }
 0x26a   : > { %v3199_v26 = vadd.f32 %v3168_v27, %v3167_v23  ;;  %v3581_v61 = vadd.f32 %v3550_v20, %v3549_v15  ;;  %v3141_v31 = vsub.f32 %v6854_v4, %v3133_v29  ;;  %v3552_v49 = vmul.f32 %v6505_v41, %v6505_v41 }
 0x26b   : > { %v3171_v39 = vmul.f32 %v3139_v17, %v3139_v17  ;;  %v3142_v16 = vsub.f32 %v6855_v28, %v3133_v29  ;;  %v3172_v34 = vmul.f32 %v3140_v58, %v3140_v58  ;;  %v3553_v50 = vmul.f32 %v6508_v6, %v6508_v6 }
 0x26c   : > { %v3200_v42 = vadd.f32 %v3199_v26, %v3169_v30  ;;  %v3582_v51 = vadd.f32 %v3581_v61, %v3551_v46  ;;  %v3173_v23 = vmul.f32 %v3141_v31, %v3141_v31  ;;  %v3554_v19 = vmul.f32 %v6511_v8, %v6511_v8 }
 0x26d   : > { %v3174_v17 = vmul.f32 %v3142_v16, %v3142_v16  ;;  %v3555_v41 = vmul.f32 %v6514_v10, %v6514_v10  ;;  %v3175_v30 = vmul.f32 %v3143_v62, %v3143_v62  ;;  %v3176_v6 = vmul.f32 %v3144_v25, %v3144_v25 }
 0x26e   : > { %v3201_v38 = vadd.f32 %v3200_v42, %v3170_v59  ;;  %v3583_v26 = vadd.f32 %v3582_v51, %v3552_v49  ;;  %v3557_v58 = vmul.f32 %v6520_v53, %v6520_v53  ;;  %v3177_v8 = vmul.f32 %v6598_v43, %v6598_v43 }
 0x26f   : > { %v3558_v10 = vmul.f32 %v6523_v2, %v6523_v2  ;;  %v3178_v62 = vmul.f32 %v6601_v55, %v6601_v55  ;;  %v3179_v53 = vmul.f32 %v6604_v33, %v6604_v33  ;;  %v3560_v43 = vmul.f32 %v6529_v35, %v6529_v35 }
 0x270   : > { %v3202_v27 = vadd.f32 %v3201_v38, %v3171_v39  ;;  %v3584_v15 = vadd.f32 %v3583_v26, %v3553_v50  ;;  %v3556_v39 = vmul.f32 %v6517_v1, %v6517_v1  ;;  %v3559_v1 = vmul.f32 %v6526_v11, %v6526_v11 }
 0x271   : > { %v3180_v2 = vmul.f32 %v6607_v40, %v6607_v40  ;;  %v3561_v55 = vmul.f32 %v6532_v57, %v6532_v57  ;;  %v3181_v11 = vmul.f32 %v6610_v21, %v6610_v21  ;;  %v3562_v33 = vmul.f32 %v6535_v52, %v6535_v52 }
 0x272   : > { %v3203_v45 = vadd.f32 %v3202_v27, %v3172_v34  ;;  %v3585_v20 = vadd.f32 %v3584_v15, %v3554_v19  ;;  %v3182_v35 = vmul.f32 %v6613_v63, %v6613_v63  ;;  %v3563_v40 = vmul.f32 %v6538_v14, %v6538_v14 }
 0x273   : > { %v3183_v57 = vmul.f32 %v6616_v18, %v6616_v18  ;;  %v3564_v21 = vmul.f32 %v6541_v9, %v6541_v9  ;;  %v3184_v52 = vmul.f32 %v6619_v24, %v6619_v24  ;;  %v3565_v63 = vmul.f32 %v6544_v22, %v6544_v22 }
 0x274   : > { %v3204_v59 = vadd.f32 %v3203_v45, %v3173_v23  ;;  %v3586_v29 = vadd.f32 %v3585_v20, %v3555_v41  ;;  %v3185_v14 = vmul.f32 %v6622_v44, %v6622_v44  ;;  %v3566_v18 = vmul.f32 %v6547_v5, %v6547_v5 }
 0x275   : > { %v3186_v9 = vmul.f32 %v6625_v7, %v6625_v7  ;;  %v3567_v24 = vmul.f32 %v6550_v0, %v6550_v0  ;;  %v3187_v22 = vmul.f32 %v6628_v54, %v6628_v54  ;;  %v3568_v44 = vmul.f32 %v6553_v3, %v6553_v3 }
 0x276   : > { %v3205_v28 = vadd.f32 %v3204_v59, %v3174_v17  ;;  %v3587_v42 = vadd.f32 %v3586_v29, %v3556_v39  ;;  %v3188_v5 = vmul.f32 %v6631_v12, %v6631_v12  ;;  %v3569_v7 = vmul.f32 %v6556_v32, %v6556_v32 }
 0x277   : > { %v3189_v0 = vmul.f32 %v6634_v13, %v6634_v13  ;;  %v3570_v54 = vmul.f32 %v6559_v48, %v6559_v48  ;;  %v3190_v3 = vmul.f32 %v6637_v56, %v6637_v56  ;;  %v3571_v12 = vmul.f32 %v6562_v60, %v6562_v60 }
 0x278   : > { %v3206_v38 = vadd.f32 %v3205_v28, %v3175_v30  ;;  %v3588_v61 = vadd.f32 %v3587_v42, %v3557_v58  ;;  %v3191_v32 = vmul.f32 %v6640_v47, %v6640_v47  ;;  %v3572_v13 = vmul.f32 %v6565_v36, %v6565_v36 }
 0x279   : > { %v3192_v48 = vmul.f32 %v6643_v37, %v6643_v37 }
 0x27a   : > { %v3207_v46 = vadd.f32 %v3206_v38, %v3176_v6  ;;  %v3589_v25 = vadd.f32 %v3588_v61, %v3558_v10  ;;  %v6856_v61 = vld [vmem:[#allocation17_spill] sm:$0xff] }
 0x27b   : > { %v3573_v56 = vmul.f32 %v6856_v61, %v6856_v61 }
 0x27c   : > { %v3208_v4 = vadd.f32 %v3207_v46, %v3177_v8  ;;  %v3590_v49 = vadd.f32 %v3589_v25, %v3559_v1  ;;  %v6858_v25 = vld [vmem:[#allocation18_spill] sm:$0xff] }
 0x27d   : > { %v3574_v47 = vmul.f32 %v6858_v25, %v6858_v25 }
 0x27e   : > { %v3209_v31 = vadd.f32 %v3208_v4, %v3178_v62  ;;  %v3591_v16 = vadd.f32 %v3590_v49, %v3560_v43  ;;  %v6857_v4 = vld [vmem:[#allocation13_spill] sm:$0xff]  ;;  %v6860_v49 = vld [vmem:[#allocation19_spill] sm:$0xff] }
 0x27f   : > { %v3193_v60 = vmul.f32 %v6857_v4, %v6857_v4  ;;  %v3575_v37 = vmul.f32 %v6860_v49, %v6860_v49 }
 0x280   : > { %v3210_v51 = vadd.f32 %v3209_v31, %v3179_v53  ;;  %v3592_v27 = vadd.f32 %v3591_v16, %v3561_v55  ;;  %v6859_v31 = vld [vmem:[#allocation11_spill] sm:$0xff] }
 0x281   : > { %v3194_v36 = vmul.f32 %v6859_v31, %v6859_v31 }
 0x282   : > { %v3211_v34 = vadd.f32 %v3210_v51, %v3180_v2  ;;  %v3593_v26 = vadd.f32 %v3592_v27, %v3562_v33  ;;  %v6861_v51 = vld [vmem:[#allocation12_spill] sm:$0xff]  ;;  %v6863_v27 = vld [vmem:[#allocation15_spill] sm:$0xff] }
 0x283   : > { %v3195_v55 = vmul.f32 %v6861_v51, %v6861_v51 }
 0x284   : > { %v3212_v50 = vadd.f32 %v3211_v34, %v3181_v11  ;;  %v3594_v45 = vadd.f32 %v3593_v26, %v3563_v40  ;;  %v6862_v11 = vld [vmem:[#allocation20_spill] sm:$0xff]  ;;  %v6864_v40 = vld [vmem:[#allocation21_spill] sm:$0xff] }
 0x285   : > { %v3576_v34 = vmul.f32 %v6862_v11, %v6862_v11  ;;  %v3577_v26 = vmul.f32 %v6864_v40, %v6864_v40 }
 0x286   : > { %v3213_v23 = vadd.f32 %v3212_v50, %v3182_v35  ;;  %v3595_v15 = vadd.f32 %v3594_v45, %v3564_v21  ;;  %v3196_v35 = vmul.f32 %v6863_v27, %v6863_v27 }
 0x288   : > { %v3214_v19 = vadd.f32 %v3213_v23, %v3183_v57  ;;  %v3596_v59 = vadd.f32 %v3595_v15, %v3565_v63  ;;  %v6865_v23 = vld [vmem:[#allocation14_spill] sm:$0xff]  ;;  %v6867_v15 = vld [vmem:[#allocation16_spill] sm:$0xff] }
 0x289   : > { %v3197_v21 = vmul.f32 %v6865_v23, %v6865_v23 }
 0x28a   : > { %v3215_v17 = vadd.f32 %v3214_v19, %v3184_v52  ;;  %v3597_v20 = vadd.f32 %v3596_v59, %v3566_v18  ;;  %v6866_v52 = vld [vmem:[#allocation22_spill] sm:$0xff]  ;;  %v6868_v18 = vld [vmem:[#allocation23_spill] sm:$0xff] }
 0x28b   : > { %v3578_v19 = vmul.f32 %v6866_v52, %v6866_v52  ;;  %v3579_v59 = vmul.f32 %v6868_v18, %v6868_v18 }
 0x28c   : > { %v3216_v41 = vadd.f32 %v3215_v17, %v3185_v14  ;;  %v3598_v28 = vadd.f32 %v3597_v20, %v3567_v24  ;;  %v3198_v14 = vmul.f32 %v6867_v15, %v6867_v15  ;;  %v6869_v24 = vld [vmem:[#allocation24_spill] sm:$0xff] }
 0x28d   : > { %v3580_v20 = vmul.f32 %v6869_v24, %v6869_v24 }
 0x28e   : > { %v3217_v30 = vadd.f32 %v3216_v41, %v3186_v9  ;;  %v3599_v29 = vadd.f32 %v3598_v28, %v3568_v44 }
 0x290   : > { %v3218_v39 = vadd.f32 %v3217_v30, %v3187_v22  ;;  %v3600_v38 = vadd.f32 %v3599_v29, %v3569_v7 }
 0x292   : > { %v3219_v6 = vadd.f32 %v3218_v39, %v3188_v5  ;;  %v3601_v42 = vadd.f32 %v3600_v38, %v3570_v54 }
 0x294   : > { %v3220_v58 = vadd.f32 %v3219_v6, %v3189_v0  ;;  %v3602_v46 = vadd.f32 %v3601_v42, %v3571_v12 }
 0x296   : > { %v3221_v8 = vadd.f32 %v3220_v58, %v3190_v3  ;;  %v3603_v62 = vadd.f32 %v3602_v46, %v3572_v13 }
 0x298   : > { %v3222_v10 = vadd.f32 %v3221_v8, %v3191_v32  ;;  %v3604_v53 = vadd.f32 %v3603_v62, %v3573_v56 }
 0x29a   : > { %v3223_v1 = vadd.f32 %v3222_v10, %v3192_v48  ;;  %v3605_v2 = vadd.f32 %v3604_v53, %v3574_v47 }
 0x29c   : > { %v3224_v43 = vadd.f32 %v3223_v1, %v3193_v60  ;;  %v3606_v33 = vadd.f32 %v3605_v2, %v3575_v37 }
 0x29e   : > { %v3225_v16 = vadd.f32 %v3224_v43, %v3194_v36  ;;  %v3607_v57 = vadd.f32 %v3606_v33, %v3576_v34 }
 0x2a0   : > { %v3226_v50 = vadd.f32 %v3225_v16, %v3195_v55  ;;  %v3608_v63 = vadd.f32 %v3607_v57, %v3577_v26 }
 0x2a2   : > { %v3227_v45 = vadd.f32 %v3226_v50, %v3196_v35  ;;  %v3609_v9 = vadd.f32 %v3608_v63, %v3578_v19 }
 0x2a4   : > { %v3228_v17 = vadd.f32 %v3227_v45, %v3197_v21  ;;  %v3610_v22 = vadd.f32 %v3609_v9, %v3579_v59 }
 0x2a6   : > { %v3229_v41 = vadd.f32 %v3228_v17, %v3198_v14  ;;  %v3611_v44 = vadd.f32 %v3610_v22, %v3580_v20 }
 0x2a8   : > { %v3230_v30 = vrot.slane %v3229_v41, 4  ;;  %v3612_v5 = vrot.slane %v3611_v44, 4 }
 0x2aa   : > { %v3231_v28 = vadd.f32 %v3230_v30, %v3229_v41  ;;  %v3613_v7 = vadd.f32 %v3612_v5, %v3611_v44 }
 0x2ac   : > { %v3232_v39 = vrot.slane %v3231_v28, 2  ;;  %v3614_v0 = vrot.slane %v3613_v7, 2 }
 0x2ae   : > { %v3233_v29 = vadd.f32 %v3232_v39, %v3231_v28  ;;  %v3615_v54 = vadd.f32 %v3614_v0, %v3613_v7 }
 0x2b0   : > { %v3234_v6 = vrot.slane %v3233_v29, 1  ;;  %v3616_v3 = vrot.slane %v3615_v54, 1 }
 0x2b2   : > { %v3235_v38 = vadd.f32 %v3234_v6, %v3233_v29  ;;  %v3617_v58 = vadd.f32 %v3616_v3, %v3615_v54 }
 0x2b4   : > { %3236 = vst [vmem:[%s305_s21] sm:$0x1] %v3235_v38  ;;  %3618 = vst [vmem:[%s311_s26] sm:$0x1] %v3617_v58 }
 0x2b5 PF: > { %s18_s24 = sadd.s32 1, %s5176_s24  }
 0x2b6   : > { %p15_p4 = scmp.ge.s32.totalorder %s18_s24, 4  }
 0x2b8   :  { %17 = sbr.rel (!%p15_p4) target bundleno = 1 (0x1), region = 114 }

</bundles_post_ra>
